<compile_context>
chip_gen: v7x
topology: tpu7x:2x2x1
jax: 0.10.0
libtpu: 0.0.40
codegen_flags: <defaults>
</compile_context>

<pallas_src>
import functools

import jax
import jax.numpy as jnp
from jax import lax
from jax.experimental import pallas as pl
from jax.experimental.pallas import tpu as pltpu

TM = 128  # max rows (M tile) per GEMM grid step


# ---------------------------------------------------------------------------
# Pallas kernels
# ---------------------------------------------------------------------------
def _gemm_kernel(x_ref, w_ref, b_ref, o_ref, *, relu):
    acc = jnp.dot(x_ref[...], w_ref[...], preferred_element_type=jnp.float32)
    acc = acc + b_ref[...]
    if relu:
        acc = jnp.maximum(acc, 0.0)
    o_ref[...] = acc.astype(o_ref.dtype)


def _gemm_res_kernel(x_ref, w_ref, b_ref, r_ref, o_ref, *, relu):
    acc = jnp.dot(x_ref[...], w_ref[...], preferred_element_type=jnp.float32)
    acc = acc + b_ref[...] + r_ref[...].astype(jnp.float32)
    if relu:
        acc = jnp.maximum(acc, 0.0)
    o_ref[...] = acc.astype(o_ref.dtype)


def _gemm_res_proj_kernel(x_ref, w_ref, b_ref, xs_ref, ws_ref, bs_ref, o_ref, *, relu):
    # relu( x @ w + b  +  (xs @ ws + bs) ): conv2 + projected (downsample) shortcut fused.
    acc = jnp.dot(x_ref[...], w_ref[...], preferred_element_type=jnp.float32)
    acc = acc + b_ref[...]
    acc = acc + jnp.dot(xs_ref[...], ws_ref[...], preferred_element_type=jnp.float32)
    acc = acc + bs_ref[...]
    if relu:
        acc = jnp.maximum(acc, 0.0)
    o_ref[...] = acc.astype(o_ref.dtype)


def _head_kernel(x_ref, imu_ref, cw_ref, cb_ref, w1_ref, b1_ref, w2_ref, b2_ref,
                 k0_ref, k1_ref, kb_ref, o_ref, *, inv_hw):
    """Fused network tail (single launch):
       backbone AvgPool2d + Threshold(-1e20) "fc", combination 1x1 conv,
       AdaptiveAvgPool2d(1)+Flatten (identity on a 1x1 map), IMUnet MLP,
       concat (folded into split classifier weights k0/k1), classifier."""
    # x_ref: (B, Hf*Wf, C) bf16 backbone feature map; imu_ref: (B, imu_in) bf16.
    feat = jnp.sum(x_ref[...].astype(jnp.float32), axis=1) * inv_hw        # AvgPool2d
    feat = jnp.where(feat > -1e20, feat, -1e20)                            # nn.Threshold
    x0 = jnp.dot(feat.astype(jnp.bfloat16), cw_ref[...],
                 preferred_element_type=jnp.float32) + cb_ref[...]         # combination
    h = jnp.dot(imu_ref[...], w1_ref[...],
                preferred_element_type=jnp.float32) + b1_ref[...]          # IMU in_layer
    x1 = jnp.dot(h.astype(jnp.bfloat16), w2_ref[...],
                 preferred_element_type=jnp.float32) + b2_ref[...]         # IMU out_layer
    out = jnp.dot(x0.astype(jnp.bfloat16), k0_ref[...], preferred_element_type=jnp.float32)
    out = out + jnp.dot(x1.astype(jnp.bfloat16), k1_ref[...], preferred_element_type=jnp.float32)
    o_ref[...] = out + kb_ref[...]                                         # classifier


# ---------------------------------------------------------------------------
# Pallas wrappers
# ---------------------------------------------------------------------------
def pallas_gemm(x, w, b, *, relu=False, residual=None, shortcut=None):
    """One fused GEMM:  y = act( x @ w + b [+ residual | + xs @ ws + bs] ).

    x:(M,K) bf16, w:(K,N) bf16, b:(1,N) f32, residual:(M,N) bf16,
    shortcut=(xs:(M,Kd) bf16, ws:(Kd,N) bf16, bs:(1,N) f32).   Returns (M,N) bf16.
    No host-side padding/slicing: blocks use the full K/N dims and a cdiv grid over M
    (Pallas masks the ragged last block itself)."""
    M, K = x.shape
    N = w.shape[1]
    bm = M if M <= TM else TM
    grid = (pl.cdiv(M, bm),)

    in_specs = [
        pl.BlockSpec((bm, K), lambda i: (i, 0)),
        pl.BlockSpec((K, N), lambda i: (0, 0)),
        pl.BlockSpec((1, N), lambda i: (0, 0)),
    ]
    args = [x, w, b]
    if shortcut is not None:
        xs, ws, bs = shortcut
        Kd = xs.shape[1]
        in_specs += [
            pl.BlockSpec((bm, Kd), lambda i: (i, 0)),
            pl.BlockSpec((Kd, N), lambda i: (0, 0)),
            pl.BlockSpec((1, N), lambda i: (0, 0)),
        ]
        args += [xs, ws, bs]
        kernel = functools.partial(_gemm_res_proj_kernel, relu=relu)
    elif residual is not None:
        in_specs.append(pl.BlockSpec((bm, N), lambda i: (i, 0)))
        args.append(residual)
        kernel = functools.partial(_gemm_res_kernel, relu=relu)
    else:
        kernel = functools.partial(_gemm_kernel, relu=relu)

    return pl.pallas_call(
        kernel,
        out_shape=jax.ShapeDtypeStruct((M, N), jnp.bfloat16),
        grid=grid,
        in_specs=in_specs,
        out_specs=pl.BlockSpec((bm, N), lambda i: (i, 0)),
        compiler_params=pltpu.CompilerParams(dimension_semantics=("parallel",)),
    )(*args)


# ---------------------------------------------------------------------------
# Conv / pooling built on the Pallas GEMM (patch extraction is fused XLA glue)
# ---------------------------------------------------------------------------
def conv2d(x_nhwc, wcol, b, *, kh, kw, stride=1, pad=0, relu=False,
           residual=None, shortcut=None):
    """Conv2d as implicit im2col (lax.conv_general_dilated_patches, channel-major
    patch layout) feeding ONE fused Pallas GEMM (bias/ReLU/residual in epilogue)."""
    B, H, W, Cin = x_nhwc.shape
    Cout = wcol.shape[1]
    Ho = (H + 2 * pad - kh) // stride + 1
    Wo = (W + 2 * pad - kw) // stride + 1
    if kh == 1 and kw == 1 and pad == 0:
        cols = x_nhwc[:, ::stride, ::stride, :]
    else:
        cols = lax.conv_general_dilated_patches(
            x_nhwc, (kh, kw), (stride, stride),
            padding=((pad, pad), (pad, pad)),
            dimension_numbers=("NHWC", "HWIO", "NHWC"))
    cols = cols.reshape(B * Ho * Wo, Cin * kh * kw)
    res = None if residual is None else residual.reshape(B * Ho * Wo, Cout)
    sc = None
    if shortcut is not None:
        xs, ws, bs = shortcut
        sc = (xs.reshape(B * Ho * Wo, xs.shape[-1]), ws, bs)
    y = pallas_gemm(cols, wcol, b, relu=relu, residual=res, shortcut=sc)
    return y.reshape(B, Ho, Wo, Cout)


def maxpool_3x3_s2_p1(x):
    """MaxPool2d(3, stride=2, padding=1) as an XLA VPU max tree — no Pallas launch;
    at this size launch + channel-pad overhead would dominate the reduction."""
    B, H, W, C = x.shape
    Ho = (H + 2 - 3) // 2 + 1
    Wo = (W + 2 - 3) // 2 + 1
    xp = jnp.pad(x, ((0, 0), (1, 1), (1, 1), (0, 0)),
                 constant_values=-jnp.inf)          # dtype-safe for bf16
    out = None
    for iy in range(3):
        for ix in range(3):
            tap = xp[:, iy:iy + 2 * Ho:2, ix:ix + 2 * Wo:2, :]
            out = tap if out is None else jnp.maximum(out, tap)
    return out


def basic_block(x, p, *, stride):
    """ResNet BasicBlock (BN folded): conv1+relu, then conv2 + shortcut + relu with
    the shortcut add (identity or projected downsample GEMM) fused into the conv2 GEMM."""
    out = conv2d(x, p["w1"], p["b1"], kh=3, kw=3, stride=stride, pad=1, relu=True)
    if "wd" in p:                                    # projected (downsample) shortcut
        xs = x[:, ::stride, ::stride, :]             # 1x1 / stride-s conv input
        return conv2d(out, p["w2"], p["b2"], kh=3, kw=3, pad=1, relu=True,
                      shortcut=(xs, p["wd"], p["bd"]))
    return conv2d(out, p["w2"], p["b2"], kh=3, kw=3, pad=1, relu=True, residual=x)


# ---------------------------------------------------------------------------
# One-time (outside jit) weight preparation: BN folding + im2col layout + bf16
# ---------------------------------------------------------------------------
def _fold_bn(conv_w, conv_b, bn, eps=1e-5):
    """Fold eval-mode BatchNorm2d into the preceding conv (exact in eval)."""
    gamma, beta, mean, var = bn
    scale = gamma / jnp.sqrt(var + eps)
    w = conv_w * scale[:, None, None, None]
    b = jnp.zeros_like(gamma) if conv_b is None else conv_b
    b = (b - mean) * scale + beta
    return w, b


def _to_gemm(w_oihw, b):
    """OIHW conv weight -> (Cin*kh*kw, Cout) bf16 matrix, K ordered channel-major
    (Cin, kh, kw) to match lax.conv_general_dilated_patches' patch layout."""
    cout, cin, kh, kw = w_oihw.shape
    wcol = jnp.transpose(w_oihw, (1, 2, 3, 0)).reshape(cin * kh * kw, cout)
    return wcol.astype(jnp.bfloat16), b.reshape(1, cout).astype(jnp.float32)


def prepare_params(params):
    """Precompute GEMM-ready weights ONCE outside jit so no per-forward BN/transpose/
    pad/cast chain sits on the critical path."""
    bb = params["backbone"]

    def conv_bn(w, bn):
        return _to_gemm(*_fold_bn(w, None, bn))

    def block(p):
        out = {}
        out["w1"], out["b1"] = conv_bn(p["conv1_w"], p["bn1"])
        out["w2"], out["b2"] = conv_bn(p["conv2_w"], p["bn2"])
        if "down_w" in p:
            out["wd"], out["bd"] = conv_bn(p["down_w"], p["bn_d"])
        return out

    stem_w, stem_b = conv_bn(bb["conv1_w"], bb["bn1"])
    comb_w, comb_b = _to_gemm(params["comb_w"], params["comb_b"])
    c2 = comb_w.shape[1]
    cls_w = params["cls_w"].T                              # (c2 + imu_out, num_classes)
    return dict(
        backbone=dict(stem_w=stem_w, stem_b=stem_b,
                      layer1=[block(p) for p in bb["layer1"]],
                      layer2=[block(p) for p in bb["layer2"]]),
        comb_w=comb_w, comb_b=comb_b,
        imu_w1=params["imu_w1"].T.astype(jnp.bfloat16),
        imu_b1=params["imu_b1"].reshape(1, -1).astype(jnp.float32),
        imu_w2=params["imu_w2"].T.astype(jnp.bfloat16),
        imu_b2=params["imu_b2"].reshape(1, -1).astype(jnp.float32),
        cls_w0=cls_w[:c2].astype(jnp.bfloat16),            # tactile slice of classifier
        cls_w1=cls_w[c2:].astype(jnp.bfloat16),            # imu slice (folds the concat)
        cls_b=params["cls_b"].reshape(1, -1).astype(jnp.float32),
    )


# ---------------------------------------------------------------------------
# TouchNet forward
# ---------------------------------------------------------------------------
def touchnet_forward(gp, pressure_nchw, imu):
    """TouchNet.forward((pressure, imu)) with prepared params `gp`."""
    # --- SmallNet / Tactilenet (truncated resnet18, fc replaced by Threshold) ---
    x = jnp.transpose(pressure_nchw, (0, 2, 3, 1)).astype(jnp.bfloat16)   # NCHW -> NHWC
    bb = gp["backbone"]
    x = conv2d(x, bb["stem_w"], bb["stem_b"], kh=9, kw=9, relu=True)      # (B,24,24,16)
    x = maxpool_3x3_s2_p1(x)                                              # (B,12,12,16)
    for blk in bb["layer1"]:
        x = basic_block(x, blk, stride=1)                                 # (B,12,12,16)
    x = basic_block(x, bb["layer2"][0], stride=2)                         # (B,6,6,32)
    x = basic_block(x, bb["layer2"][1], stride=1)                         # (B,6,6,32)

    # --- fused tail: AvgPool2d + dropout(0)=identity + Threshold "fc", then the
    # TouchNet head (combination 1x1 conv + AdaptiveAvgPool2d(1) + Flatten + IMUnet
    # + concat + classifier) in a single grid-less pallas_call. ---
    B, Hf, Wf, C = x.shape
    num_classes = gp["cls_b"].shape[1]
    return pl.pallas_call(
        functools.partial(_head_kernel, inv_hw=1.0 / (Hf * Wf)),
        out_shape=jax.ShapeDtypeStruct((B, num_classes), jnp.float32),
    )(x.reshape(B, Hf * Wf, C), imu.astype(jnp.bfloat16),
      gp["comb_w"], gp["comb_b"],
      gp["imu_w1"], gp["imu_b1"], gp["imu_w2"], gp["imu_b2"],
      gp["cls_w0"], gp["cls_w1"], gp["cls_b"])


# ---------------------------------------------------------------------------
# Deterministic parameter init (shapes match the PyTorch module definitions)
# ---------------------------------------------------------------------------
def init_params(key, *, num_classes=27, inplanes=16, imu_in=6, imu_out=3,
                imu_hidden=12):
    keys = iter(jax.random.split(key, 96))

    def w(shape, scale=0.1):
        return scale * jax.random.normal(next(keys), shape, dtype=jnp.float32)

    def bn(c):
        return (1.0 + 0.1 * jax.random.normal(next(keys), (c,), jnp.float32),  # gamma
                0.1 * jax.random.normal(next(keys), (c,), jnp.float32),        # beta
                0.1 * jax.random.normal(next(keys), (c,), jnp.float32),        # running_mean
                1.0 + 0.1 * jax.random.uniform(next(keys), (c,)))              # running_var

    c1, c2 = inplanes, inplanes * 2
    backbone = dict(
        conv1_w=w((c1, 1, 9, 9)), bn1=bn(c1),
        layer1=[dict(conv1_w=w((c1, c1, 3, 3)), bn1=bn(c1),
                     conv2_w=w((c1, c1, 3, 3)), bn2=bn(c1)) for _ in range(2)],
        layer2=[dict(conv1_w=w((c2, c1, 3, 3)), bn1=bn(c2),
                     conv2_w=w((c2, c2, 3, 3)), bn2=bn(c2),
                     down_w=w((c2, c1, 1, 1)), bn_d=bn(c2)),
                dict(conv1_w=w((c2, c2, 3, 3)), bn1=bn(c2),
                     conv2_w=w((c2, c2, 3, 3)), bn2=bn(c2))],
    )
    return dict(
        backbone=backbone,
        comb_w=w((c2, c2, 1, 1)), comb_b=w((c2,)),                 # Conv2d(32,32,1)
        imu_w1=w((imu_hidden, imu_in)), imu_b1=w((imu_hidden,)),   # Linear(6,12)
        imu_w2=w((imu_out, imu_hidden)), imu_b2=w((imu_out,)),     # Linear(12,3)
        cls_w=w((num_classes, c2 + imu_out)), cls_b=w((num_classes,)),  # Linear(35,27)
    )


if __name__ == "__main__":
    key = jax.random.PRNGKey(0)
    kp, kx, ki = jax.random.split(key, 3)
    params = init_params(kp)
    gemm_params = prepare_params(params)     # one-time weight prep, outside jit

    # TouchNet.forward(x) with x = (pressure, imu)
    pressure = jax.random.normal(kx, (2, 1, 32, 32), dtype=jnp.float32)  # x[0], NCHW
    imu = jax.random.normal(ki, (2, 6), dtype=jnp.float32)               # x[1]

    fwd = jax.jit(touchnet_forward)
    out = fwd(gemm_params, pressure, imu)
    jax.block_until_ready(out)
    assert out.shape == (2, 27) and out.dtype == jnp.float32
    print("KERNEL_OK")
</pallas_src>

<mosaic_0001>
module attributes {stable_mosaic.version = 11 : i64} {
  func.func @_gemm_kernel(%arg0: i32, %arg1: memref<128x81xbf16, #tpu.memory_space<vmem>>, %arg2: memref<81x16xbf16, #tpu.memory_space<vmem>>, %arg3: memref<1x16xf32, #tpu.memory_space<vmem>>, %arg4: memref<128x16xbf16, #tpu.memory_space<vmem>>) attributes {dimension_semantics = [#tpu.dimension_semantics<parallel>], iteration_bounds = array<i64: 9>, scalar_prefetch = 0 : i64, scratch_operands = 0 : i64, tpu.core_type = #tpu.core_type<tc>, window_params = [{transform_indices = @transform_0, window_bounds = array<i64: 128, 81>}, {pipeline_mode = #tpu.pipeline_mode<synchronous>, transform_indices = @transform_1, window_bounds = array<i64: 81, 16>}, {pipeline_mode = #tpu.pipeline_mode<synchronous>, transform_indices = @transform_2, window_bounds = array<i64: 1, 16>}, {transform_indices = @transform_3, window_bounds = array<i64: 128, 16>}]} {
    %c0 = arith.constant 0 : index
    %c0_0 = arith.constant 0 : index
    %0 = vector.load %arg1[%c0, %c0_0] : memref<128x81xbf16, #tpu.memory_space<vmem>>, vector<128x81xbf16>
    %c0_1 = arith.constant 0 : index
    %c0_2 = arith.constant 0 : index
    %1 = vector.load %arg2[%c0_1, %c0_2] : memref<81x16xbf16, #tpu.memory_space<vmem>>, vector<81x16xbf16>
    %cst = arith.constant dense<0.000000e+00> : vector<128x16xf32>
    %2 = tpu.matmul %0, %1, %cst {dimension_numbers = #tpu.dot_dimension_numbers<[1], [0], [0], [1], [0, 0, 1, 1], [], []>} : vector<128x81xbf16>, vector<81x16xbf16>, vector<128x16xf32> -> vector<128x16xf32>
    %c0_3 = arith.constant 0 : index
    %c0_4 = arith.constant 0 : index
    %3 = vector.load %arg3[%c0_3, %c0_4] : memref<1x16xf32, #tpu.memory_space<vmem>>, vector<1x16xf32>
    %4 = vector.broadcast %3 : vector<1x16xf32> to vector<128x16xf32>
    %5 = arith.addf %2, %4 : vector<128x16xf32>
    %cst_5 = arith.constant 0.000000e+00 : f32
    %6 = vector.broadcast %cst_5 : f32 to vector<128x16xf32>
    %7 = arith.maximumf %5, %6 : vector<128x16xf32>
    %8 = arith.truncf %7 : vector<128x16xf32> to vector<128x16xbf16>
    %c0_6 = arith.constant 0 : index
    %c0_7 = arith.constant 0 : index
    %9 = vector.load %arg4[%c0_6, %c0_7] : memref<128x16xbf16, #tpu.memory_space<vmem>>, vector<128x16xbf16>
    tpu.vector_store %arg4[%c0_6, %c0_7], %8 {strides = array<i32>} : memref<128x16xbf16, #tpu.memory_space<vmem>>, vector<128x16xbf16>,
    return
  }
  func.func @transform_0(%arg0: i32) -> (i32, i32) {
    %c0_i32 = arith.constant 0 : i32
    %c0_i32_0 = arith.constant 0 : i32
    return %arg0, %c0_i32 : i32, i32
  }
  func.func @transform_1(%arg0: i32) -> (i32, i32) {
    %c0_i32 = arith.constant 0 : i32
    %c0_i32_0 = arith.constant 0 : i32
    %c0_i32_1 = arith.constant 0 : i32
    return %c0_i32, %c0_i32_0 : i32, i32
  }
  func.func @transform_2(%arg0: i32) -> (i32, i32) {
    %c0_i32 = arith.constant 0 : i32
    %c0_i32_0 = arith.constant 0 : i32
    %c0_i32_1 = arith.constant 0 : i32
    return %c0_i32, %c0_i32_0 : i32, i32
  }
  func.func @transform_3(%arg0: i32) -> (i32, i32) {
    %c0_i32 = arith.constant 0 : i32
    %c0_i32_0 = arith.constant 0 : i32
    return %arg0, %c0_i32 : i32, i32
  }
}

module attributes {stable_mosaic.version = 11 : i64} {
  func.func @_gemm_kernel(%arg0: i32, %arg1: memref<128x144xbf16, #tpu.memory_space<vmem>>, %arg2: memref<144x16xbf16, #tpu.memory_space<vmem>>, %arg3: memref<1x16xf32, #tpu.memory_space<vmem>>, %arg4: memref<128x16xbf16, #tpu.memory_space<vmem>>) attributes {dimension_semantics = [#tpu.dimension_semantics<parallel>], iteration_bounds = array<i64: 3>, scalar_prefetch = 0 : i64, scratch_operands = 0 : i64, tpu.core_type = #tpu.core_type<tc>, window_params = [{transform_indices = @transform_0, window_bounds = array<i64: 128, 144>}, {pipeline_mode = #tpu.pipeline_mode<synchronous>, transform_indices = @transform_1, window_bounds = array<i64: 144, 16>}, {pipeline_mode = #tpu.pipeline_mode<synchronous>, transform_indices = @transform_2, window_bounds = array<i64: 1, 16>}, {transform_indices = @transform_3, window_bounds = array<i64: 128, 16>}]} {
    %c0 = arith.constant 0 : index
    %c0_0 = arith.constant 0 : index
    %0 = vector.load %arg1[%c0, %c0_0] : memref<128x144xbf16, #tpu.memory_space<vmem>>, vector<128x144xbf16>
    %c0_1 = arith.constant 0 : index
    %c0_2 = arith.constant 0 : index
    %1 = vector.load %arg2[%c0_1, %c0_2] : memref<144x16xbf16, #tpu.memory_space<vmem>>, vector<144x16xbf16>
    %cst = arith.constant dense<0.000000e+00> : vector<128x16xf32>
    %2 = tpu.matmul %0, %1, %cst {dimension_numbers = #tpu.dot_dimension_numbers<[1], [0], [0], [1], [0, 0, 1, 1], [], []>} : vector<128x144xbf16>, vector<144x16xbf16>, vector<128x16xf32> -> vector<128x16xf32>
    %c0_3 = arith.constant 0 : index
    %c0_4 = arith.constant 0 : index
    %3 = vector.load %arg3[%c0_3, %c0_4] : memref<1x16xf32, #tpu.memory_space<vmem>>, vector<1x16xf32>
    %4 = vector.broadcast %3 : vector<1x16xf32> to vector<128x16xf32>
    %5 = arith.addf %2, %4 : vector<128x16xf32>
    %cst_5 = arith.constant 0.000000e+00 : f32
    %6 = vector.broadcast %cst_5 : f32 to vector<128x16xf32>
    %7 = arith.maximumf %5, %6 : vector<128x16xf32>
    %8 = arith.truncf %7 : vector<128x16xf32> to vector<128x16xbf16>
    %c0_6 = arith.constant 0 : index
    %c0_7 = arith.constant 0 : index
    %9 = vector.load %arg4[%c0_6, %c0_7] : memref<128x16xbf16, #tpu.memory_space<vmem>>, vector<128x16xbf16>
    tpu.vector_store %arg4[%c0_6, %c0_7], %8 {strides = array<i32>} : memref<128x16xbf16, #tpu.memory_space<vmem>>, vector<128x16xbf16>,
    return
  }
  func.func @transform_0(%arg0: i32) -> (i32, i32) {
    %c0_i32 = arith.constant 0 : i32
    %c0_i32_0 = arith.constant 0 : i32
    return %arg0, %c0_i32 : i32, i32
  }
  func.func @transform_1(%arg0: i32) -> (i32, i32) {
    %c0_i32 = arith.constant 0 : i32
    %c0_i32_0 = arith.constant 0 : i32
    %c0_i32_1 = arith.constant 0 : i32
    return %c0_i32, %c0_i32_0 : i32, i32
  }
  func.func @transform_2(%arg0: i32) -> (i32, i32) {
    %c0_i32 = arith.constant 0 : i32
    %c0_i32_0 = arith.constant 0 : i32
    %c0_i32_1 = arith.constant 0 : i32
    return %c0_i32, %c0_i32_0 : i32, i32
  }
  func.func @transform_3(%arg0: i32) -> (i32, i32) {
    %c0_i32 = arith.constant 0 : i32
    %c0_i32_0 = arith.constant 0 : i32
    return %arg0, %c0_i32 : i32, i32
  }
}

module attributes {stable_mosaic.version = 11 : i64} {
  func.func @_gemm_res_kernel(%arg0: i32, %arg1: memref<128x144xbf16, #tpu.memory_space<vmem>>, %arg2: memref<144x16xbf16, #tpu.memory_space<vmem>>, %arg3: memref<1x16xf32, #tpu.memory_space<vmem>>, %arg4: memref<128x16xbf16, #tpu.memory_space<vmem>>, %arg5: memref<128x16xbf16, #tpu.memory_space<vmem>>) attributes {dimension_semantics = [#tpu.dimension_semantics<parallel>], iteration_bounds = array<i64: 3>, scalar_prefetch = 0 : i64, scratch_operands = 0 : i64, tpu.core_type = #tpu.core_type<tc>, window_params = [{transform_indices = @transform_0, window_bounds = array<i64: 128, 144>}, {pipeline_mode = #tpu.pipeline_mode<synchronous>, transform_indices = @transform_1, window_bounds = array<i64: 144, 16>}, {pipeline_mode = #tpu.pipeline_mode<synchronous>, transform_indices = @transform_2, window_bounds = array<i64: 1, 16>}, {transform_indices = @transform_3, window_bounds = array<i64: 128, 16>}, {transform_indices = @transform_4, window_bounds = array<i64: 128, 16>}]} {
    %c0 = arith.constant 0 : index
    %c0_0 = arith.constant 0 : index
    %0 = vector.load %arg1[%c0, %c0_0] : memref<128x144xbf16, #tpu.memory_space<vmem>>, vector<128x144xbf16>
    %c0_1 = arith.constant 0 : index
    %c0_2 = arith.constant 0 : index
    %1 = vector.load %arg2[%c0_1, %c0_2] : memref<144x16xbf16, #tpu.memory_space<vmem>>, vector<144x16xbf16>
    %cst = arith.constant dense<0.000000e+00> : vector<128x16xf32>
    %2 = tpu.matmul %0, %1, %cst {dimension_numbers = #tpu.dot_dimension_numbers<[1], [0], [0], [1], [0, 0, 1, 1], [], []>} : vector<128x144xbf16>, vector<144x16xbf16>, vector<128x16xf32> -> vector<128x16xf32>
    %c0_3 = arith.constant 0 : index
    %c0_4 = arith.constant 0 : index
    %3 = vector.load %arg3[%c0_3, %c0_4] : memref<1x16xf32, #tpu.memory_space<vmem>>, vector<1x16xf32>
    %4 = vector.broadcast %3 : vector<1x16xf32> to vector<128x16xf32>
    %5 = arith.addf %2, %4 : vector<128x16xf32>
    %c0_5 = arith.constant 0 : index
    %c0_6 = arith.constant 0 : index
    %6 = vector.load %arg4[%c0_5, %c0_6] : memref<128x16xbf16, #tpu.memory_space<vmem>>, vector<128x16xbf16>
    %7 = arith.extf %6 : vector<128x16xbf16> to vector<128x16xf32>
    %8 = arith.addf %5, %7 : vector<128x16xf32>
    %cst_7 = arith.constant 0.000000e+00 : f32
    %9 = vector.broadcast %cst_7 : f32 to vector<128x16xf32>
    %10 = arith.maximumf %8, %9 : vector<128x16xf32>
    %11 = arith.truncf %10 : vector<128x16xf32> to vector<128x16xbf16>
    %c0_8 = arith.constant 0 : index
    %c0_9 = arith.constant 0 : index
    %12 = vector.load %arg5[%c0_8, %c0_9] : memref<128x16xbf16, #tpu.memory_space<vmem>>, vector<128x16xbf16>
    tpu.vector_store %arg5[%c0_8, %c0_9], %11 {strides = array<i32>} : memref<128x16xbf16, #tpu.memory_space<vmem>>, vector<128x16xbf16>,
    return
  }
  func.func @transform_0(%arg0: i32) -> (i32, i32) {
    %c0_i32 = arith.constant 0 : i32
    %c0_i32_0 = arith.constant 0 : i32
    return %arg0, %c0_i32 : i32, i32
  }
  func.func @transform_1(%arg0: i32) -> (i32, i32) {
    %c0_i32 = arith.constant 0 : i32
    %c0_i32_0 = arith.constant 0 : i32
    %c0_i32_1 = arith.constant 0 : i32
    return %c0_i32, %c0_i32_0 : i32, i32
  }
  func.func @transform_2(%arg0: i32) -> (i32, i32) {
    %c0_i32 = arith.constant 0 : i32
    %c0_i32_0 = arith.constant 0 : i32
    %c0_i32_1 = arith.constant 0 : i32
    return %c0_i32, %c0_i32_0 : i32, i32
  }
  func.func @transform_3(%arg0: i32) -> (i32, i32) {
    %c0_i32 = arith.constant 0 : i32
    %c0_i32_0 = arith.constant 0 : i32
    return %arg0, %c0_i32 : i32, i32
  }
  func.func @transform_4(%arg0: i32) -> (i32, i32) {
    %c0_i32 = arith.constant 0 : i32
    %c0_i32_0 = arith.constant 0 : i32
    return %arg0, %c0_i32 : i32, i32
  }
}

module attributes {stable_mosaic.version = 11 : i64} {
  func.func @_gemm_kernel(%arg0: i32, %arg1: memref<72x144xbf16, #tpu.memory_space<vmem>>, %arg2: memref<144x32xbf16, #tpu.memory_space<vmem>>, %arg3: memref<1x32xf32, #tpu.memory_space<vmem>>, %arg4: memref<72x32xbf16, #tpu.memory_space<vmem>>) attributes {dimension_semantics = [#tpu.dimension_semantics<parallel>], iteration_bounds = array<i64: 1>, scalar_prefetch = 0 : i64, scratch_operands = 0 : i64, tpu.core_type = #tpu.core_type<tc>, window_params = [{transform_indices = @transform_0, window_bounds = array<i64: 72, 144>}, {pipeline_mode = #tpu.pipeline_mode<synchronous>, transform_indices = @transform_1, window_bounds = array<i64: 144, 32>}, {pipeline_mode = #tpu.pipeline_mode<synchronous>, transform_indices = @transform_2, window_bounds = array<i64: 1, 32>}, {transform_indices = @transform_3, window_bounds = array<i64: 72, 32>}]} {
    %c0 = arith.constant 0 : index
    %c0_0 = arith.constant 0 : index
    %0 = vector.load %arg1[%c0, %c0_0] : memref<72x144xbf16, #tpu.memory_space<vmem>>, vector<72x144xbf16>
    %c0_1 = arith.constant 0 : index
    %c0_2 = arith.constant 0 : index
    %1 = vector.load %arg2[%c0_1, %c0_2] : memref<144x32xbf16, #tpu.memory_space<vmem>>, vector<144x32xbf16>
    %cst = arith.constant dense<0.000000e+00> : vector<72x32xf32>
    %2 = tpu.matmul %0, %1, %cst {dimension_numbers = #tpu.dot_dimension_numbers<[1], [0], [0], [1], [0, 0, 1, 1], [], []>} : vector<72x144xbf16>, vector<144x32xbf16>, vector<72x32xf32> -> vector<72x32xf32>
    %c0_3 = arith.constant 0 : index
    %c0_4 = arith.constant 0 : index
    %3 = vector.load %arg3[%c0_3, %c0_4] : memref<1x32xf32, #tpu.memory_space<vmem>>, vector<1x32xf32>
    %4 = vector.broadcast %3 : vector<1x32xf32> to vector<72x32xf32>
    %5 = arith.addf %2, %4 : vector<72x32xf32>
    %cst_5 = arith.constant 0.000000e+00 : f32
    %6 = vector.broadcast %cst_5 : f32 to vector<72x32xf32>
    %7 = arith.maximumf %5, %6 : vector<72x32xf32>
    %8 = arith.truncf %7 : vector<72x32xf32> to vector<72x32xbf16>
    %c0_6 = arith.constant 0 : index
    %c0_7 = arith.constant 0 : index
    %9 = vector.load %arg4[%c0_6, %c0_7] : memref<72x32xbf16, #tpu.memory_space<vmem>>, vector<72x32xbf16>
    tpu.vector_store %arg4[%c0_6, %c0_7], %8 {strides = array<i32>} : memref<72x32xbf16, #tpu.memory_space<vmem>>, vector<72x32xbf16>,
    return
  }
  func.func @transform_0(%arg0: i32) -> (i32, i32) {
    %c0_i32 = arith.constant 0 : i32
    %c0_i32_0 = arith.constant 0 : i32
    return %arg0, %c0_i32 : i32, i32
  }
  func.func @transform_1(%arg0: i32) -> (i32, i32) {
    %c0_i32 = arith.constant 0 : i32
    %c0_i32_0 = arith.constant 0 : i32
    %c0_i32_1 = arith.constant 0 : i32
    return %c0_i32, %c0_i32_0 : i32, i32
  }
  func.func @transform_2(%arg0: i32) -> (i32, i32) {
    %c0_i32 = arith.constant 0 : i32
    %c0_i32_0 = arith.constant 0 : i32
    %c0_i32_1 = arith.constant 0 : i32
    return %c0_i32, %c0_i32_0 : i32, i32
  }
  func.func @transform_3(%arg0: i32) -> (i32, i32) {
    %c0_i32 = arith.constant 0 : i32
    %c0_i32_0 = arith.constant 0 : i32
    return %arg0, %c0_i32 : i32, i32
  }
}

module attributes {stable_mosaic.version = 11 : i64} {
  func.func @_gemm_kernel(%arg0: i32, %arg1: memref<72x288xbf16, #tpu.memory_space<vmem>>, %arg2: memref<288x32xbf16, #tpu.memory_space<vmem>>, %arg3: memref<1x32xf32, #tpu.memory_space<vmem>>, %arg4: memref<72x32xbf16, #tpu.memory_space<vmem>>) attributes {dimension_semantics = [#tpu.dimension_semantics<parallel>], iteration_bounds = array<i64: 1>, scalar_prefetch = 0 : i64, scratch_operands = 0 : i64, tpu.core_type = #tpu.core_type<tc>, window_params = [{transform_indices = @transform_0, window_bounds = array<i64: 72, 288>}, {pipeline_mode = #tpu.pipeline_mode<synchronous>, transform_indices = @transform_1, window_bounds = array<i64: 288, 32>}, {pipeline_mode = #tpu.pipeline_mode<synchronous>, transform_indices = @transform_2, window_bounds = array<i64: 1, 32>}, {transform_indices = @transform_3, window_bounds = array<i64: 72, 32>}]} {
    %c0 = arith.constant 0 : index
    %c0_0 = arith.constant 0 : index
    %0 = vector.load %arg1[%c0, %c0_0] : memref<72x288xbf16, #tpu.memory_space<vmem>>, vector<72x288xbf16>
    %c0_1 = arith.constant 0 : index
    %c0_2 = arith.constant 0 : index
    %1 = vector.load %arg2[%c0_1, %c0_2] : memref<288x32xbf16, #tpu.memory_space<vmem>>, vector<288x32xbf16>
    %cst = arith.constant dense<0.000000e+00> : vector<72x32xf32>
    %2 = tpu.matmul %0, %1, %cst {dimension_numbers = #tpu.dot_dimension_numbers<[1], [0], [0], [1], [0, 0, 1, 1], [], []>} : vector<72x288xbf16>, vector<288x32xbf16>, vector<72x32xf32> -> vector<72x32xf32>
    %c0_3 = arith.constant 0 : index
    %c0_4 = arith.constant 0 : index
    %3 = vector.load %arg3[%c0_3, %c0_4] : memref<1x32xf32, #tpu.memory_space<vmem>>, vector<1x32xf32>
    %4 = vector.broadcast %3 : vector<1x32xf32> to vector<72x32xf32>
    %5 = arith.addf %2, %4 : vector<72x32xf32>
    %cst_5 = arith.constant 0.000000e+00 : f32
    %6 = vector.broadcast %cst_5 : f32 to vector<72x32xf32>
    %7 = arith.maximumf %5, %6 : vector<72x32xf32>
    %8 = arith.truncf %7 : vector<72x32xf32> to vector<72x32xbf16>
    %c0_6 = arith.constant 0 : index
    %c0_7 = arith.constant 0 : index
    %9 = vector.load %arg4[%c0_6, %c0_7] : memref<72x32xbf16, #tpu.memory_space<vmem>>, vector<72x32xbf16>
    tpu.vector_store %arg4[%c0_6, %c0_7], %8 {strides = array<i32>} : memref<72x32xbf16, #tpu.memory_space<vmem>>, vector<72x32xbf16>,
    return
  }
  func.func @transform_0(%arg0: i32) -> (i32, i32) {
    %c0_i32 = arith.constant 0 : i32
    %c0_i32_0 = arith.constant 0 : i32
    return %arg0, %c0_i32 : i32, i32
  }
  func.func @transform_1(%arg0: i32) -> (i32, i32) {
    %c0_i32 = arith.constant 0 : i32
    %c0_i32_0 = arith.constant 0 : i32
    %c0_i32_1 = arith.constant 0 : i32
    return %c0_i32, %c0_i32_0 : i32, i32
  }
  func.func @transform_2(%arg0: i32) -> (i32, i32) {
    %c0_i32 = arith.constant 0 : i32
    %c0_i32_0 = arith.constant 0 : i32
    %c0_i32_1 = arith.constant 0 : i32
    return %c0_i32, %c0_i32_0 : i32, i32
  }
  func.func @transform_3(%arg0: i32) -> (i32, i32) {
    %c0_i32 = arith.constant 0 : i32
    %c0_i32_0 = arith.constant 0 : i32
    return %arg0, %c0_i32 : i32, i32
  }
}

module attributes {stable_mosaic.version = 11 : i64} {
  func.func @_gemm_res_proj_kernel(%arg0: i32, %arg1: memref<72x288xbf16, #tpu.memory_space<vmem>>, %arg2: memref<288x32xbf16, #tpu.memory_space<vmem>>, %arg3: memref<1x32xf32, #tpu.memory_space<vmem>>, %arg4: memref<72x16xbf16, #tpu.memory_space<vmem>>, %arg5: memref<16x32xbf16, #tpu.memory_space<vmem>>, %arg6: memref<1x32xf32, #tpu.memory_space<vmem>>, %arg7: memref<72x32xbf16, #tpu.memory_space<vmem>>) attributes {dimension_semantics = [#tpu.dimension_semantics<parallel>], iteration_bounds = array<i64: 1>, scalar_prefetch = 0 : i64, scratch_operands = 0 : i64, tpu.core_type = #tpu.core_type<tc>, window_params = [{transform_indices = @transform_0, window_bounds = array<i64: 72, 288>}, {pipeline_mode = #tpu.pipeline_mode<synchronous>, transform_indices = @transform_1, window_bounds = array<i64: 288, 32>}, {pipeline_mode = #tpu.pipeline_mode<synchronous>, transform_indices = @transform_2, window_bounds = array<i64: 1, 32>}, {transform_indices = @transform_3, window_bounds = array<i64: 72, 16>}, {pipeline_mode = #tpu.pipeline_mode<synchronous>, transform_indices = @transform_4, window_bounds = array<i64: 16, 32>}, {pipeline_mode = #tpu.pipeline_mode<synchronous>, transform_indices = @transform_5, window_bounds = array<i64: 1, 32>}, {transform_indices = @transform_6, window_bounds = array<i64: 72, 32>}]} {
    %c0 = arith.constant 0 : index
    %c0_0 = arith.constant 0 : index
    %0 = vector.load %arg1[%c0, %c0_0] : memref<72x288xbf16, #tpu.memory_space<vmem>>, vector<72x288xbf16>
    %c0_1 = arith.constant 0 : index
    %c0_2 = arith.constant 0 : index
    %1 = vector.load %arg2[%c0_1, %c0_2] : memref<288x32xbf16, #tpu.memory_space<vmem>>, vector<288x32xbf16>
    %cst = arith.constant dense<0.000000e+00> : vector<72x32xf32>
    %2 = tpu.matmul %0, %1, %cst {dimension_numbers = #tpu.dot_dimension_numbers<[1], [0], [0], [1], [0, 0, 1, 1], [], []>} : vector<72x288xbf16>, vector<288x32xbf16>, vector<72x32xf32> -> vector<72x32xf32>
    %c0_3 = arith.constant 0 : index
    %c0_4 = arith.constant 0 : index
    %3 = vector.load %arg3[%c0_3, %c0_4] : memref<1x32xf32, #tpu.memory_space<vmem>>, vector<1x32xf32>
    %4 = vector.broadcast %3 : vector<1x32xf32> to vector<72x32xf32>
    %5 = arith.addf %2, %4 : vector<72x32xf32>
    %c0_5 = arith.constant 0 : index
    %c0_6 = arith.constant 0 : index
    %6 = vector.load %arg4[%c0_5, %c0_6] : memref<72x16xbf16, #tpu.memory_space<vmem>>, vector<72x16xbf16>
    %c0_7 = arith.constant 0 : index
    %c0_8 = arith.constant 0 : index
    %7 = vector.load %arg5[%c0_7, %c0_8] : memref<16x32xbf16, #tpu.memory_space<vmem>>, vector<16x32xbf16>
    %cst_9 = arith.constant dense<0.000000e+00> : vector<72x32xf32>
    %8 = tpu.matmul %6, %7, %cst_9 {dimension_numbers = #tpu.dot_dimension_numbers<[1], [0], [0], [1], [0, 0, 1, 1], [], []>} : vector<72x16xbf16>, vector<16x32xbf16>, vector<72x32xf32> -> vector<72x32xf32>
    %9 = arith.addf %5, %8 : vector<72x32xf32>
    %c0_10 = arith.constant 0 : index
    %c0_11 = arith.constant 0 : index
    %10 = vector.load %arg6[%c0_10, %c0_11] : memref<1x32xf32, #tpu.memory_space<vmem>>, vector<1x32xf32>
    %11 = vector.broadcast %10 : vector<1x32xf32> to vector<72x32xf32>
    %12 = arith.addf %9, %11 : vector<72x32xf32>
    %cst_12 = arith.constant 0.000000e+00 : f32
    %13 = vector.broadcast %cst_12 : f32 to vector<72x32xf32>
    %14 = arith.maximumf %12, %13 : vector<72x32xf32>
    %15 = arith.truncf %14 : vector<72x32xf32> to vector<72x32xbf16>
    %c0_13 = arith.constant 0 : index
    %c0_14 = arith.constant 0 : index
    %16 = vector.load %arg7[%c0_13, %c0_14] : memref<72x32xbf16, #tpu.memory_space<vmem>>, vector<72x32xbf16>
    tpu.vector_store %arg7[%c0_13, %c0_14], %15 {strides = array<i32>} : memref<72x32xbf16, #tpu.memory_space<vmem>>, vector<72x32xbf16>,
    return
  }
  func.func @transform_0(%arg0: i32) -> (i32, i32) {
    %c0_i32 = arith.constant 0 : i32
    %c0_i32_0 = arith.constant 0 : i32
    return %arg0, %c0_i32 : i32, i32
  }
  func.func @transform_1(%arg0: i32) -> (i32, i32) {
    %c0_i32 = arith.constant 0 : i32
    %c0_i32_0 = arith.constant 0 : i32
    %c0_i32_1 = arith.constant 0 : i32
    return %c0_i32, %c0_i32_0 : i32, i32
  }
  func.func @transform_2(%arg0: i32) -> (i32, i32) {
    %c0_i32 = arith.constant 0 : i32
    %c0_i32_0 = arith.constant 0 : i32
    %c0_i32_1 = arith.constant 0 : i32
    return %c0_i32, %c0_i32_0 : i32, i32
  }
  func.func @transform_3(%arg0: i32) -> (i32, i32) {
    %c0_i32 = arith.constant 0 : i32
    %c0_i32_0 = arith.constant 0 : i32
    return %arg0, %c0_i32 : i32, i32
  }
  func.func @transform_4(%arg0: i32) -> (i32, i32) {
    %c0_i32 = arith.constant 0 : i32
    %c0_i32_0 = arith.constant 0 : i32
    %c0_i32_1 = arith.constant 0 : i32
    return %c0_i32, %c0_i32_0 : i32, i32
  }
  func.func @transform_5(%arg0: i32) -> (i32, i32) {
    %c0_i32 = arith.constant 0 : i32
    %c0_i32_0 = arith.constant 0 : i32
    %c0_i32_1 = arith.constant 0 : i32
    return %c0_i32, %c0_i32_0 : i32, i32
  }
  func.func @transform_6(%arg0: i32) -> (i32, i32) {
    %c0_i32 = arith.constant 0 : i32
    %c0_i32_0 = arith.constant 0 : i32
    return %arg0, %c0_i32 : i32, i32
  }
}

module attributes {stable_mosaic.version = 11 : i64} {
  func.func @_gemm_res_kernel(%arg0: i32, %arg1: memref<72x288xbf16, #tpu.memory_space<vmem>>, %arg2: memref<288x32xbf16, #tpu.memory_space<vmem>>, %arg3: memref<1x32xf32, #tpu.memory_space<vmem>>, %arg4: memref<72x32xbf16, #tpu.memory_space<vmem>>, %arg5: memref<72x32xbf16, #tpu.memory_space<vmem>>) attributes {dimension_semantics = [#tpu.dimension_semantics<parallel>], iteration_bounds = array<i64: 1>, scalar_prefetch = 0 : i64, scratch_operands = 0 : i64, tpu.core_type = #tpu.core_type<tc>, window_params = [{transform_indices = @transform_0, window_bounds = array<i64: 72, 288>}, {pipeline_mode = #tpu.pipeline_mode<synchronous>, transform_indices = @transform_1, window_bounds = array<i64: 288, 32>}, {pipeline_mode = #tpu.pipeline_mode<synchronous>, transform_indices = @transform_2, window_bounds = array<i64: 1, 32>}, {transform_indices = @transform_3, window_bounds = array<i64: 72, 32>}, {transform_indices = @transform_4, window_bounds = array<i64: 72, 32>}]} {
    %c0 = arith.constant 0 : index
    %c0_0 = arith.constant 0 : index
    %0 = vector.load %arg1[%c0, %c0_0] : memref<72x288xbf16, #tpu.memory_space<vmem>>, vector<72x288xbf16>
    %c0_1 = arith.constant 0 : index
    %c0_2 = arith.constant 0 : index
    %1 = vector.load %arg2[%c0_1, %c0_2] : memref<288x32xbf16, #tpu.memory_space<vmem>>, vector<288x32xbf16>
    %cst = arith.constant dense<0.000000e+00> : vector<72x32xf32>
    %2 = tpu.matmul %0, %1, %cst {dimension_numbers = #tpu.dot_dimension_numbers<[1], [0], [0], [1], [0, 0, 1, 1], [], []>} : vector<72x288xbf16>, vector<288x32xbf16>, vector<72x32xf32> -> vector<72x32xf32>
    %c0_3 = arith.constant 0 : index
    %c0_4 = arith.constant 0 : index
    %3 = vector.load %arg3[%c0_3, %c0_4] : memref<1x32xf32, #tpu.memory_space<vmem>>, vector<1x32xf32>
    %4 = vector.broadcast %3 : vector<1x32xf32> to vector<72x32xf32>
    %5 = arith.addf %2, %4 : vector<72x32xf32>
    %c0_5 = arith.constant 0 : index
    %c0_6 = arith.constant 0 : index
    %6 = vector.load %arg4[%c0_5, %c0_6] : memref<72x32xbf16, #tpu.memory_space<vmem>>, vector<72x32xbf16>
    %7 = arith.extf %6 : vector<72x32xbf16> to vector<72x32xf32>
    %8 = arith.addf %5, %7 : vector<72x32xf32>
    %cst_7 = arith.constant 0.000000e+00 : f32
    %9 = vector.broadcast %cst_7 : f32 to vector<72x32xf32>
    %10 = arith.maximumf %8, %9 : vector<72x32xf32>
    %11 = arith.truncf %10 : vector<72x32xf32> to vector<72x32xbf16>
    %c0_8 = arith.constant 0 : index
    %c0_9 = arith.constant 0 : index
    %12 = vector.load %arg5[%c0_8, %c0_9] : memref<72x32xbf16, #tpu.memory_space<vmem>>, vector<72x32xbf16>
    tpu.vector_store %arg5[%c0_8, %c0_9], %11 {strides = array<i32>} : memref<72x32xbf16, #tpu.memory_space<vmem>>, vector<72x32xbf16>,
    return
  }
  func.func @transform_0(%arg0: i32) -> (i32, i32) {
    %c0_i32 = arith.constant 0 : i32
    %c0_i32_0 = arith.constant 0 : i32
    return %arg0, %c0_i32 : i32, i32
  }
  func.func @transform_1(%arg0: i32) -> (i32, i32) {
    %c0_i32 = arith.constant 0 : i32
    %c0_i32_0 = arith.constant 0 : i32
    %c0_i32_1 = arith.constant 0 : i32
    return %c0_i32, %c0_i32_0 : i32, i32
  }
  func.func @transform_2(%arg0: i32) -> (i32, i32) {
    %c0_i32 = arith.constant 0 : i32
    %c0_i32_0 = arith.constant 0 : i32
    %c0_i32_1 = arith.constant 0 : i32
    return %c0_i32, %c0_i32_0 : i32, i32
  }
  func.func @transform_3(%arg0: i32) -> (i32, i32) {
    %c0_i32 = arith.constant 0 : i32
    %c0_i32_0 = arith.constant 0 : i32
    return %arg0, %c0_i32 : i32, i32
  }
  func.func @transform_4(%arg0: i32) -> (i32, i32) {
    %c0_i32 = arith.constant 0 : i32
    %c0_i32_0 = arith.constant 0 : i32
    return %arg0, %c0_i32 : i32, i32
  }
}

module attributes {stable_mosaic.version = 11 : i64} {
  func.func @_head_kernel(%arg0: memref<2x36x32xbf16, #tpu.memory_space<vmem>>, %arg1: memref<2x6xbf16, #tpu.memory_space<vmem>>, %arg2: memref<32x32xbf16, #tpu.memory_space<vmem>>, %arg3: memref<1x32xf32, #tpu.memory_space<vmem>>, %arg4: memref<6x12xbf16, #tpu.memory_space<vmem>>, %arg5: memref<1x12xf32, #tpu.memory_space<vmem>>, %arg6: memref<12x3xbf16, #tpu.memory_space<vmem>>, %arg7: memref<1x3xf32, #tpu.memory_space<vmem>>, %arg8: memref<32x27xbf16, #tpu.memory_space<vmem>>, %arg9: memref<3x27xbf16, #tpu.memory_space<vmem>>, %arg10: memref<1x27xf32, #tpu.memory_space<vmem>>, %arg11: memref<2x27xf32, #tpu.memory_space<vmem>>) attributes {dimension_semantics = [], scalar_prefetch = 0 : i64, scratch_operands = 0 : i64, tpu.core_type = #tpu.core_type<tc>} {
    %c0 = arith.constant 0 : index
    %c0_0 = arith.constant 0 : index
    %c0_1 = arith.constant 0 : index
    %0 = vector.load %arg0[%c0, %c0_0, %c0_1] : memref<2x36x32xbf16, #tpu.memory_space<vmem>>, vector<2x36x32xbf16>
    %1 = arith.extf %0 : vector<2x36x32xbf16> to vector<2x36x32xf32>
    %cst = arith.constant dense<0.000000e+00> : vector<2x32xf32>
    %2 = vector.multi_reduction <add>, %1, %cst [1] : vector<2x36x32xf32> to vector<2x32xf32>
    %cst_2 = arith.constant 0.027777778 : f32
    %3 = vector.broadcast %cst_2 : f32 to vector<2x32xf32>
    %4 = arith.mulf %2, %3 : vector<2x32xf32>
    %cst_3 = arith.constant -1.000000e+20 : f32
    %5 = vector.broadcast %cst_3 : f32 to vector<2x32xf32>
    %6 = arith.cmpf ogt, %4, %5 : vector<2x32xf32>
    %cst_4 = arith.constant -1.000000e+20 : f32
    %7 = vector.broadcast %cst_4 : f32 to vector<2x32xf32>
    %8 = arith.select %6, %4, %7 : vector<2x32xi1>, vector<2x32xf32>
    %9 = arith.truncf %8 : vector<2x32xf32> to vector<2x32xbf16>
    %c0_5 = arith.constant 0 : index
    %c0_6 = arith.constant 0 : index
    %10 = vector.load %arg2[%c0_5, %c0_6] : memref<32x32xbf16, #tpu.memory_space<vmem>>, vector<32x32xbf16>
    %cst_7 = arith.constant dense<0.000000e+00> : vector<2x32xf32>
    %11 = tpu.matmul %9, %10, %cst_7 {dimension_numbers = #tpu.dot_dimension_numbers<[1], [0], [0], [1], [0, 0, 1, 1], [], []>} : vector<2x32xbf16>, vector<32x32xbf16>, vector<2x32xf32> -> vector<2x32xf32>
    %c0_8 = arith.constant 0 : index
    %c0_9 = arith.constant 0 : index
    %12 = vector.load %arg3[%c0_8, %c0_9] : memref<1x32xf32, #tpu.memory_space<vmem>>, vector<1x32xf32>
    %13 = vector.broadcast %12 : vector<1x32xf32> to vector<2x32xf32>
    %14 = arith.addf %11, %13 : vector<2x32xf32>
    %c0_10 = arith.constant 0 : index
    %c0_11 = arith.constant 0 : index
    %15 = vector.load %arg1[%c0_10, %c0_11] : memref<2x6xbf16, #tpu.memory_space<vmem>>, vector<2x6xbf16>
    %c0_12 = arith.constant 0 : index
    %c0_13 = arith.constant 0 : index
    %16 = vector.load %arg4[%c0_12, %c0_13] : memref<6x12xbf16, #tpu.memory_space<vmem>>, vector<6x12xbf16>
    %cst_14 = arith.constant dense<0.000000e+00> : vector<2x12xf32>
    %17 = tpu.matmul %15, %16, %cst_14 {dimension_numbers = #tpu.dot_dimension_numbers<[1], [0], [0], [1], [0, 0, 1, 1], [], []>} : vector<2x6xbf16>, vector<6x12xbf16>, vector<2x12xf32> -> vector<2x12xf32>
    %c0_15 = arith.constant 0 : index
    %c0_16 = arith.constant 0 : index
    %18 = vector.load %arg5[%c0_15, %c0_16] : memref<1x12xf32, #tpu.memory_space<vmem>>, vector<1x12xf32>
    %19 = vector.broadcast %18 : vector<1x12xf32> to vector<2x12xf32>
    %20 = arith.addf %17, %19 : vector<2x12xf32>
    %21 = arith.truncf %20 : vector<2x12xf32> to vector<2x12xbf16>
    %c0_17 = arith.constant 0 : index
    %c0_18 = arith.constant 0 : index
    %22 = vector.load %arg6[%c0_17, %c0_18] : memref<12x3xbf16, #tpu.memory_space<vmem>>, vector<12x3xbf16>
    %cst_19 = arith.constant dense<0.000000e+00> : vector<2x3xf32>
    %23 = tpu.matmul %21, %22, %cst_19 {dimension_numbers = #tpu.dot_dimension_numbers<[1], [0], [0], [1], [0, 0, 1, 1], [], []>} : vector<2x12xbf16>, vector<12x3xbf16>, vector<2x3xf32> -> vector<2x3xf32>
    %c0_20 = arith.constant 0 : index
    %c0_21 = arith.constant 0 : index
    %24 = vector.load %arg7[%c0_20, %c0_21] : memref<1x3xf32, #tpu.memory_space<vmem>>, vector<1x3xf32>
    %25 = vector.broadcast %24 : vector<1x3xf32> to vector<2x3xf32>
    %26 = arith.addf %23, %25 : vector<2x3xf32>
    %27 = arith.truncf %14 : vector<2x32xf32> to vector<2x32xbf16>
    %c0_22 = arith.constant 0 : index
    %c0_23 = arith.constant 0 : index
    %28 = vector.load %arg8[%c0_22, %c0_23] : memref<32x27xbf16, #tpu.memory_space<vmem>>, vector<32x27xbf16>
    %cst_24 = arith.constant dense<0.000000e+00> : vector<2x27xf32>
    %29 = tpu.matmul %27, %28, %cst_24 {dimension_numbers = #tpu.dot_dimension_numbers<[1], [0], [0], [1], [0, 0, 1, 1], [], []>} : vector<2x32xbf16>, vector<32x27xbf16>, vector<2x27xf32> -> vector<2x27xf32>
    %30 = arith.truncf %26 : vector<2x3xf32> to vector<2x3xbf16>
    %c0_25 = arith.constant 0 : index
    %c0_26 = arith.constant 0 : index
    %31 = vector.load %arg9[%c0_25, %c0_26] : memref<3x27xbf16, #tpu.memory_space<vmem>>, vector<3x27xbf16>
    %cst_27 = arith.constant dense<0.000000e+00> : vector<2x27xf32>
    %32 = tpu.matmul %30, %31, %cst_27 {dimension_numbers = #tpu.dot_dimension_numbers<[1], [0], [0], [1], [0, 0, 1, 1], [], []>} : vector<2x3xbf16>, vector<3x27xbf16>, vector<2x27xf32> -> vector<2x27xf32>
    %33 = arith.addf %29, %32 : vector<2x27xf32>
    %c0_28 = arith.constant 0 : index
    %c0_29 = arith.constant 0 : index
    %34 = vector.load %arg10[%c0_28, %c0_29] : memref<1x27xf32, #tpu.memory_space<vmem>>, vector<1x27xf32>
    %35 = vector.broadcast %34 : vector<1x27xf32> to vector<2x27xf32>
    %36 = arith.addf %33, %35 : vector<2x27xf32>
    %c0_30 = arith.constant 0 : index
    %c0_31 = arith.constant 0 : index
    %37 = vector.load %arg11[%c0_30, %c0_31] : memref<2x27xf32, #tpu.memory_space<vmem>>, vector<2x27xf32>
    tpu.vector_store %arg11[%c0_30, %c0_31], %36 {strides = array<i32>} : memref<2x27xf32, #tpu.memory_space<vmem>>, vector<2x27xf32>,
    return
  }
}

</mosaic_0001>

<bundles_post_ra>
// kernel: touchnet_forward.10
= control target key start
LH: loop header
LB: loop body
LE: loop exit
PB: predicated region body
PF: predicated region fallthrough
CT: control target
= control target key end

     0   :  { %s735_s12 = smov 0   ;;  %s832_s0 = inlined_call_operand.vmem [shape: bf16[1152,81], index: 0, kind: input, shape index: {}]   ;;  %s833_s1 = inlined_call_operand.vmem [shape: bf16[81,16], index: 1, kind: input, shape index: {}]   ;;  %s834_s2 = inlined_call_operand.vmem [shape: f32[1,16], index: 2, kind: input, shape index: {}]   ;;  %s835_s3 = inlined_call_operand.vmem [shape: bf16[1152,16], index: 3, kind: output, shape index: {}]  }
   0x1 LB: > { %s563_s13 = sadd.s32 4294967295, %s712_s12   ;;  %p567_p0 = scmp.ge.s32.totalorder %s712_s12, 1  ;;  %s712_s12 = sphi %s735_s12, %s13_s12  }
   0x2   : > { %p138_p1 = scmp.lt.s32.totalorder %s712_s12, 10 }
   0x4   : > { %p139_p2 = pnand %p567_p0, %p138_p1 }
   0x5   : > { %v692_v0 = vld [vmem:[%s833_s1] sm:$0xff] (!%p139_p2)   ;;  %v693_v1 = vld [vmem:[%s833_s1 + $0x8] sm:$0xff] (!%p139_p2)   ;;  %s568_s18 = sshll.u32 (!%p139_p2), %s563_s13, 4  ;;  %v694_v2 = vld [vmem:[%s833_s1 + $0x10] sm:$0xff] (!%p139_p2)   ;;  %vm307_vm0 = vcmask (!%p139_p2), 1040384   ;;  %vm282_vm1 = vcmask (!%p139_p2), 662528  }
   0x6   : > { %142 = sbr.rel (%p139_p2) target bundleno = 260 (0x104), region = 32  ;;  %643 = vmatprep.subr.bf16.mxu0 (!%p139_p2), %v692_v0  ;;  %671 = vmatprep.subr.bf16.mxu1 (!%p139_p2), %v692_v0  ;;  %p163_p3 = scmp.lt.s32.totalorder (!%p139_p2), %s568_s18, 143  ;;  %v695_v3 = vld [vmem:[%s833_s1 + $0x18] sm:$0xff] (!%p139_p2)   ;;  %v697_v4 = vld [vmem:[%s833_s1 + $0x28] ss:$0 sps:$4 sm:$0x11] (!%p139_p2)  }
   0x7   : > { %644 = vmatpush3.bf16.msra.mxu0 (!%p139_p2), %v692_v0  ;;  %677 = vmatpush3.bf16.msra.mxu1 (!%p139_p2), %v692_v0  ;;  %v696_v7 = vld [vmem:[%s833_s1 + $0x20] sm:$0xff] (!%p139_p2)   ;;  %v714_v8 = vmov (!%p139_p2), 0   ;;  %vm490_vm2 = vcmask (!%p139_p2), 125952  }
   0x8   : > { %645 = vmatprep.subr.bf16.mxu0 (!%p139_p2), %v693_v1  ;;  %672 = vmatprep.subr.bf16.mxu1 (!%p139_p2), %v693_v1  ;;  %v309_v9 = vsel (!%p139_p2), %vm307_vm0, 65535, %v714_v8  ;;  %v572_v17 = vld [vmem:[%s834_s2] ss:$0 sm:$0xff] (!%p139_p2) }
   0x9   : > { %v311_v10 = vand.u32 (!%p139_p2), %v697_v4, %v309_v9 }
   0xb   : > { %646 = vmatpush3.bf16.msra.mxu0 (!%p139_p2), %v693_v1  ;;  %678 = vmatpush3.bf16.msra.mxu1 (!%p139_p2), %v693_v1 }
   0xc   : > { %647 = vmatprep.subr.bf16.mxu0 (!%p139_p2), %v694_v2  ;;  %673 = vmatprep.subr.bf16.mxu1 (!%p139_p2), %v694_v2 }
   0xd   : > { %s837_s18 = smov (!%p163_p3, %s568_s18), 143 }
   0xe   : > { %s569_s23 = sshll.u32 %s837_s18, 2 }
   0xf   : > { %s763_s26 = scalar_lea.vmem %s832_s0, %s569_s23  ;;  %648 = vmatpush3.bf16.msra.mxu0 %v694_v2  ;;  %679 = vmatpush3.bf16.msra.mxu1 %v694_v2  ;;  %s795_s8 = scalar_lea.vmem %s835_s3, %s569_s23 }
  0x10   : > { %v698_v5 = vld [vmem:[%s763_s26] sm:$0xff]   ;;  %649 = vmatprep.subr.bf16.mxu0 %v695_v3  ;;  %674 = vmatprep.subr.bf16.mxu1 %v695_v3  ;;  %v700_v11 = vld [vmem:[%s763_s26 + $0x8] sm:$0xff]   ;;  %v702_v13 = vld [vmem:[%s763_s26 + $0x10] sm:$0xff]  }
  0x11   : > { %v699_v6 = vld [vmem:[%s763_s26 + $0x20] sm:$0xff]   ;;  %655 = vmatprep.mubr.msk.bf16.mxu0 %vm282_vm1, %v698_v5  ;;  %v701_v12 = vld [vmem:[%s763_s26 + $0x28] sm:$0xff]   ;;  %v703_v14 = vld [vmem:[%s763_s26 + $0x30] sm:$0xff]  }
  0x12   : > { %663 = vmatprep.mubr.msk.bf16.mxu1 %vm282_vm1, %v699_v6  ;;  %v704_v15 = vld [vmem:[%s763_s26 + $0x18] sm:$0xff]  }
  0x13   : > { %650 = vmatpush3.bf16.msra.mxu0 %v695_v3  ;;  %680 = vmatpush3.bf16.msra.mxu1 %v695_v3  ;;  %v705_v16 = vld [vmem:[%s763_s26 + $0x38] sm:$0xff]  }
  0x14   : > { %651 = vmatprep.subr.bf16.mxu0 %v696_v7  ;;  %675 = vmatprep.subr.bf16.mxu1 %v696_v7 }
  0x17   : > { %652 = vmatpush3.bf16.msra.mxu0 %v696_v7  ;;  %681 = vmatpush3.bf16.msra.mxu1 %v696_v7 }
  0x18   : > { %653 = vmatprep.subr.bf16.mxu0 %v311_v10  ;;  %676 = vmatprep.subr.bf16.mxu1 %v311_v10 }
  0x1b   : > { %654 = vmatpush3.bf16.msra.mxu0 %v311_v10  ;;  %682 = vmatpush3.bf16.msra.mxu1 %v311_v10 }
  0x1e   : > { %656 = vmatmul.mubr.msk.bf16.vlgmr.msra.gmra.mrb[0].mxu0 %vm282_vm1, %v700_v11  ;;  %664 = vmatmul.mubr.msk.bf16.vlgmr.msra.gmra.mrb[0].mxu1 %vm282_vm1, %v701_v12 }
  0x1f   : > { %659 = vmatprep.mubr.msk.bf16.mxu0 %vm282_vm1, %v702_v13  ;;  %667 = vmatprep.mubr.msk.bf16.mxu1 %vm282_vm1, %v703_v14 }
  0x26   : > { %660 = vmatmul.mubr.msk.bf16.gmra.mrb[4].mxu0 %vm282_vm1, %v704_v15  ;;  %668 = vmatmul.mubr.msk.bf16.gmra.mrb[4].mxu1 %vm282_vm1, %v705_v16 }
  0xf1   : > { %v657_v18 = vpop.f32.mrb[0].mxu0  ;;  %v665_v19 = vpop.f32.mrb[0].mxu1 }
  0xf2   : > { %v356_v20 = vadd.f32 %v657_v18, %v572_v17  ;;  %v388_v21 = vadd.f32 %v665_v19, %v572_v17  ;;  %v347_v22 = vpop.f32.mrb[1].mxu0  ;;  %v379_v23 = vpop.f32.mrb[1].mxu1 }
  0xf3   : > { %v348_v24 = vadd.f32 %v572_v17, %v347_v22  ;;  %v380_v25 = vadd.f32 %v572_v17, %v379_v23  ;;  %v658_v26 = vpop.f32.mrb[2].mxu0  ;;  %v666_v27 = vpop.f32.mrb[2].mxu1 }
  0xf4   : > { %v412_v28 = vmax.f32 %v356_v20, 0.0  ;;  %v420_v29 = vmax.f32 %v388_v21, 0.0  ;;  %v359_v30 = vadd.f32 %v658_v26, %v572_v17  ;;  %v391_v31 = vadd.f32 %v666_v27, %v572_v17  ;;  %v350_v32 = vpop.f32.mrb[3].mxu0  ;;  %v382_v33 = vpop.f32.mrb[3].mxu1 }
  0xf5   : > { %v410_v34 = vmax.f32 %v348_v24, 0.0  ;;  %v418_v35 = vmax.f32 %v380_v25, 0.0  ;;  %v351_v36 = vadd.f32 %v572_v17, %v350_v32  ;;  %v383_v37 = vadd.f32 %v572_v17, %v382_v33 }
  0xf6   : > { %v615_v38 = vpack.c.bf16 %v412_v28, %v412_v28  ;;  %v623_v39 = vpack.c.bf16 %v420_v29, %v420_v29  ;;  %v413_v40 = vmax.f32 %v359_v30, 0.0  ;;  %v421_v41 = vmax.f32 %v391_v31, 0.0 }
  0xf7   : > { %v613_v42 = vpack.c.bf16 %v410_v34, %v410_v34  ;;  %v621_v43 = vpack.c.bf16 %v418_v35, %v418_v35  ;;  %v411_v44 = vmax.f32 %v351_v36, 0.0  ;;  %v419_v45 = vmax.f32 %v383_v37, 0.0 }
  0xf8   : > { %493 = vst.msk [vmem:[%s795_s8 + $0x8] sm:$0xf] %vm490_vm2, %v615_v38  ;;  %501 = vst.msk [vmem:[%s795_s8 + $0x28] sm:$0xf] %vm490_vm2, %v623_v39  ;;  %v616_v46 = vpack.c.bf16 %v413_v40, %v413_v40  ;;  %v624_v47 = vpack.c.bf16 %v421_v41, %v421_v41 }
  0xf9   : > { %491 = vst.msk [vmem:[%s795_s8] sm:$0xf] %vm490_vm2, %v613_v42  ;;  %499 = vst.msk [vmem:[%s795_s8 + $0x20] sm:$0xf] %vm490_vm2, %v621_v43  ;;  %v614_v48 = vpack.c.bf16 %v411_v44, %v411_v44  ;;  %v622_v49 = vpack.c.bf16 %v419_v45, %v419_v45  ;;  %v661_v50 = vpop.f32.mrb[4].mxu0  ;;  %v669_v51 = vpop.f32.mrb[4].mxu1 }
  0xfa   : > { %494 = vst.msk [vmem:[%s795_s8 + $0xc] sm:$0xf] %vm490_vm2, %v616_v46  ;;  %502 = vst.msk [vmem:[%s795_s8 + $0x2c] sm:$0xf] %vm490_vm2, %v624_v47  ;;  %v372_v52 = vadd.f32 %v661_v50, %v572_v17  ;;  %v404_v53 = vadd.f32 %v669_v51, %v572_v17  ;;  %v363_v54 = vpop.f32.mrb[5].mxu0  ;;  %v395_v55 = vpop.f32.mrb[5].mxu1 }
  0xfb   : > { %492 = vst.msk [vmem:[%s795_s8 + $0x4] sm:$0xf] %vm490_vm2, %v614_v48  ;;  %500 = vst.msk [vmem:[%s795_s8 + $0x24] sm:$0xf] %vm490_vm2, %v622_v49  ;;  %v364_v56 = vadd.f32 %v572_v17, %v363_v54  ;;  %v396_v57 = vadd.f32 %v572_v17, %v395_v55  ;;  %v662_v58 = vpop.f32.mrb[6].mxu0  ;;  %v670_v59 = vpop.f32.mrb[6].mxu1 }
  0xfc   : > { %v416_v60 = vmax.f32 %v372_v52, 0.0  ;;  %v424_v61 = vmax.f32 %v404_v53, 0.0  ;;  %v375_v62 = vadd.f32 %v662_v58, %v572_v17  ;;  %v407_v63 = vadd.f32 %v670_v59, %v572_v17  ;;  %v366_v0 = vpop.f32.mrb[7].mxu0  ;;  %v398_v1 = vpop.f32.mrb[7].mxu1 }
  0xfd   : > { %v414_v2 = vmax.f32 %v364_v56, 0.0  ;;  %v422_v3 = vmax.f32 %v396_v57, 0.0  ;;  %v367_v4 = vadd.f32 %v572_v17, %v366_v0  ;;  %v399_v5 = vadd.f32 %v572_v17, %v398_v1 }
  0xfe   : > { %v619_v6 = vpack.c.bf16 %v416_v60, %v416_v60  ;;  %v627_v7 = vpack.c.bf16 %v424_v61, %v424_v61  ;;  %v417_v8 = vmax.f32 %v375_v62, 0.0  ;;  %v425_v9 = vmax.f32 %v407_v63, 0.0 }
  0xff   : > { %v617_v10 = vpack.c.bf16 %v414_v2, %v414_v2  ;;  %v625_v11 = vpack.c.bf16 %v422_v3, %v422_v3  ;;  %v415_v12 = vmax.f32 %v367_v4, 0.0  ;;  %v423_v13 = vmax.f32 %v399_v5, 0.0 }
 0x100   : > { %497 = vst.msk [vmem:[%s795_s8 + $0x18] sm:$0xf] %vm490_vm2, %v619_v6  ;;  %505 = vst.msk [vmem:[%s795_s8 + $0x38] sm:$0xf] %vm490_vm2, %v627_v7  ;;  %v620_v14 = vpack.c.bf16 %v417_v8, %v417_v8  ;;  %v628_v15 = vpack.c.bf16 %v425_v9, %v425_v9 }
 0x101   : > { %495 = vst.msk [vmem:[%s795_s8 + $0x10] sm:$0xf] %vm490_vm2, %v617_v10  ;;  %503 = vst.msk [vmem:[%s795_s8 + $0x30] sm:$0xf] %vm490_vm2, %v625_v11  ;;  %v618_v16 = vpack.c.bf16 %v415_v12, %v415_v12  ;;  %v626_v17 = vpack.c.bf16 %v423_v13, %v423_v13 }
 0x102   : > { %498 = vst.msk [vmem:[%s795_s8 + $0x1c] sm:$0xf] %vm490_vm2, %v620_v14  ;;  %506 = vst.msk [vmem:[%s795_s8 + $0x3c] sm:$0xf] %vm490_vm2, %v628_v15 }
 0x103   : > { %496 = vst.msk [vmem:[%s795_s8 + $0x14] sm:$0xf] %vm490_vm2, %v618_v16  ;;  %504 = vst.msk [vmem:[%s795_s8 + $0x34] sm:$0xf] %vm490_vm2, %v626_v17 }
 0x104 PF: > { %s13_s12 = sadd.s32 1, %s712_s12  }
 0x105   : > { %p10_p4 = scmp.ge.s32.totalorder %s13_s12, 11  }
 0x107   :  { %12 = sbr.rel (!%p10_p4) target bundleno = 1 (0x1), region = 62 }

// kernel: touchnet_forward.11
= control target key start
LH: loop header
LB: loop body
LE: loop exit
PB: predicated region body
PF: predicated region fallthrough
CT: control target
= control target key end

     0   :  { %s1205_s12 = smov 0   ;;  %s1207_s13 = smov 0   ;;  %s1454_s0 = inlined_call_operand.vmem [shape: bf16[288,144], index: 0, kind: input, shape index: {}]   ;;  %s1455_s1 = inlined_call_operand.vmem [shape: bf16[144,16], index: 1, kind: input, shape index: {}]   ;;  %s1456_s2 = inlined_call_operand.vmem [shape: f32[1,16], index: 2, kind: input, shape index: {}]   ;;  %s1457_s3 = inlined_call_operand.vmem [shape: bf16[288,16], index: 3, kind: output, shape index: {}]  }
   0x1   :  { %s1209_s14 = smov 0  }
   0x2 LB: > { %s1218_s15 = sadd.s32 4294967295, %s1150_s14   ;;  %s1220_s16 = sadd.s32 1, %s1150_s14   ;;  %s1150_s14 = sphi %s1209_s14, %s1464_s14   ;;  %s1146_s13 = sphi %s1207_s13, %s1463_s13   ;;  %s1142_s12 = sphi %s1205_s12, %s1462_s12  }
   0x3   : > { %s85_s17 = ssub.s32 %s1150_s14, %s1220_s16  ;;  %s88_s18 = sadd.s32 1, %s1146_s13 }
   0x4   : > { %p86_p0 = scmp.eq.s32.totalorder %s85_s17, 0  ;;  %p98_p1 = scmp.ne.s32.totalorder %s1146_s13, %s1142_s12 }
   0x5   : > { %p99_p2 = scmp.eq.s32.totalorder %s1218_s15, 2  ;;  %p864_p3 = scmp.ge.s32.totalorder %s1150_s14, 1 }
   0x6   : > { %s1228_s19 = scalar_select %p86_p0, %s1146_s13, %s88_s18  }
   0x7   : > { %p1230_p4 = por %p99_p2, %p98_p1  ;;  %p149_p5 = scmp.lt.s32.totalorder %s1150_s14, 4 }
   0x9   : > { %p150_p6 = pnand %p864_p3, %p149_p5 }
   0xa   : > { %v1063_v0 = vld [vmem:[%s1455_s1] sm:$0xff] (!%p150_p6)   ;;  %v1184_v1 = vmov (!%p150_p6), 0   ;;  %s1238_s23 = sshll.u32 (!%p150_p6), %s1218_s15, 4  ;;  %v1064_v2 = vld [vmem:[%s1455_s1 + $0x8] sm:$0xff] (!%p150_p6)   ;;  %v1065_v3 = vld [vmem:[%s1455_s1 + $0x10] sm:$0xff] (!%p150_p6)   ;;  %vm368_vm0 = vcmask (!%p150_p6), 130048  }
   0xb   : > { %153 = sbr.rel (%p150_p6) target bundleno = 352 (0x160), region = 32  ;;  %393 = vmatprep.subr.bf16.mxu0 (!%p150_p6), %v1184_v1  ;;  %956 = vmatprep.subr.bf16.mxu1 (!%p150_p6), %v1184_v1  ;;  %p184_p7 = scmp.lt.s32.totalorder (!%p150_p6), %s1238_s23, 35  ;;  %v1066_v4 = vld [vmem:[%s1455_s1 + $0x18] sm:$0xff] (!%p150_p6)   ;;  %v1067_v7 = vld [vmem:[%s1455_s1 + $0x20] sm:$0xff] (!%p150_p6)   ;;  %v1068_v8 = vld [vmem:[%s1455_s1 + $0x28] sm:$0xff] (!%p150_p6)   ;;  %vm570_vm1 = vcmask (!%p150_p6), 125952  }
   0xc   : > { %394 = vmatpush1.bf16.msra.mxu0 (!%p150_p6), %v1063_v0  ;;  %965 = vmatpush1.bf16.msra.mxu1 (!%p150_p6), %v1063_v0  ;;  %v1069_v9 = vld [vmem:[%s1455_s1 + $0x30] sm:$0xff] (!%p150_p6)   ;;  %v1070_v10 = vld [vmem:[%s1455_s1 + $0x38] sm:$0xff] (!%p150_p6)   ;;  %v1071_v11 = vld [vmem:[%s1455_s1 + $0x40] sm:$0xff] (!%p150_p6)   ;;  %s175_s25 = sand.u32 (!%p150_p6), 1, %s1142_s12  }
   0xd   : > { %395 = vmatprep.subr.bf16.mxu0 (!%p150_p6), %v1184_v1  ;;  %957 = vmatprep.subr.bf16.mxu1 (!%p150_p6), %v1184_v1  ;;  %v1299_v26 = vld [vmem:[%s1456_s2] ss:$0 sm:$0xff] (!%p150_p6)  ;;  %s865_s28 = sshll.u32 (!%p150_p6), %s175_s25, 6 }
   0xe   : > { %s1305_s12 = scalar_lea.vmem (!%p150_p6), [#allocation2], %s865_s28  }
  0x10   : > { %396 = vmatpush1.bf16.msra.mxu0 (!%p150_p6), %v1064_v2  ;;  %966 = vmatpush1.bf16.msra.mxu1 (!%p150_p6), %v1064_v2 }
  0x11   : > { %397 = vmatprep.subr.bf16.mxu0 (!%p150_p6), %v1184_v1  ;;  %958 = vmatprep.subr.bf16.mxu1 (!%p150_p6), %v1184_v1 }
  0x12   : > { %s185_s26 = scalar_select %p184_p7, %s1238_s23, 35 }
  0x13   : > { %s953_s30 = sshll.u32 (%p1230_p4), %s1218_s15, 6 }
  0x14   : > { %s936_s29 = sshll.u32 %s185_s26, 3  ;;  %398 = vmatpush1.bf16.msra.mxu0 %v1065_v3  ;;  %967 = vmatpush1.bf16.msra.mxu1 %v1065_v3  ;;  %s1358_s6 = scalar_lea.vmem (%p1230_p4), %s1457_s3, %s953_s30  }
  0x15   : > { %s1251_s5 = scalar_lea.vmem %s1454_s0, %s936_s29  ;;  %399 = vmatprep.subr.bf16.mxu0 %v1184_v1  ;;  %959 = vmatprep.subr.bf16.mxu1 %v1184_v1  ;;  %s595_s29 = ssub.s32 (%p1230_p4), 36, %s1238_s23 }
  0x16   : > { %v1074_v5 = vld [vmem:[%s1251_s5 + $0x4] ss:$8 sps:$4 sm:$0xff]   ;;  %v1072_v12 = vld [vmem:[%s1251_s5] ss:$8 sps:$4 sm:$0xff]   ;;  %v1078_v14 = vld [vmem:[%s1251_s5 + $0x14] ss:$8 sps:$4 sm:$0xff]  }
  0x17   : > { %v1077_v6 = vld [vmem:[%s1251_s5 + $0x44] ss:$8 sps:$4 sm:$0xff]   ;;  %895 = vmatprep.mubr.msk.bf16.mxu0 %vm368_vm0, %v1074_v5  ;;  %v1075_v13 = vld [vmem:[%s1251_s5 + $0x40] ss:$8 sps:$4 sm:$0xff]   ;;  %v1080_v15 = vld [vmem:[%s1251_s5 + $0x54] ss:$8 sps:$4 sm:$0xff]  }
  0x18   : > { %899 = vmatprep.mubr.msk.bf16.mxu1 %vm368_vm0, %v1077_v6  ;;  %400 = vmatpush1.bf16.msra.mxu0 %v1066_v4  ;;  %v1082_v16 = vld [vmem:[%s1251_s5 + $0x10] ss:$8 sps:$4 sm:$0xff]   ;;  %v1084_v18 = vld [vmem:[%s1251_s5 + $0x24] ss:$8 sps:$4 sm:$0xff]   ;;  %v1088_v20 = vld [vmem:[%s1251_s5 + $0x20] ss:$8 sps:$4 sm:$0xff]  }
  0x19   : > { %968 = vmatpush1.bf16.msra.mxu1 %v1066_v4  ;;  %401 = vmatprep.subr.bf16.mxu0 %v1184_v1  ;;  %v1083_v17 = vld [vmem:[%s1251_s5 + $0x50] ss:$8 sps:$4 sm:$0xff]   ;;  %v1086_v19 = vld [vmem:[%s1251_s5 + $0x64] ss:$8 sps:$4 sm:$0xff]   ;;  %v1089_v21 = vld [vmem:[%s1251_s5 + $0x60] ss:$8 sps:$4 sm:$0xff]  }
  0x1a   : > { %960 = vmatprep.subr.bf16.mxu1 %v1184_v1  ;;  %v1090_v22 = vld [vmem:[%s1251_s5 + $0x34] ss:$8 sps:$4 sm:$0xff]   ;;  %v1094_v24 = vld [vmem:[%s1251_s5 + $0x30] ss:$8 sps:$4 sm:$0xff]   ;;  %p596_p8 = scmp.lt.s32.totalorder (%p1230_p4), %s595_s29, 16 }
  0x1b   : > { %v1092_v23 = vld [vmem:[%s1251_s5 + $0x74] ss:$8 sps:$4 sm:$0xff]   ;;  %v1095_v25 = vld [vmem:[%s1251_s5 + $0x70] ss:$8 sps:$4 sm:$0xff]  }
  0x1c   : > { %402 = vmatpush1.bf16.msra.mxu0 %v1067_v7 }
  0x1d   : > { %969 = vmatpush1.bf16.msra.mxu1 %v1067_v7  ;;  %403 = vmatprep.subr.bf16.mxu0 %v1184_v1 }
  0x1e   : > { %961 = vmatprep.subr.bf16.mxu1 %v1184_v1 }
  0x20   : > { %404 = vmatpush1.bf16.msra.mxu0 %v1068_v8 }
  0x21   : > { %970 = vmatpush1.bf16.msra.mxu1 %v1068_v8  ;;  %405 = vmatprep.subr.bf16.mxu0 %v1184_v1 }
  0x22   : > { %962 = vmatprep.subr.bf16.mxu1 %v1184_v1 }
  0x24   : > { %406 = vmatpush1.bf16.msra.mxu0 %v1069_v9 }
  0x25   : > { %971 = vmatpush1.bf16.msra.mxu1 %v1069_v9  ;;  %407 = vmatprep.subr.bf16.mxu0 %v1184_v1 }
  0x26   : > { %963 = vmatprep.subr.bf16.mxu1 %v1184_v1 }
  0x28   : > { %408 = vmatpush1.bf16.msra.mxu0 %v1070_v10 }
  0x29   : > { %972 = vmatpush1.bf16.msra.mxu1 %v1070_v10  ;;  %409 = vmatprep.subr.bf16.mxu0 %v1184_v1 }
  0x2a   : > { %964 = vmatprep.subr.bf16.mxu1 %v1184_v1 }
  0x2c   : > { %410 = vmatpush1.bf16.msra.mxu0 %v1071_v11 }
  0x2d   : > { %973 = vmatpush1.bf16.msra.mxu1 %v1071_v11 }
  0x2f   : > { %426 = vmatmul.mubr.bf16.vlgmr.msra.gmra.mrb[0].mxu0 %v1072_v12 }
  0x30   : > { %458 = vmatmul.mubr.bf16.vlgmr.msra.gmra.mrb[0].mxu1 %v1075_v13  ;;  %896 = vmatprep.mubr.msk.bf16.mxu0 %vm368_vm0, %v1078_v14 }
  0x31   : > { %900 = vmatprep.mubr.msk.bf16.mxu1 %vm368_vm0, %v1080_v15 }
  0x37   : > { %434 = vmatmul.mubr.bf16.gmra.mrb[4].mxu0 %v1082_v16 }
  0x38   : > { %466 = vmatmul.mubr.bf16.gmra.mrb[4].mxu1 %v1083_v17  ;;  %897 = vmatprep.mubr.msk.bf16.mxu0 %vm368_vm0, %v1084_v18 }
  0x39   : > { %901 = vmatprep.mubr.msk.bf16.mxu1 %vm368_vm0, %v1086_v19 }
  0x3f   : > { %442 = vmatmul.mubr.bf16.gmra.mrb[8].mxu0 %v1088_v20 }
  0x40   : > { %474 = vmatmul.mubr.bf16.gmra.mrb[8].mxu1 %v1089_v21  ;;  %898 = vmatprep.mubr.msk.bf16.mxu0 %vm368_vm0, %v1090_v22 }
  0x41   : > { %902 = vmatprep.mubr.msk.bf16.mxu1 %vm368_vm0, %v1092_v23 }
  0x47   : > { %450 = vmatmul.mubr.bf16.gmra.mrb[12].mxu0 %v1094_v24 }
  0x48   : > { %482 = vmatmul.mubr.bf16.gmra.mrb[12].mxu1 %v1095_v25 }
 0x102   : > { %v427_v27 = vpop.f32.mrb[0].mxu0 }
 0x103   : > { %v459_v28 = vpop.f32.mrb[0].mxu1  ;;  %v428_v29 = vadd.f32 %v1299_v26, %v427_v27  ;;  %v429_v31 = vpop.f32.mrb[1].mxu0 }
 0x104   : > { %v460_v30 = vadd.f32 %v1299_v26, %v459_v28  ;;  %v461_v32 = vpop.f32.mrb[1].mxu1  ;;  %v430_v33 = vpop.f32.mrb[2].mxu0 }
 0x105   : > { %v462_v34 = vpop.f32.mrb[2].mxu1  ;;  %v490_v35 = vmax.f32 %v428_v29, 0.0  ;;  %v431_v37 = vadd.f32 %v1299_v26, %v430_v33  ;;  %v432_v39 = vpop.f32.mrb[3].mxu0 }
 0x106   : > { %v498_v36 = vmax.f32 %v460_v30, 0.0  ;;  %v463_v38 = vadd.f32 %v1299_v26, %v462_v34  ;;  %v464_v40 = vpop.f32.mrb[3].mxu1 }
 0x107   : > { %v937_v41 = vpack.c.bf16 %v490_v35, %v490_v35  ;;  %v491_v43 = vmax.f32 %v431_v37, 0.0 }
 0x108   : > { %v945_v42 = vpack.c.bf16 %v498_v36, %v498_v36  ;;  %v499_v44 = vmax.f32 %v463_v38, 0.0 }
 0x109   : > { %571 = vst.msk [vmem:[%s1305_s12] sm:$0xf] %vm570_vm1, %v937_v41  ;;  %v938_v45 = vpack.c.bf16 %v491_v43, %v491_v43 }
 0x10a   : > { %579 = vst.msk [vmem:[%s1305_s12 + $0x20] sm:$0xf] %vm570_vm1, %v945_v42  ;;  %v946_v46 = vpack.c.bf16 %v499_v44, %v499_v44  ;;  %v435_v47 = vpop.f32.mrb[4].mxu0 }
 0x10b   : > { %v467_v48 = vpop.f32.mrb[4].mxu1  ;;  %572 = vst.msk [vmem:[%s1305_s12 + $0x4] sm:$0xf] %vm570_vm1, %v938_v45  ;;  %v436_v49 = vadd.f32 %v1299_v26, %v435_v47  ;;  %v437_v51 = vpop.f32.mrb[5].mxu0 }
 0x10c   : > { %580 = vst.msk [vmem:[%s1305_s12 + $0x24] sm:$0xf] %vm570_vm1, %v946_v46  ;;  %v468_v50 = vadd.f32 %v1299_v26, %v467_v48  ;;  %v469_v52 = vpop.f32.mrb[5].mxu1  ;;  %v438_v53 = vpop.f32.mrb[6].mxu0 }
 0x10d   : > { %v470_v54 = vpop.f32.mrb[6].mxu1  ;;  %v492_v55 = vmax.f32 %v436_v49, 0.0  ;;  %v439_v57 = vadd.f32 %v1299_v26, %v438_v53  ;;  %v440_v59 = vpop.f32.mrb[7].mxu0 }
 0x10e   : > { %v500_v56 = vmax.f32 %v468_v50, 0.0  ;;  %v471_v58 = vadd.f32 %v1299_v26, %v470_v54  ;;  %v472_v60 = vpop.f32.mrb[7].mxu1 }
 0x10f   : > { %v939_v61 = vpack.c.bf16 %v492_v55, %v492_v55  ;;  %v493_v63 = vmax.f32 %v439_v57, 0.0 }
 0x110   : > { %v947_v62 = vpack.c.bf16 %v500_v56, %v500_v56  ;;  %v501_v0 = vmax.f32 %v471_v58, 0.0 }
 0x111   : > { %573 = vst.msk [vmem:[%s1305_s12 + $0x8] sm:$0xf] %vm570_vm1, %v939_v61  ;;  %v940_v1 = vpack.c.bf16 %v493_v63, %v493_v63 }
 0x112   : > { %581 = vst.msk [vmem:[%s1305_s12 + $0x28] sm:$0xf] %vm570_vm1, %v947_v62  ;;  %v948_v2 = vpack.c.bf16 %v501_v0, %v501_v0  ;;  %v443_v3 = vpop.f32.mrb[8].mxu0 }
 0x113   : > { %v475_v4 = vpop.f32.mrb[8].mxu1  ;;  %574 = vst.msk [vmem:[%s1305_s12 + $0xc] sm:$0xf] %vm570_vm1, %v940_v1  ;;  %v444_v5 = vadd.f32 %v1299_v26, %v443_v3  ;;  %v445_v7 = vpop.f32.mrb[9].mxu0 }
 0x114   : > { %582 = vst.msk [vmem:[%s1305_s12 + $0x2c] sm:$0xf] %vm570_vm1, %v948_v2  ;;  %v476_v6 = vadd.f32 %v1299_v26, %v475_v4  ;;  %v477_v8 = vpop.f32.mrb[9].mxu1  ;;  %v446_v9 = vpop.f32.mrb[10].mxu0 }
 0x115   : > { %v478_v10 = vpop.f32.mrb[10].mxu1  ;;  %v494_v11 = vmax.f32 %v444_v5, 0.0  ;;  %v447_v13 = vadd.f32 %v1299_v26, %v446_v9  ;;  %v448_v15 = vpop.f32.mrb[11].mxu0 }
 0x116   : > { %v502_v12 = vmax.f32 %v476_v6, 0.0  ;;  %v479_v14 = vadd.f32 %v1299_v26, %v478_v10  ;;  %v480_v16 = vpop.f32.mrb[11].mxu1 }
 0x117   : > { %v941_v17 = vpack.c.bf16 %v494_v11, %v494_v11  ;;  %v495_v19 = vmax.f32 %v447_v13, 0.0 }
 0x118   : > { %v949_v18 = vpack.c.bf16 %v502_v12, %v502_v12  ;;  %v503_v20 = vmax.f32 %v479_v14, 0.0 }
 0x119   : > { %575 = vst.msk [vmem:[%s1305_s12 + $0x10] sm:$0xf] %vm570_vm1, %v941_v17  ;;  %v942_v21 = vpack.c.bf16 %v495_v19, %v495_v19 }
 0x11a   : > { %583 = vst.msk [vmem:[%s1305_s12 + $0x30] sm:$0xf] %vm570_vm1, %v949_v18  ;;  %v950_v22 = vpack.c.bf16 %v503_v20, %v503_v20  ;;  %v451_v23 = vpop.f32.mrb[12].mxu0 }
 0x11b   : > { %v483_v24 = vpop.f32.mrb[12].mxu1  ;;  %576 = vst.msk [vmem:[%s1305_s12 + $0x14] sm:$0xf] %vm570_vm1, %v942_v21  ;;  %v452_v25 = vadd.f32 %v1299_v26, %v451_v23  ;;  %v453_v28 = vpop.f32.mrb[13].mxu0 }
 0x11c   : > { %584 = vst.msk [vmem:[%s1305_s12 + $0x34] sm:$0xf] %vm570_vm1, %v950_v22  ;;  %v484_v27 = vadd.f32 %v1299_v26, %v483_v24  ;;  %v485_v29 = vpop.f32.mrb[13].mxu1  ;;  %v454_v30 = vpop.f32.mrb[14].mxu0 }
 0x11d   : > { %v486_v31 = vpop.f32.mrb[14].mxu1  ;;  %v496_v32 = vmax.f32 %v452_v25, 0.0  ;;  %v455_v34 = vadd.f32 %v1299_v26, %v454_v30  ;;  %v456_v36 = vpop.f32.mrb[15].mxu0 }
 0x11e   : > { %v504_v33 = vmax.f32 %v484_v27, 0.0  ;;  %v487_v35 = vadd.f32 %v1299_v26, %v486_v31  ;;  %v488_v37 = vpop.f32.mrb[15].mxu1  ;;  %593 = sbr.rel (!%p1230_p4) target bundleno = 352 (0x160), region = 36 }
 0x11f   : > { %v943_v38 = vpack.c.bf16 %v496_v32, %v496_v32  ;;  %v497_v40 = vmax.f32 %v455_v34, 0.0 }
 0x120   : > { %v951_v39 = vpack.c.bf16 %v504_v33, %v504_v33  ;;  %v505_v41 = vmax.f32 %v487_v35, 0.0 }
 0x121   : > { %577 = vst.msk [vmem:[%s1305_s12 + $0x18] sm:$0xf] %vm570_vm1, %v943_v38  ;;  %v944_v42 = vpack.c.bf16 %v497_v40, %v497_v40 }
 0x122   : > { %585 = vst.msk [vmem:[%s1305_s12 + $0x38] sm:$0xf] %vm570_vm1, %v951_v39  ;;  %v952_v43 = vpack.c.bf16 %v505_v41, %v505_v41 }
 0x123   : > { %578 = vst.msk [vmem:[%s1305_s12 + $0x1c] sm:$0xf] %vm570_vm1, %v944_v42 }
 0x124   : > { %586 = vst.msk [vmem:[%s1305_s12 + $0x3c] sm:$0xf] %vm570_vm1, %v952_v43 }
 0x125   : > { %s1466_s29 = smov (!%p596_p8, %s595_s29), 16 }
 0x126   : > { %s921_s7 = sshll.u32 %s1466_s29, 6 }
 0x127   : > { %p924_p9 = scmp.eq.s32.totalorder %s921_s7, 0 }
 0x128   : > { %s1364_s8 = sshrl.u32 (!%p924_p9), %s1466_s29, 4 }
 0x129   : > { %604 = sbr.rel (%p924_p9) target bundleno = 352 (0x160), region = 40  ;;  %p925_p10 = scmp.le.s32.totalorder (!%p924_p9), %s1364_s8, 0 }
 0x130   : > { %817 = sbr.rel (%p925_p10) target bundleno = 331 (0x14b), region = 112  ;;  %s1459_s15 = smov (!%p925_p10), %s1358_s6 }
 0x131   : > { %s1460_s20 = smov (!%p925_p10), %s1305_s12  ;;  %s1373_s23 = smov (!%p925_p10), 0  }
 0x132   : > { %s1375_s9 = smov (!%p925_p10), 0  }
 0x137 LB: >> { %v620_v26 = vld [vmem:[%s1158_s20] sm:$0xf]  ;;  %v622_v44 = vld [vmem:[%s1158_s20 + $0x4] sm:$0xf]  ;;  %v624_v45 = vld [vmem:[%s1158_s20 + $0x8] sm:$0xf]  ;;  %s1166_s9 = sphi %s1375_s9, %s614_s9   ;;  %s1162_s23 = sphi %s1373_s23, %s1461_s23   ;;  %s1158_s20 = sphi %s1460_s20, %s657_s20   ;;  %s1154_s15 = sphi %s1459_s15, %s658_s15  }
 0x138   : >> { %621 = vst [vmem:[%s1154_s15] sm:$0xf] %v620_v26  ;;  %623 = vst [vmem:[%s1154_s15 + $0x4] sm:$0xf] %v622_v44  ;;  %v626_v46 = vld [vmem:[%s1158_s20 + $0xc] sm:$0xf]  ;;  %s652_s10 = sadd.s32 1, %s1162_s23 }
 0x139   : >> { %625 = vst [vmem:[%s1154_s15 + $0x8] sm:$0xf] %v624_v45  ;;  %v628_v47 = vld [vmem:[%s1158_s20 + $0x10] sm:$0xf]  ;;  %v630_v48 = vld [vmem:[%s1158_s20 + $0x14] sm:$0xf]  ;;  %p653_p11 = scmp.ge.s32.totalorder %s652_s10, %s1364_s8 }
 0x13a   : >> { %627 = vst [vmem:[%s1154_s15 + $0xc] sm:$0xf] %v626_v46  ;;  %629 = vst [vmem:[%s1154_s15 + $0x10] sm:$0xf] %v628_v47  ;;  %v632_v49 = vld [vmem:[%s1158_s20 + $0x18] sm:$0xf] }
 0x13b   : >> { %631 = vst [vmem:[%s1154_s15 + $0x14] sm:$0xf] %v630_v48  ;;  %v634_v50 = vld [vmem:[%s1158_s20 + $0x1c] sm:$0xf]  ;;  %v636_v51 = vld [vmem:[%s1158_s20 + $0x20] sm:$0xf] }
 0x13c   : >> { %633 = vst [vmem:[%s1154_s15 + $0x18] sm:$0xf] %v632_v49  ;;  %635 = vst [vmem:[%s1154_s15 + $0x1c] sm:$0xf] %v634_v50  ;;  %v638_v52 = vld [vmem:[%s1158_s20 + $0x24] sm:$0xf] }
 0x13d   : >> { %637 = vst [vmem:[%s1154_s15 + $0x20] sm:$0xf] %v636_v51  ;;  %v640_v53 = vld [vmem:[%s1158_s20 + $0x28] sm:$0xf]  ;;  %v642_v54 = vld [vmem:[%s1158_s20 + $0x2c] sm:$0xf] }
 0x13e   : >> { %639 = vst [vmem:[%s1154_s15 + $0x24] sm:$0xf] %v638_v52  ;;  %641 = vst [vmem:[%s1154_s15 + $0x28] sm:$0xf] %v640_v53  ;;  %v644_v55 = vld [vmem:[%s1158_s20 + $0x30] sm:$0xf] }
 0x13f   : >> { %643 = vst [vmem:[%s1154_s15 + $0x2c] sm:$0xf] %v642_v54  ;;  %v646_v56 = vld [vmem:[%s1158_s20 + $0x34] sm:$0xf]  ;;  %v648_v57 = vld [vmem:[%s1158_s20 + $0x38] sm:$0xf] }
 0x140   : >> { %645 = vst [vmem:[%s1154_s15 + $0x30] sm:$0xf] %v644_v55  ;;  %647 = vst [vmem:[%s1154_s15 + $0x34] sm:$0xf] %v646_v56  ;;  %v650_v58 = vld [vmem:[%s1158_s20 + $0x3c] sm:$0xf] }
 0x141   : >> { %649 = vst [vmem:[%s1154_s15 + $0x38] sm:$0xf] %v648_v57  ;;  %651 = vst [vmem:[%s1154_s15 + $0x3c] sm:$0xf] %v650_v58  ;;  %s1468_s10 = smov (%p653_p11, %s652_s10), 0  ;;  %s614_s9 = sadd.s32 1, %s1166_s9  }
 0x142   : >> { %s926_s11 = sshll.u32 %s1468_s10, 6  ;;  %p613_p12 = scmp.ge.s32.totalorder %s614_s9, %s1364_s8 }
 0x143   : >> { %s657_s20 = scalar_lea.vmem %s1305_s12, %s926_s11 [#allocation2]   ;;  %s658_s15 = scalar_lea.vmem %s1358_s6, %s926_s11  }
 0x144   : >> { %s1461_s23 = smov %s1468_s10  ;;  %616 = sbr.rel (!%p613_p12) target bundleno = 311 (0x137), region = 118 }
 0x14b PF: > { %s1436_s14 = sand.u32 15, %s1466_s29   ;;  %s954_s17 = sshll.u32 %s1364_s8, 6 }
 0x14c   : > { %s663_s18 = scalar_lea.vmem %s1305_s12, %s954_s17 [#allocation2]   ;;  %s665_s21 = scalar_lea.vmem %s1358_s6, %s954_s17  }
 0x14d   : > { %p931_p13 = scmp.le.s32.totalorder %s1436_s14, 0 }
 0x14e   : > { %s1168_s22 = smov (!%p931_p13), %s665_s21   ;;  %s1172_s24 = smov (!%p931_p13), %s663_s18  }
 0x14f   : > { %831 = sbr.rel (%p931_p13) target bundleno = 352 (0x160), region = 123  ;;  %s1176_s25 = smov (!%p931_p13), 0  }
 0x150   : > { %s1180_s26 = smov (!%p931_p13), 0  }
 0x156 LB: >> { %v675_v59 = vld [vmem:[%s1174_s24] sm:$0xf]  ;;  %s677_s27 = sadd.s32 1, %s1178_s25  ;;  %s669_s26 = sadd.s32 1, %s1182_s26   ;;  %s1182_s26 = sphi %s1180_s26, %s669_s26   ;;  %s1178_s25 = sphi %s1176_s25, %s1177_s25   ;;  %s1174_s24 = sphi %s1172_s24, %s682_s24   ;;  %s1170_s22 = sphi %s1168_s22, %s683_s22  }
 0x157   : >> { %676 = vst [vmem:[%s1170_s22] sm:$0xf] %v675_v59  ;;  %p678_p0 = scmp.ge.s32.totalorder %s677_s27, %s1436_s14  ;;  %p668_p1 = scmp.ge.s32.totalorder %s669_s26, %s1436_s14 }
 0x159   : >> { %s1470_s27 = smov (%p678_p0, %s677_s27), 0  ;;  %671 = sbr.rel (!%p668_p1) target bundleno = 342 (0x156), region = 129 }
 0x15a   : >> { %s932_s28 = sshll.u32 %s1470_s27, 2  ;;  %s1177_s25 = smov %s1470_s27  }
 0x15b   : >> { %s682_s24 = scalar_lea.vmem %s663_s18, %s932_s28 [#allocation2]   ;;  %s683_s22 = scalar_lea.vmem %s665_s21, %s932_s28  }
 0x160 PF: > { %p10_p2 = scmp.ge.s32.totalorder %s1220_s16, 5   ;;  %s1462_s12 = smov %s1146_s13 }
 0x161   : > { %s1463_s13 = smov %s1228_s19  ;;  %s1464_s14 = smov %s1220_s16 }
 0x162   :  { %12 = sbr.rel (!%p10_p2) target bundleno = 2 (0x2), region = 140 }

// kernel: touchnet_forward.12
= control target key start
LH: loop header
LB: loop body
LE: loop exit
PB: predicated region body
PF: predicated region fallthrough
CT: control target
= control target key end

     0   :  { %s1380_s15 = smov 0   ;;  %s1382_s16 = smov 0   ;;  %s1646_s0 = inlined_call_operand.vmem [shape: bf16[288,144], index: 0, kind: input, shape index: {}]   ;;  %s1647_s1 = inlined_call_operand.vmem [shape: bf16[144,16], index: 1, kind: input, shape index: {}]   ;;  %s1648_s2 = inlined_call_operand.vmem [shape: f32[1,16], index: 2, kind: input, shape index: {}]   ;;  %s1649_s3 = inlined_call_operand.vmem [shape: bf16[288,16], index: 3, kind: input, shape index: {}]   ;;  %s1650_s4 = inlined_call_operand.vmem [shape: bf16[288,16], index: 4, kind: output, shape index: {}]  }
   0x1   :  { %s1384_s17 = smov 0  }
   0x2 LB: > { %s1393_s18 = sadd.s32 4294967295, %s1320_s17   ;;  %s1395_s19 = sadd.s32 1, %s1320_s17   ;;  %s1320_s17 = sphi %s1384_s17, %s1657_s17   ;;  %s1316_s16 = sphi %s1382_s16, %s1656_s16   ;;  %s1312_s15 = sphi %s1380_s15, %s1655_s15  }
   0x3   : > { %s112_s20 = ssub.s32 %s1320_s17, %s1395_s19  ;;  %s115_s21 = sadd.s32 1, %s1316_s16 }
   0x4   : > { %p113_p0 = scmp.eq.s32.totalorder %s112_s20, 0  ;;  %p125_p1 = scmp.ne.s32.totalorder %s1316_s16, %s1312_s15 }
   0x5   : > { %p126_p2 = scmp.eq.s32.totalorder %s1393_s18, 2  ;;  %p993_p3 = scmp.ge.s32.totalorder %s1320_s17, 1 }
   0x6   : > { %s1403_s22 = scalar_select %p113_p0, %s1316_s16, %s115_s21  }
   0x7   : > { %p1405_p4 = por %p126_p2, %p125_p1  ;;  %p193_p5 = scmp.lt.s32.totalorder %s1320_s17, 4 }
   0x9   : > { %p194_p6 = pnand %p993_p3, %p193_p5 }
   0xa   : > { %v1233_v0 = vld [vmem:[%s1647_s1] sm:$0xff] (!%p194_p6)   ;;  %v1354_v1 = vmov (!%p194_p6), 0   ;;  %s1413_s26 = sshll.u32 (!%p194_p6), %s1393_s18, 4  ;;  %v1234_v2 = vld [vmem:[%s1647_s1 + $0x8] sm:$0xff] (!%p194_p6)   ;;  %v1235_v3 = vld [vmem:[%s1647_s1 + $0x10] sm:$0xff] (!%p194_p6)   ;;  %vm437_vm0 = vcmask (!%p194_p6), 130048  }
   0xb   : > { %197 = sbr.rel (%p194_p6) target bundleno = 354 (0x162), region = 36  ;;  %462 = vmatprep.subr.bf16.mxu0 (!%p194_p6), %v1354_v1  ;;  %1126 = vmatprep.subr.bf16.mxu1 (!%p194_p6), %v1354_v1  ;;  %p239_p7 = scmp.lt.s32.totalorder (!%p194_p6), %s1413_s26, 35  ;;  %v1236_v4 = vld [vmem:[%s1647_s1 + $0x18] sm:$0xff] (!%p194_p6)   ;;  %v1237_v7 = vld [vmem:[%s1647_s1 + $0x20] sm:$0xff] (!%p194_p6)   ;;  %v1238_v8 = vld [vmem:[%s1647_s1 + $0x28] sm:$0xff] (!%p194_p6)   ;;  %vm687_vm1 = vcmask (!%p194_p6), 125952  }
   0xc   : > { %463 = vmatpush1.bf16.msra.mxu0 (!%p194_p6), %v1233_v0  ;;  %1135 = vmatpush1.bf16.msra.mxu1 (!%p194_p6), %v1233_v0  ;;  %v1239_v9 = vld [vmem:[%s1647_s1 + $0x30] sm:$0xff] (!%p194_p6)   ;;  %v1240_v10 = vld [vmem:[%s1647_s1 + $0x38] sm:$0xff] (!%p194_p6)   ;;  %v1241_v11 = vld [vmem:[%s1647_s1 + $0x40] sm:$0xff] (!%p194_p6)  }
   0xd   : > { %464 = vmatprep.subr.bf16.mxu0 (!%p194_p6), %v1354_v1  ;;  %1127 = vmatprep.subr.bf16.mxu1 (!%p194_p6), %v1354_v1  ;;  %v1484_v28 = vld [vmem:[%s1648_s2] ss:$0 sm:$0xff] (!%p194_p6) }
  0x10   : > { %465 = vmatpush1.bf16.msra.mxu0 (!%p194_p6), %v1234_v2  ;;  %1136 = vmatpush1.bf16.msra.mxu1 (!%p194_p6), %v1234_v2 }
  0x11   : > { %466 = vmatprep.subr.bf16.mxu0 (!%p194_p6), %v1354_v1  ;;  %1128 = vmatprep.subr.bf16.mxu1 (!%p194_p6), %v1354_v1 }
  0x12   : > { %s1420_s29 = scalar_select %p239_p7, %s1413_s26, 35 }
  0x13   : > { %s712_s11 = ssub.s32 (%p1405_p4), 36, %s1413_s26  ;;  %s1084_s12 = sshll.u32 (%p1405_p4), %s1393_s18, 6 }
  0x14   : > { %s1067_s6 = sshll.u32 %s1420_s29, 3  ;;  %467 = vmatpush1.bf16.msra.mxu0 %v1235_v3  ;;  %1137 = vmatpush1.bf16.msra.mxu1 %v1235_v3  ;;  %s999_s30 = sshll.u32 %s1420_s29, 2 }
  0x15   : > { %s1429_s9 = scalar_lea.vmem %s1646_s0, %s1067_s6  ;;  %468 = vmatprep.subr.bf16.mxu0 %v1354_v1  ;;  %1129 = vmatprep.subr.bf16.mxu1 %v1354_v1  ;;  %s1477_s7 = scalar_lea.vmem %s1649_s3, %s999_s30 }
  0x16   : > { %v1244_v5 = vld [vmem:[%s1429_s9 + $0x4] ss:$8 sps:$4 sm:$0xff]   ;;  %v1242_v12 = vld [vmem:[%s1429_s9] ss:$8 sps:$4 sm:$0xff]   ;;  %v1248_v14 = vld [vmem:[%s1429_s9 + $0x14] ss:$8 sps:$4 sm:$0xff]   ;;  %s1550_s17 = scalar_lea.vmem (%p1405_p4), %s1650_s4, %s1084_s12  }
  0x17   : > { %v1247_v6 = vld [vmem:[%s1429_s9 + $0x44] ss:$8 sps:$4 sm:$0xff]   ;;  %1026 = vmatprep.mubr.msk.bf16.mxu0 %vm437_vm0, %v1244_v5  ;;  %v1245_v13 = vld [vmem:[%s1429_s9 + $0x40] ss:$8 sps:$4 sm:$0xff]   ;;  %v1250_v15 = vld [vmem:[%s1429_s9 + $0x54] ss:$8 sps:$4 sm:$0xff]  }
  0x18   : > { %1030 = vmatprep.mubr.msk.bf16.mxu1 %vm437_vm0, %v1247_v6  ;;  %469 = vmatpush1.bf16.msra.mxu0 %v1236_v4  ;;  %v1252_v16 = vld [vmem:[%s1429_s9 + $0x10] ss:$8 sps:$4 sm:$0xff]   ;;  %v1254_v18 = vld [vmem:[%s1429_s9 + $0x24] ss:$8 sps:$4 sm:$0xff]   ;;  %v1258_v20 = vld [vmem:[%s1429_s9 + $0x20] ss:$8 sps:$4 sm:$0xff]  }
  0x19   : > { %1138 = vmatpush1.bf16.msra.mxu1 %v1236_v4  ;;  %470 = vmatprep.subr.bf16.mxu0 %v1354_v1  ;;  %v1253_v17 = vld [vmem:[%s1429_s9 + $0x50] ss:$8 sps:$4 sm:$0xff]   ;;  %v1256_v19 = vld [vmem:[%s1429_s9 + $0x64] ss:$8 sps:$4 sm:$0xff]   ;;  %v1259_v21 = vld [vmem:[%s1429_s9 + $0x60] ss:$8 sps:$4 sm:$0xff]  }
  0x1a   : > { %1130 = vmatprep.subr.bf16.mxu1 %v1354_v1  ;;  %v1260_v22 = vld [vmem:[%s1429_s9 + $0x34] ss:$8 sps:$4 sm:$0xff]   ;;  %v1264_v24 = vld [vmem:[%s1429_s9 + $0x30] ss:$8 sps:$4 sm:$0xff]   ;;  %v1088_v26 = vld [vmem:[%s1477_s7] sm:$0xff]   ;;  %p713_p8 = scmp.lt.s32.totalorder (%p1405_p4), %s712_s11, 16 }
  0x1b   : > { %v1262_v23 = vld [vmem:[%s1429_s9 + $0x74] ss:$8 sps:$4 sm:$0xff]   ;;  %v1265_v25 = vld [vmem:[%s1429_s9 + $0x70] ss:$8 sps:$4 sm:$0xff]   ;;  %v1122_v27 = vld [vmem:[%s1477_s7 + $0x20] sm:$0xff]   ;;  %v1089_v29 = vunpack.c.l.bf16 %v1088_v26  ;;  %s230_s9 = sand.u32 1, %s1312_s15   ;;  %v1090_v37 = vunpack.c.h.bf16 %v1088_v26 }
  0x1c   : > { %471 = vmatpush1.bf16.msra.mxu0 %v1237_v7  ;;  %v1105_v30 = vunpack.c.l.bf16 %v1122_v27  ;;  %v1106_v38 = vunpack.c.h.bf16 %v1122_v27  ;;  %s994_s29 = sshll.u32 %s230_s9, 6  ;;  %v1119_v47 = vld [vmem:[%s1477_s7 + $0x8] sm:$0xff]  }
  0x1d   : > { %1139 = vmatpush1.bf16.msra.mxu1 %v1237_v7  ;;  %472 = vmatprep.subr.bf16.mxu0 %v1354_v1  ;;  %v1123_v48 = vld [vmem:[%s1477_s7 + $0x28] sm:$0xff]   ;;  %v1093_v53 = vunpack.c.l.bf16 %v1119_v47  ;;  %v1094_v61 = vunpack.c.h.bf16 %v1119_v47  ;;  %s1493_s15 = scalar_lea.vmem [#allocation2], %s994_s29  }
  0x1e   : > { %1131 = vmatprep.subr.bf16.mxu1 %v1354_v1  ;;  %v1109_v54 = vunpack.c.l.bf16 %v1123_v48  ;;  %v1110_v62 = vunpack.c.h.bf16 %v1123_v48 }
  0x20   : > { %473 = vmatpush1.bf16.msra.mxu0 %v1238_v8 }
  0x21   : > { %1140 = vmatpush1.bf16.msra.mxu1 %v1238_v8  ;;  %474 = vmatprep.subr.bf16.mxu0 %v1354_v1 }
  0x22   : > { %1132 = vmatprep.subr.bf16.mxu1 %v1354_v1 }
  0x24   : > { %475 = vmatpush1.bf16.msra.mxu0 %v1239_v9 }
  0x25   : > { %1141 = vmatpush1.bf16.msra.mxu1 %v1239_v9  ;;  %476 = vmatprep.subr.bf16.mxu0 %v1354_v1 }
  0x26   : > { %1133 = vmatprep.subr.bf16.mxu1 %v1354_v1 }
  0x28   : > { %477 = vmatpush1.bf16.msra.mxu0 %v1240_v10 }
  0x29   : > { %1142 = vmatpush1.bf16.msra.mxu1 %v1240_v10  ;;  %478 = vmatprep.subr.bf16.mxu0 %v1354_v1 }
  0x2a   : > { %1134 = vmatprep.subr.bf16.mxu1 %v1354_v1 }
  0x2c   : > { %479 = vmatpush1.bf16.msra.mxu0 %v1241_v11 }
  0x2d   : > { %1143 = vmatpush1.bf16.msra.mxu1 %v1241_v11 }
  0x2f   : > { %495 = vmatmul.mubr.bf16.vlgmr.msra.gmra.mrb[0].mxu0 %v1242_v12 }
  0x30   : > { %527 = vmatmul.mubr.bf16.vlgmr.msra.gmra.mrb[0].mxu1 %v1245_v13  ;;  %1027 = vmatprep.mubr.msk.bf16.mxu0 %vm437_vm0, %v1248_v14  ;;  %v1120_v13 = vld [vmem:[%s1477_s7 + $0x10] sm:$0xff]  }
  0x31   : > { %1031 = vmatprep.mubr.msk.bf16.mxu1 %vm437_vm0, %v1250_v15  ;;  %v1124_v14 = vld [vmem:[%s1477_s7 + $0x30] sm:$0xff]   ;;  %v1098_v27 = vunpack.c.h.bf16 %v1120_v13 }
  0x37   : > { %503 = vmatmul.mubr.bf16.gmra.mrb[4].mxu0 %v1252_v16 }
  0x38   : > { %535 = vmatmul.mubr.bf16.gmra.mrb[4].mxu1 %v1253_v17  ;;  %1028 = vmatprep.mubr.msk.bf16.mxu0 %vm437_vm0, %v1254_v18 }
  0x39   : > { %1032 = vmatprep.mubr.msk.bf16.mxu1 %vm437_vm0, %v1256_v19  ;;  %v1097_v19 = vunpack.c.l.bf16 %v1120_v13 }
  0x3f   : > { %511 = vmatmul.mubr.bf16.gmra.mrb[8].mxu0 %v1258_v20  ;;  %v1113_v20 = vunpack.c.l.bf16 %v1124_v14 }
  0x40   : > { %543 = vmatmul.mubr.bf16.gmra.mrb[8].mxu1 %v1259_v21  ;;  %1029 = vmatprep.mubr.msk.bf16.mxu0 %vm437_vm0, %v1260_v22 }
  0x41   : > { %1033 = vmatprep.mubr.msk.bf16.mxu1 %vm437_vm0, %v1262_v23 }
  0x47   : > { %519 = vmatmul.mubr.bf16.gmra.mrb[12].mxu0 %v1264_v24 }
  0x48   : > { %551 = vmatmul.mubr.bf16.gmra.mrb[12].mxu1 %v1265_v25 }
 0x102   : > { %v496_v31 = vpop.f32.mrb[0].mxu0 }
 0x103   : > { %v528_v32 = vpop.f32.mrb[0].mxu1  ;;  %v497_v33 = vadd.f32 %v1484_v28, %v496_v31  ;;  %v498_v35 = vpop.f32.mrb[1].mxu0 }
 0x104   : > { %v529_v34 = vadd.f32 %v1484_v28, %v528_v32  ;;  %v530_v36 = vpop.f32.mrb[1].mxu1  ;;  %v499_v39 = vpop.f32.mrb[2].mxu0 }
 0x105   : > { %v531_v40 = vpop.f32.mrb[2].mxu1  ;;  %v591_v41 = vadd.f32 %v1089_v29, %v497_v33  ;;  %v500_v43 = vadd.f32 %v1484_v28, %v499_v39  ;;  %v501_v45 = vpop.f32.mrb[3].mxu0  ;;  %v1114_v29 = vunpack.c.h.bf16 %v1124_v14 }
 0x106   : > { %v599_v42 = vadd.f32 %v1105_v30, %v529_v34  ;;  %v532_v44 = vadd.f32 %v1484_v28, %v531_v40  ;;  %v533_v46 = vpop.f32.mrb[3].mxu1  ;;  %v1125_v45 = vld [vmem:[%s1477_s7 + $0x38] sm:$0xff]  }
 0x107   : > { %v607_v49 = vmax.f32 %v591_v41, 0.0  ;;  %v592_v51 = vadd.f32 %v1090_v37, %v500_v43 }
 0x108   : > { %v615_v50 = vmax.f32 %v599_v42, 0.0  ;;  %v600_v52 = vadd.f32 %v1106_v38, %v532_v44  ;;  %v1121_v44 = vld [vmem:[%s1477_s7 + $0x18] sm:$0xff]  }
 0x109   : > { %v1068_v55 = vpack.c.bf16 %v607_v49, %v607_v49  ;;  %v608_v57 = vmax.f32 %v592_v51, 0.0  ;;  %v1117_v51 = vunpack.c.l.bf16 %v1125_v45 }
 0x10a   : > { %v1076_v56 = vpack.c.bf16 %v615_v50, %v615_v50  ;;  %v616_v58 = vmax.f32 %v600_v52, 0.0  ;;  %v504_v59 = vpop.f32.mrb[4].mxu0  ;;  %v1101_v50 = vunpack.c.l.bf16 %v1121_v44 }
 0x10b   : > { %v536_v60 = vpop.f32.mrb[4].mxu1  ;;  %688 = vst.msk [vmem:[%s1493_s15] sm:$0xf] %vm687_vm1, %v1068_v55  ;;  %v1069_v63 = vpack.c.bf16 %v608_v57, %v608_v57  ;;  %v505_v1 = vadd.f32 %v1484_v28, %v504_v59  ;;  %v506_v3 = vpop.f32.mrb[5].mxu0  ;;  %v1118_v59 = vunpack.c.h.bf16 %v1125_v45 }
 0x10c   : > { %696 = vst.msk [vmem:[%s1493_s15 + $0x20] sm:$0xf] %vm687_vm1, %v1076_v56  ;;  %v1077_v0 = vpack.c.bf16 %v616_v58, %v616_v58  ;;  %v537_v2 = vadd.f32 %v1484_v28, %v536_v60  ;;  %v538_v4 = vpop.f32.mrb[5].mxu1  ;;  %v507_v5 = vpop.f32.mrb[6].mxu0  ;;  %v1102_v58 = vunpack.c.h.bf16 %v1121_v44 }
 0x10d   : > { %v539_v6 = vpop.f32.mrb[6].mxu1  ;;  %689 = vst.msk [vmem:[%s1493_s15 + $0x4] sm:$0xf] %vm687_vm1, %v1069_v63  ;;  %v593_v7 = vadd.f32 %v1093_v53, %v505_v1  ;;  %v508_v9 = vadd.f32 %v1484_v28, %v507_v5  ;;  %v509_v11 = vpop.f32.mrb[7].mxu0 }
 0x10e   : > { %697 = vst.msk [vmem:[%s1493_s15 + $0x24] sm:$0xf] %vm687_vm1, %v1077_v0  ;;  %v601_v8 = vadd.f32 %v1109_v54, %v537_v2  ;;  %v540_v10 = vadd.f32 %v1484_v28, %v539_v6  ;;  %v541_v12 = vpop.f32.mrb[7].mxu1 }
 0x10f   : > { %v609_v15 = vmax.f32 %v593_v7, 0.0  ;;  %v594_v17 = vadd.f32 %v1094_v61, %v508_v9 }
 0x110   : > { %v617_v16 = vmax.f32 %v601_v8, 0.0  ;;  %v602_v18 = vadd.f32 %v1110_v62, %v540_v10 }
 0x111   : > { %v1070_v21 = vpack.c.bf16 %v609_v15, %v609_v15  ;;  %v610_v23 = vmax.f32 %v594_v17, 0.0 }
 0x112   : > { %v1078_v22 = vpack.c.bf16 %v617_v16, %v617_v16  ;;  %v618_v24 = vmax.f32 %v602_v18, 0.0  ;;  %v512_v25 = vpop.f32.mrb[8].mxu0 }
 0x113   : > { %v544_v26 = vpop.f32.mrb[8].mxu1  ;;  %690 = vst.msk [vmem:[%s1493_s15 + $0x8] sm:$0xf] %vm687_vm1, %v1070_v21  ;;  %v1071_v30 = vpack.c.bf16 %v610_v23, %v610_v23  ;;  %v513_v32 = vadd.f32 %v1484_v28, %v512_v25  ;;  %v514_v34 = vpop.f32.mrb[9].mxu0 }
 0x114   : > { %698 = vst.msk [vmem:[%s1493_s15 + $0x28] sm:$0xf] %vm687_vm1, %v1078_v22  ;;  %v1079_v31 = vpack.c.bf16 %v618_v24, %v618_v24  ;;  %v545_v33 = vadd.f32 %v1484_v28, %v544_v26  ;;  %v546_v35 = vpop.f32.mrb[9].mxu1  ;;  %v515_v36 = vpop.f32.mrb[10].mxu0 }
 0x115   : > { %v547_v37 = vpop.f32.mrb[10].mxu1  ;;  %691 = vst.msk [vmem:[%s1493_s15 + $0xc] sm:$0xf] %vm687_vm1, %v1071_v30  ;;  %v595_v38 = vadd.f32 %v1097_v19, %v513_v32  ;;  %v516_v40 = vadd.f32 %v1484_v28, %v515_v36  ;;  %v517_v42 = vpop.f32.mrb[11].mxu0 }
 0x116   : > { %699 = vst.msk [vmem:[%s1493_s15 + $0x2c] sm:$0xf] %vm687_vm1, %v1079_v31  ;;  %v603_v39 = vadd.f32 %v1113_v20, %v545_v33  ;;  %v548_v41 = vadd.f32 %v1484_v28, %v547_v37  ;;  %v549_v43 = vpop.f32.mrb[11].mxu1 }
 0x117   : > { %v611_v46 = vmax.f32 %v595_v38, 0.0  ;;  %v596_v48 = vadd.f32 %v1098_v27, %v516_v40 }
 0x118   : > { %v619_v47 = vmax.f32 %v603_v39, 0.0  ;;  %v604_v49 = vadd.f32 %v1114_v29, %v548_v41 }
 0x119   : > { %v1072_v52 = vpack.c.bf16 %v611_v46, %v611_v46  ;;  %v612_v54 = vmax.f32 %v596_v48, 0.0 }
 0x11a   : > { %v1080_v53 = vpack.c.bf16 %v619_v47, %v619_v47  ;;  %v620_v55 = vmax.f32 %v604_v49, 0.0  ;;  %v520_v56 = vpop.f32.mrb[12].mxu0 }
 0x11b   : > { %v552_v57 = vpop.f32.mrb[12].mxu1  ;;  %692 = vst.msk [vmem:[%s1493_s15 + $0x10] sm:$0xf] %vm687_vm1, %v1072_v52  ;;  %v1073_v60 = vpack.c.bf16 %v612_v54, %v612_v54  ;;  %v521_v62 = vadd.f32 %v1484_v28, %v520_v56  ;;  %v522_v0 = vpop.f32.mrb[13].mxu0 }
 0x11c   : > { %700 = vst.msk [vmem:[%s1493_s15 + $0x30] sm:$0xf] %vm687_vm1, %v1080_v53  ;;  %v1081_v61 = vpack.c.bf16 %v620_v55, %v620_v55  ;;  %v553_v63 = vadd.f32 %v1484_v28, %v552_v57  ;;  %v554_v1 = vpop.f32.mrb[13].mxu1  ;;  %v523_v2 = vpop.f32.mrb[14].mxu0 }
 0x11d   : > { %v555_v3 = vpop.f32.mrb[14].mxu1  ;;  %693 = vst.msk [vmem:[%s1493_s15 + $0x14] sm:$0xf] %vm687_vm1, %v1073_v60  ;;  %v597_v4 = vadd.f32 %v1101_v50, %v521_v62  ;;  %v524_v6 = vadd.f32 %v1484_v28, %v523_v2  ;;  %v525_v8 = vpop.f32.mrb[15].mxu0 }
 0x11e   : > { %701 = vst.msk [vmem:[%s1493_s15 + $0x34] sm:$0xf] %vm687_vm1, %v1081_v61  ;;  %v605_v5 = vadd.f32 %v1117_v51, %v553_v63  ;;  %v556_v7 = vadd.f32 %v1484_v28, %v555_v3  ;;  %v557_v9 = vpop.f32.mrb[15].mxu1 }
 0x11f   : > { %v613_v10 = vmax.f32 %v597_v4, 0.0  ;;  %v598_v12 = vadd.f32 %v1102_v58, %v524_v6 }
 0x120   : > { %v621_v11 = vmax.f32 %v605_v5, 0.0  ;;  %v606_v13 = vadd.f32 %v1118_v59, %v556_v7  ;;  %710 = sbr.rel (!%p1405_p4) target bundleno = 354 (0x162), region = 40 }
 0x121   : > { %v1074_v14 = vpack.c.bf16 %v613_v10, %v613_v10  ;;  %v614_v16 = vmax.f32 %v598_v12, 0.0 }
 0x122   : > { %v1082_v15 = vpack.c.bf16 %v621_v11, %v621_v11  ;;  %v622_v17 = vmax.f32 %v606_v13, 0.0 }
 0x123   : > { %694 = vst.msk [vmem:[%s1493_s15 + $0x18] sm:$0xf] %vm687_vm1, %v1074_v14  ;;  %v1075_v18 = vpack.c.bf16 %v614_v16, %v614_v16 }
 0x124   : > { %702 = vst.msk [vmem:[%s1493_s15 + $0x38] sm:$0xf] %vm687_vm1, %v1082_v15  ;;  %v1083_v19 = vpack.c.bf16 %v622_v17, %v622_v17 }
 0x125   : > { %695 = vst.msk [vmem:[%s1493_s15 + $0x1c] sm:$0xf] %vm687_vm1, %v1075_v18 }
 0x126   : > { %703 = vst.msk [vmem:[%s1493_s15 + $0x3c] sm:$0xf] %vm687_vm1, %v1083_v19 }
 0x127   : > { %s1659_s11 = smov (!%p713_p8, %s712_s11), 16 }
 0x128   : > { %s1052_s20 = sshll.u32 %s1659_s11, 6 }
 0x129   : > { %p1055_p9 = scmp.eq.s32.totalorder %s1052_s20, 0 }
 0x12a   : > { %s1556_s21 = sshrl.u32 (!%p1055_p9), %s1659_s11, 4 }
 0x12b   : > { %721 = sbr.rel (%p1055_p9) target bundleno = 354 (0x162), region = 44  ;;  %p1056_p10 = scmp.le.s32.totalorder (!%p1055_p9), %s1556_s21, 0 }
 0x132   : > { %940 = sbr.rel (%p1056_p10) target bundleno = 333 (0x14d), region = 119  ;;  %s1652_s18 = smov (!%p1056_p10), %s1550_s17 }
 0x133   : > { %s1653_s23 = smov (!%p1056_p10), %s1493_s15  ;;  %s1565_s26 = smov (!%p1056_p10), 0  }
 0x134   : > { %s1567_s24 = smov (!%p1056_p10), 0  }
 0x139 LB: >> { %v737_v28 = vld [vmem:[%s1328_s23] sm:$0xf]  ;;  %v739_v20 = vld [vmem:[%s1328_s23 + $0x4] sm:$0xf]  ;;  %v741_v21 = vld [vmem:[%s1328_s23 + $0x8] sm:$0xf]  ;;  %s1336_s24 = sphi %s1567_s24, %s731_s24   ;;  %s1332_s26 = sphi %s1565_s26, %s1654_s26   ;;  %s1328_s23 = sphi %s1653_s23, %s774_s23   ;;  %s1324_s18 = sphi %s1652_s18, %s775_s18  }
 0x13a   : >> { %738 = vst [vmem:[%s1324_s18] sm:$0xf] %v737_v28  ;;  %740 = vst [vmem:[%s1324_s18 + $0x4] sm:$0xf] %v739_v20  ;;  %v743_v22 = vld [vmem:[%s1328_s23 + $0xc] sm:$0xf]  ;;  %s769_s25 = sadd.s32 1, %s1332_s26 }
 0x13b   : >> { %742 = vst [vmem:[%s1324_s18 + $0x8] sm:$0xf] %v741_v21  ;;  %v745_v23 = vld [vmem:[%s1328_s23 + $0x10] sm:$0xf]  ;;  %v747_v24 = vld [vmem:[%s1328_s23 + $0x14] sm:$0xf]  ;;  %p770_p11 = scmp.ge.s32.totalorder %s769_s25, %s1556_s21 }
 0x13c   : >> { %744 = vst [vmem:[%s1324_s18 + $0xc] sm:$0xf] %v743_v22  ;;  %746 = vst [vmem:[%s1324_s18 + $0x10] sm:$0xf] %v745_v23  ;;  %v749_v25 = vld [vmem:[%s1328_s23 + $0x18] sm:$0xf] }
 0x13d   : >> { %748 = vst [vmem:[%s1324_s18 + $0x14] sm:$0xf] %v747_v24  ;;  %v751_v26 = vld [vmem:[%s1328_s23 + $0x1c] sm:$0xf]  ;;  %v753_v27 = vld [vmem:[%s1328_s23 + $0x20] sm:$0xf] }
 0x13e   : >> { %750 = vst [vmem:[%s1324_s18 + $0x18] sm:$0xf] %v749_v25  ;;  %752 = vst [vmem:[%s1324_s18 + $0x1c] sm:$0xf] %v751_v26  ;;  %v755_v29 = vld [vmem:[%s1328_s23 + $0x24] sm:$0xf] }
 0x13f   : >> { %754 = vst [vmem:[%s1324_s18 + $0x20] sm:$0xf] %v753_v27  ;;  %v757_v30 = vld [vmem:[%s1328_s23 + $0x28] sm:$0xf]  ;;  %v759_v31 = vld [vmem:[%s1328_s23 + $0x2c] sm:$0xf] }
 0x140   : >> { %756 = vst [vmem:[%s1324_s18 + $0x24] sm:$0xf] %v755_v29  ;;  %758 = vst [vmem:[%s1324_s18 + $0x28] sm:$0xf] %v757_v30  ;;  %v761_v32 = vld [vmem:[%s1328_s23 + $0x30] sm:$0xf] }
 0x141   : >> { %760 = vst [vmem:[%s1324_s18 + $0x2c] sm:$0xf] %v759_v31  ;;  %v763_v33 = vld [vmem:[%s1328_s23 + $0x34] sm:$0xf]  ;;  %v765_v34 = vld [vmem:[%s1328_s23 + $0x38] sm:$0xf] }
 0x142   : >> { %762 = vst [vmem:[%s1324_s18 + $0x30] sm:$0xf] %v761_v32  ;;  %764 = vst [vmem:[%s1324_s18 + $0x34] sm:$0xf] %v763_v33  ;;  %v767_v35 = vld [vmem:[%s1328_s23 + $0x3c] sm:$0xf] }
 0x143   : >> { %766 = vst [vmem:[%s1324_s18 + $0x38] sm:$0xf] %v765_v34  ;;  %768 = vst [vmem:[%s1324_s18 + $0x3c] sm:$0xf] %v767_v35  ;;  %s1661_s25 = smov (%p770_p11, %s769_s25), 0  ;;  %s731_s24 = sadd.s32 1, %s1336_s24  }
 0x144   : >> { %s1057_s27 = sshll.u32 %s1661_s25, 6  ;;  %p730_p12 = scmp.ge.s32.totalorder %s731_s24, %s1556_s21 }
 0x145   : >> { %s774_s23 = scalar_lea.vmem %s1493_s15, %s1057_s27 [#allocation2]   ;;  %s775_s18 = scalar_lea.vmem %s1550_s17, %s1057_s27  }
 0x146   : >> { %s1654_s26 = smov %s1661_s25  ;;  %733 = sbr.rel (!%p730_p12) target bundleno = 313 (0x139), region = 125 }
 0x14d PF: > { %s1628_s28 = sand.u32 15, %s1659_s11   ;;  %s1085_s30 = sshll.u32 %s1556_s21, 6 }
 0x14e   : > { %s780_s5 = scalar_lea.vmem %s1493_s15, %s1085_s30 [#allocation2]   ;;  %s782_s6 = scalar_lea.vmem %s1550_s17, %s1085_s30  }
 0x14f   : > { %p1062_p13 = scmp.le.s32.totalorder %s1628_s28, 0 }
 0x150   : > { %s1338_s7 = smov (!%p1062_p13), %s782_s6   ;;  %s1342_s8 = smov (!%p1062_p13), %s780_s5  }
 0x151   : > { %954 = sbr.rel (%p1062_p13) target bundleno = 354 (0x162), region = 130  ;;  %s1346_s10 = smov (!%p1062_p13), 0  }
 0x152   : > { %s1350_s9 = smov (!%p1062_p13), 0  }
 0x158 LB: >> { %v792_v36 = vld [vmem:[%s1344_s8] sm:$0xf]  ;;  %s794_s29 = sadd.s32 1, %s1348_s10  ;;  %s786_s9 = sadd.s32 1, %s1352_s9   ;;  %s1352_s9 = sphi %s1350_s9, %s786_s9   ;;  %s1348_s10 = sphi %s1346_s10, %s1347_s10   ;;  %s1344_s8 = sphi %s1342_s8, %s799_s8   ;;  %s1340_s7 = sphi %s1338_s7, %s800_s7  }
 0x159   : >> { %793 = vst [vmem:[%s1340_s7] sm:$0xf] %v792_v36  ;;  %p795_p0 = scmp.ge.s32.totalorder %s794_s29, %s1628_s28  ;;  %p785_p1 = scmp.ge.s32.totalorder %s786_s9, %s1628_s28 }
 0x15b   : >> { %s1663_s29 = smov (%p795_p0, %s794_s29), 0  ;;  %788 = sbr.rel (!%p785_p1) target bundleno = 344 (0x158), region = 136 }
 0x15c   : >> { %s1063_s15 = sshll.u32 %s1663_s29, 2  ;;  %s1347_s10 = smov %s1663_s29  }
 0x15d   : >> { %s799_s8 = scalar_lea.vmem %s780_s5, %s1063_s15 [#allocation2]   ;;  %s800_s7 = scalar_lea.vmem %s782_s6, %s1063_s15  }
 0x162 PF: > { %p11_p2 = scmp.ge.s32.totalorder %s1395_s19, 5   ;;  %s1655_s15 = smov %s1316_s16 }
 0x163   : > { %s1656_s16 = smov %s1403_s22  ;;  %s1657_s17 = smov %s1395_s19 }
 0x164   :  { %13 = sbr.rel (!%p11_p2) target bundleno = 2 (0x2), region = 147 }

// kernel: touchnet_forward.15
= control target key start
LH: loop header
LB: loop body
LE: loop exit
PB: predicated region body
PF: predicated region fallthrough
CT: control target
= control target key end

     0   :  { %v378_v0 = vmov 0   ;;  %vm145_vm0 = vcmask 130048   ;;  %vm279_vm1 = vcmask 257024   ;;  %s497_s1 = inlined_call_operand.vmem [shape: bf16[144,32], index: 1, kind: input, shape index: {}]   ;;  %s498_s0 = inlined_call_operand.vmem [shape: bf16[72,144], index: 0, kind: input, shape index: {}]   ;;  %s499_s2 = inlined_call_operand.vmem [shape: f32[1,32], index: 2, kind: input, shape index: {}]   ;;  %s500_s3 = inlined_call_operand.vmem [shape: bf16[72,32], index: 3, kind: output, shape index: {}]  }
   0x1   :  { %161 = vmatprep.subr.bf16.mxu0 %v378_v0  ;;  %v355_v1 = vld [vmem:[%s497_s1] sm:$0xff]   ;;  %336 = vmatprep.subr.bf16.mxu1 %v378_v0  ;;  %v356_v2 = vld [vmem:[%s497_s1 + $0x8] sm:$0xff]   ;;  %v357_v3 = vld [vmem:[%s497_s1 + $0x10] sm:$0xff]  }
   0x2   :  { %162 = vmatpush1.bf16.msra.mxu0 %v355_v1  ;;  %345 = vmatpush1.bf16.msra.mxu1 %v355_v1  ;;  %v358_v4 = vld [vmem:[%s497_s1 + $0x18] sm:$0xff]   ;;  %v366_v5 = vld [vmem:[%s498_s0 + $0x4] ss:$8 sps:$4 sm:$0xff]   ;;  %v361_v9 = vld [vmem:[%s497_s1 + $0x30] sm:$0xff]  }
   0x3   :  { %163 = vmatprep.subr.bf16.mxu0 %v378_v0  ;;  %337 = vmatprep.subr.bf16.mxu1 %v378_v0  ;;  %v369_v6 = vld [vmem:[%s498_s0 + $0x34] ss:$8 sps:$4 sm:$0xff]   ;;  %v359_v7 = vld [vmem:[%s497_s1 + $0x20] sm:$0xff]   ;;  %v360_v8 = vld [vmem:[%s497_s1 + $0x28] sm:$0xff]  }
   0x4   :  { %313 = vmatprep.mubr.msk.bf16.mxu0 %vm145_vm0, %v366_v5  ;;  %316 = vmatprep.mubr.msk.bf16.mxu1 %vm145_vm0, %v369_v6  ;;  %v362_v10 = vld [vmem:[%s497_s1 + $0x38] sm:$0xff]   ;;  %v363_v11 = vld [vmem:[%s497_s1 + $0x40] sm:$0xff]  }
   0x5   :  { %v23_v12 = vld [vmem:[%s498_s0 + $0x40] sm:$0xff]  ;;  %v367_v14 = vld [vmem:[%s498_s0 + $0x30] ss:$8 sps:$4 sm:$0xff]   ;;  %v370_v15 = vld [vmem:[%s498_s0 + $0x14] ss:$8 sps:$4 sm:$0xff]  }
   0x6   :  { %164 = vmatpush1.bf16.msra.mxu0 %v356_v2  ;;  %346 = vmatpush1.bf16.msra.mxu1 %v356_v2  ;;  %v364_v13 = vld [vmem:[%s498_s0] ss:$8 sps:$4 sm:$0xff]   ;;  %v303_v16 = vcombine.high %v23_v12, %v23_v12  ;;  %v372_v17 = vld [vmem:[%s498_s0 + $0x10] ss:$8 sps:$4 sm:$0xff]   ;;  %v302_v18 = vcombine.low %v23_v12, %v23_v12  ;;  %v374_v19 = vld [vmem:[%s498_s0 + $0x24] ss:$8 sps:$4 sm:$0xff]  }
   0x7   :  { %165 = vmatprep.subr.bf16.mxu0 %v378_v0  ;;  %338 = vmatprep.subr.bf16.mxu1 %v378_v0  ;;  %v377_v20 = vld [vmem:[%s498_s0 + $0x20] ss:$8 sps:$4 sm:$0xff]  }
   0x8   :  { %v293_v21 = vld [vmem:[%s499_s2] ss:$0 sm:$0xff] }
   0xa   :  { %166 = vmatpush1.bf16.msra.mxu0 %v357_v3  ;;  %347 = vmatpush1.bf16.msra.mxu1 %v357_v3 }
   0xb   :  { %167 = vmatprep.subr.bf16.mxu0 %v378_v0  ;;  %339 = vmatprep.subr.bf16.mxu1 %v378_v0 }
   0xe   :  { %168 = vmatpush1.bf16.msra.mxu0 %v358_v4  ;;  %348 = vmatpush1.bf16.msra.mxu1 %v358_v4 }
   0xf   :  { %169 = vmatprep.subr.bf16.mxu0 %v378_v0  ;;  %340 = vmatprep.subr.bf16.mxu1 %v378_v0 }
  0x12   :  { %170 = vmatpush1.bf16.msra.mxu0 %v359_v7  ;;  %349 = vmatpush1.bf16.msra.mxu1 %v359_v7 }
  0x13   :  { %171 = vmatprep.subr.bf16.mxu0 %v378_v0  ;;  %341 = vmatprep.subr.bf16.mxu1 %v378_v0 }
  0x16   :  { %172 = vmatpush1.bf16.msra.mxu0 %v360_v8  ;;  %350 = vmatpush1.bf16.msra.mxu1 %v360_v8 }
  0x17   :  { %173 = vmatprep.subr.bf16.mxu0 %v378_v0  ;;  %342 = vmatprep.subr.bf16.mxu1 %v378_v0 }
  0x1a   :  { %174 = vmatpush1.bf16.msra.mxu0 %v361_v9  ;;  %351 = vmatpush1.bf16.msra.mxu1 %v361_v9 }
  0x1b   :  { %175 = vmatprep.subr.bf16.mxu0 %v378_v0  ;;  %343 = vmatprep.subr.bf16.mxu1 %v378_v0 }
  0x1e   :  { %176 = vmatpush1.bf16.msra.mxu0 %v362_v10  ;;  %352 = vmatpush1.bf16.msra.mxu1 %v362_v10 }
  0x1f   :  { %177 = vmatprep.subr.bf16.mxu0 %v378_v0  ;;  %344 = vmatprep.subr.bf16.mxu1 %v378_v0 }
  0x22   :  { %178 = vmatpush1.bf16.msra.mxu0 %v363_v11  ;;  %353 = vmatpush1.bf16.msra.mxu1 %v363_v11 }
  0x25   :  { %194 = vmatmul.mubr.bf16.vlgmr.msra.gmra.mrb[0].mxu0 %v364_v13  ;;  %218 = vmatmul.mubr.bf16.vlgmr.msra.gmra.mrb[0].mxu1 %v367_v14 }
  0x26   :  { %314 = vmatprep.mubr.msk.bf16.mxu0 %vm145_vm0, %v370_v15  ;;  %317 = vmatprep.mubr.msk.bf16.mxu1 %vm145_vm0, %v303_v16 }
  0x2d   :  { %202 = vmatmul.mubr.bf16.gmra.mrb[4].mxu0 %v372_v17  ;;  %226 = vmatmul.mubr.bf16.gmra.mrb[4].mxu1 %v302_v18 }
  0x2e   :  { %315 = vmatprep.mubr.msk.bf16.mxu0 %vm145_vm0, %v374_v19 }
  0x35   :  { %210 = vmatmul.mubr.bf16.gmra.mrb[8].mxu0 %v377_v20 }
  0xf8   :  { %v195_v22 = vpop.f32.mrb[0].mxu0  ;;  %v219_v23 = vpop.f32.mrb[0].mxu1 }
  0xf9   :  { %v196_v24 = vadd.f32 %v293_v21, %v195_v22  ;;  %v197_v25 = vpop.f32.mrb[1].mxu0  ;;  %v220_v26 = vadd.f32 %v293_v21, %v219_v23  ;;  %v221_v27 = vpop.f32.mrb[1].mxu1 }
  0xfa   :  { %v198_v28 = vpop.f32.mrb[2].mxu0  ;;  %v222_v29 = vpop.f32.mrb[2].mxu1 }
  0xfb   :  { %v233_v30 = vmax.f32 %v196_v24, 0.0  ;;  %v199_v31 = vadd.f32 %v293_v21, %v198_v28  ;;  %v200_v32 = vpop.f32.mrb[3].mxu0  ;;  %v239_v33 = vmax.f32 %v220_v26, 0.0  ;;  %v223_v34 = vadd.f32 %v293_v21, %v222_v29  ;;  %v224_v35 = vpop.f32.mrb[3].mxu1 }
  0xfd   :  { %v327_v36 = vpack.c.bf16 %v233_v30, %v233_v30  ;;  %v234_v37 = vmax.f32 %v199_v31, 0.0  ;;  %v333_v38 = vpack.c.bf16 %v239_v33, %v239_v33  ;;  %v240_v39 = vmax.f32 %v223_v34, 0.0 }
  0xff   :  { %280 = vst.msk [vmem:[%s500_s3] sm:$0xf] %vm279_vm1, %v327_v36  ;;  %v328_v40 = vpack.c.bf16 %v234_v37, %v234_v37  ;;  %286 = vst.msk [vmem:[%s500_s3 + $0x18] sm:$0xf] %vm279_vm1, %v333_v38  ;;  %v334_v41 = vpack.c.bf16 %v240_v39, %v240_v39 }
 0x100   :  { %v203_v42 = vpop.f32.mrb[4].mxu0  ;;  %v227_v43 = vpop.f32.mrb[4].mxu1 }
 0x101   :  { %281 = vst.msk [vmem:[%s500_s3 + $0x4] sm:$0xf] %vm279_vm1, %v328_v40  ;;  %v204_v44 = vadd.f32 %v293_v21, %v203_v42  ;;  %v205_v45 = vpop.f32.mrb[5].mxu0  ;;  %287 = vst.msk [vmem:[%s500_s3 + $0x1c] sm:$0xf] %vm279_vm1, %v334_v41  ;;  %v228_v46 = vadd.f32 %v293_v21, %v227_v43  ;;  %v229_v47 = vpop.f32.mrb[5].mxu1 }
 0x102   :  { %v206_v48 = vpop.f32.mrb[6].mxu0  ;;  %v230_v49 = vpop.f32.mrb[6].mxu1 }
 0x103   :  { %v235_v50 = vmax.f32 %v204_v44, 0.0  ;;  %v207_v51 = vadd.f32 %v293_v21, %v206_v48  ;;  %v208_v52 = vpop.f32.mrb[7].mxu0  ;;  %v241_v53 = vmax.f32 %v228_v46, 0.0  ;;  %v231_v54 = vpop.f32.mrb[7].mxu1 }
 0x105   :  { %v329_v55 = vpack.c.bf16 %v235_v50, %v235_v50  ;;  %v236_v56 = vmax.f32 %v207_v51, 0.0  ;;  %v335_v57 = vpack.c.bf16 %v241_v53, %v241_v53 }
 0x107   :  { %282 = vst.msk [vmem:[%s500_s3 + $0x8] sm:$0xf] %vm279_vm1, %v329_v55  ;;  %v330_v58 = vpack.c.bf16 %v236_v56, %v236_v56  ;;  %288 = vst.msk [vmem:[%s500_s3 + $0x20] sm:$0xf] %vm279_vm1, %v335_v57 }
 0x108   :  { %v211_v59 = vpop.f32.mrb[8].mxu0 }
 0x109   :  { %283 = vst.msk [vmem:[%s500_s3 + $0xc] sm:$0xf] %vm279_vm1, %v330_v58  ;;  %v212_v60 = vadd.f32 %v293_v21, %v211_v59  ;;  %v213_v61 = vpop.f32.mrb[9].mxu0 }
 0x10a   :  { %v214_v62 = vpop.f32.mrb[10].mxu0 }
 0x10b   :  { %v237_v63 = vmax.f32 %v212_v60, 0.0  ;;  %v215_v0 = vadd.f32 %v293_v21, %v214_v62  ;;  %v216_v1 = vpop.f32.mrb[11].mxu0 }
 0x10d   :  { %v331_v2 = vpack.c.bf16 %v237_v63, %v237_v63  ;;  %v238_v3 = vmax.f32 %v215_v0, 0.0 }
 0x10f   :  { %284 = vst.msk [vmem:[%s500_s3 + $0x10] sm:$0xf] %vm279_vm1, %v331_v2  ;;  %v332_v4 = vpack.c.bf16 %v238_v3, %v238_v3 }
 0x111   :  { %285 = vst.msk [vmem:[%s500_s3 + $0x14] sm:$0xf] %vm279_vm1, %v332_v4 }

// kernel: touchnet_forward.17
= control target key start
LH: loop header
LB: loop body
LE: loop exit
PB: predicated region body
PF: predicated region fallthrough
CT: control target
= control target key end

     0   :  { %v647_v1 = vmov 0.0   ;;  %vm648_vm0 = vmmov 0   ;;  %vm254_vm1 = vcmask 261120   ;;  %vm460_vm2 = vcmask 257024   ;;  %s832_s1 = inlined_call_operand.vmem [shape: bf16[288,32], index: 1, kind: input, shape index: {}]   ;;  %s833_s0 = inlined_call_operand.vmem [shape: bf16[72,288], index: 0, kind: input, shape index: {}]   ;;  %s834_s2 = inlined_call_operand.vmem [shape: f32[1,32], index: 2, kind: input, shape index: {}]   ;;  %s835_s3 = inlined_call_operand.vmem [shape: bf16[72,32], index: 3, kind: output, shape index: {}]  }
   0x1   :  { %v610_v0 = vld [vmem:[%s832_s1 + $0x40] sm:$0xff]   ;;  %584 = vmatprep.subr.bf16.mxu1 %v647_v1  ;;  %588 = vmatprep.mubr.msk.bf16.mxu1 %vm648_vm0, %v647_v1  ;;  %v612_v3 = vld [vmem:[%s832_s1 + $0x48] sm:$0xff]   ;;  %v614_v5 = vld [vmem:[%s832_s1 + $0x50] sm:$0xff]  }
   0x2   :  { %v611_v2 = vld [vmem:[%s832_s1] sm:$0xff]   ;;  %531 = vmatprep.subr.bf16.mxu0 %v610_v0  ;;  %v613_v4 = vld [vmem:[%s832_s1 + $0x8] sm:$0xff]   ;;  %v615_v6 = vld [vmem:[%s832_s1 + $0x10] sm:$0xff]  }
   0x3   :  { %532 = vmatpush3.bf16.msra.mxu0 %v611_v2  ;;  %v616_v7 = vld [vmem:[%s832_s1 + $0x58] sm:$0xff]   ;;  %v618_v9 = vld [vmem:[%s832_s1 + $0x60] sm:$0xff]   ;;  %v620_v12 = vld [vmem:[%s832_s1 + $0x68] sm:$0xff]  }
   0x4   :  { %533 = vmatprep.subr.bf16.mxu0 %v612_v3  ;;  %v617_v8 = vld [vmem:[%s832_s1 + $0x18] sm:$0xff]   ;;  %v624_v10 = vld [vmem:[%s832_s1 + $0x80] sm:$0xff]   ;;  %v621_v13 = vld [vmem:[%s832_s1 + $0x28] sm:$0xff]  }
   0x5   :  { %v619_v11 = vld [vmem:[%s832_s1 + $0x20] sm:$0xff]   ;;  %585 = vmatpush3.bf16.msra.mxu1 %v624_v10  ;;  %v622_v14 = vld [vmem:[%s832_s1 + $0x70] sm:$0xff]   ;;  %v630_v16 = vld [vmem:[%s832_s1 + $0x88] sm:$0xff]  }
   0x6   :  { %586 = vmatprep.subr.bf16.mxu1 %v647_v1  ;;  %v629_v15 = vld [vmem:[%s833_s0 + $0x4] ss:$12 sps:$4 sm:$0xff]   ;;  %v631_v17 = vld [vmem:[%s833_s0 + $0x8] ss:$12 sps:$4 sm:$0xff]   ;;  %v625_v19 = vld [vmem:[%s832_s1 + $0x78] sm:$0xff]  }
   0x7   :  { %534 = vmatpush3.bf16.msra.mxu0 %v613_v4  ;;  %302 = vmatprep.mubr.bf16.mxu0 %v629_v15  ;;  %v623_v18 = vld [vmem:[%s832_s1 + $0x30] sm:$0xff]   ;;  %v626_v20 = vld [vmem:[%s832_s1 + $0x38] sm:$0xff]   ;;  %v635_v21 = vld [vmem:[%s833_s0 + $0x20] ss:$12 sps:$4 sm:$0xff]  }
   0x8   :  { %535 = vmatprep.subr.bf16.mxu0 %v614_v5  ;;  %v627_v22 = vld [vmem:[%s833_s0] ss:$12 sps:$4 sm:$0xff]   ;;  %v632_v23 = vld [vmem:[%s833_s0 + $0x1c] ss:$12 sps:$4 sm:$0xff]   ;;  %v639_v24 = vld [vmem:[%s833_s0 + $0x38] ss:$12 sps:$4 sm:$0xff]  }
   0x9   :  { %587 = vmatpush3.bf16.msra.mxu1 %v630_v16  ;;  %v634_v25 = vld [vmem:[%s833_s0 + $0x18] ss:$12 sps:$4 sm:$0xff]   ;;  %v636_v26 = vld [vmem:[%s833_s0 + $0x34] ss:$12 sps:$4 sm:$0xff]   ;;  %v643_v27 = vld [vmem:[%s833_s0 + $0x50] ss:$12 sps:$4 sm:$0xff]  }
   0xa   :  { %v638_v28 = vld [vmem:[%s833_s0 + $0x30] ss:$12 sps:$4 sm:$0xff]   ;;  %v640_v29 = vld [vmem:[%s833_s0 + $0x4c] ss:$12 sps:$4 sm:$0xff]   ;;  %v31_v30 = vld [vmem:[%s833_s0 + $0x60] sm:$0xff] }
   0xb   :  { %536 = vmatpush3.bf16.msra.mxu0 %v615_v6  ;;  %v646_v31 = vld [vmem:[%s833_s0 + $0x68] ss:$0 sps:$4 sm:$0xff]   ;;  %v488_v33 = vcombine.high %v31_v30, %v31_v30  ;;  %v487_v34 = vcombine.low %v31_v30, %v31_v30  ;;  %v785_v44 = vld [vmem:[%s834_s2] ss:$0 sm:$0xff] }
   0xc   :  { %537 = vmatprep.subr.bf16.mxu0 %v616_v7  ;;  %589 = vmatmul.mubr.msk.bf16.vlgmr.msra.gmra.mrb[0].mxu1 %vm254_vm1, %v631_v17  ;;  %v642_v32 = vld [vmem:[%s833_s0 + $0x48] ss:$12 sps:$4 sm:$0xff]  }
   0xd   :  { %592 = vmatprep.mubr.msk.bf16.mxu1 %vm648_vm0, %v647_v1 }
   0xf   :  { %538 = vmatpush3.bf16.msra.mxu0 %v617_v8 }
  0x10   :  { %539 = vmatprep.subr.bf16.mxu0 %v618_v9 }
  0x13   :  { %540 = vmatpush3.bf16.msra.mxu0 %v619_v11 }
  0x14   :  { %541 = vmatprep.subr.bf16.mxu0 %v620_v12  ;;  %593 = vmatmul.mubr.msk.bf16.gmra.mrb[4].mxu1 %vm254_vm1, %v635_v21 }
  0x15   :  { %596 = vmatprep.mubr.msk.bf16.mxu1 %vm648_vm0, %v647_v1 }
  0x17   :  { %542 = vmatpush3.bf16.msra.mxu0 %v621_v13 }
  0x18   :  { %543 = vmatprep.subr.bf16.mxu0 %v622_v14 }
  0x1b   :  { %544 = vmatpush3.bf16.msra.mxu0 %v623_v18 }
  0x1c   :  { %545 = vmatprep.subr.bf16.mxu0 %v625_v19  ;;  %597 = vmatmul.mubr.msk.bf16.gmra.mrb[8].mxu1 %vm254_vm1, %v639_v24 }
  0x1d   :  { %600 = vmatprep.mubr.msk.bf16.mxu1 %vm648_vm0, %v647_v1 }
  0x1f   :  { %546 = vmatpush3.bf16.msra.mxu0 %v626_v20 }
  0x22   :  { %303 = vmatmul.mubr.bf16.vlgmr.msra.gmra.mrb[0].mxu0 %v627_v22 }
  0x23   :  { %310 = vmatprep.mubr.bf16.mxu0 %v632_v23 }
  0x24   :  { %601 = vmatmul.mubr.msk.bf16.gmra.mrb[12].mxu1 %vm254_vm1, %v643_v27 }
  0x25   :  { %604 = vmatprep.mubr.msk.bf16.mxu1 %vm648_vm0, %v647_v1 }
  0x2a   :  { %311 = vmatmul.mubr.bf16.gmra.mrb[4].mxu0 %v634_v25 }
  0x2b   :  { %318 = vmatprep.mubr.bf16.mxu0 %v636_v26 }
  0x2c   :  { %605 = vmatmul.mubr.msk.bf16.gmra.mrb[16].mxu1 %vm254_vm1, %v646_v31 }
  0x32   :  { %319 = vmatmul.mubr.bf16.gmra.mrb[8].mxu0 %v638_v28 }
  0x33   :  { %326 = vmatprep.mubr.bf16.mxu0 %v640_v29 }
  0x3a   :  { %327 = vmatmul.mubr.bf16.gmra.mrb[12].mxu0 %v642_v32 }
  0x3b   :  { %334 = vmatprep.mubr.bf16.mxu0 %v488_v33 }
  0x42   :  { %335 = vmatmul.mubr.bf16.gmra.mrb[16].mxu0 %v487_v34 }
  0xdf   :  { %v376_v35 = vpop.f32.mrb[0].mxu1 }
  0xe0   :  { %v590_v36 = vpop.f32.mrb[1].mxu1 }
  0xe1   :  { %v379_v37 = vpop.f32.mrb[2].mxu1 }
  0xe2   :  { %v591_v38 = vpop.f32.mrb[3].mxu1 }
  0xe7   :  { %v384_v39 = vpop.f32.mrb[4].mxu1 }
  0xe8   :  { %v594_v40 = vpop.f32.mrb[5].mxu1 }
  0xe9   :  { %v387_v42 = vpop.f32.mrb[6].mxu1 }
  0xea   :  { %v595_v45 = vpop.f32.mrb[7].mxu1 }
  0xef   :  { %v392_v53 = vpop.f32.mrb[8].mxu1 }
  0xf0   :  { %v598_v54 = vpop.f32.mrb[9].mxu1 }
  0xf1   :  { %v395_v58 = vpop.f32.mrb[10].mxu1 }
  0xf2   :  { %v599_v60 = vpop.f32.mrb[11].mxu1 }
  0xf5   :  { %v547_v41 = vpop.f32.mrb[0].mxu0 }
  0xf6   :  { %v548_v43 = vpop.f32.mrb[1].mxu0 }
  0xf7   :  { %v549_v46 = vadd.f32 %v548_v43, %v547_v41  ;;  %v550_v47 = vpop.f32.mrb[2].mxu0  ;;  %v400_v7 = vpop.f32.mrb[12].mxu1 }
  0xf8   :  { %v551_v48 = vpop.f32.mrb[3].mxu0  ;;  %v602_v8 = vpop.f32.mrb[13].mxu1 }
  0xf9   :  { %v305_v49 = vadd.f32 %v549_v46, %v785_v44  ;;  %v552_v50 = vadd.f32 %v551_v48, %v550_v47  ;;  %v403_v12 = vpop.f32.mrb[14].mxu1 }
  0xfa   :  { %v603_v14 = vpop.f32.mrb[15].mxu1 }
  0xfb   :  { %v377_v51 = vadd.f32 %v376_v35, %v305_v49  ;;  %v308_v52 = vadd.f32 %v552_v50, %v785_v44 }
  0xfd   :  { %v414_v55 = vmax.f32 %v377_v51, 0.0  ;;  %v380_v56 = vadd.f32 %v379_v37, %v308_v52  ;;  %v553_v57 = vpop.f32.mrb[4].mxu0 }
  0xfe   :  { %v554_v59 = vpop.f32.mrb[5].mxu0 }
  0xff   :  { %v522_v61 = vpack.c.bf16 %v414_v55, %v414_v55  ;;  %v415_v62 = vmax.f32 %v380_v56, 0.0  ;;  %v555_v63 = vadd.f32 %v554_v59, %v553_v57  ;;  %v556_v0 = vpop.f32.mrb[6].mxu0  ;;  %v408_v25 = vpop.f32.mrb[16].mxu1 }
 0x100   :  { %v557_v1 = vpop.f32.mrb[7].mxu0  ;;  %v606_v26 = vpop.f32.mrb[17].mxu1 }
 0x101   :  { %461 = vst.msk [vmem:[%s835_s3] sm:$0xf] %vm460_vm2, %v522_v61  ;;  %v523_v2 = vpack.c.bf16 %v415_v62, %v415_v62  ;;  %v313_v3 = vadd.f32 %v555_v63, %v785_v44  ;;  %v558_v4 = vadd.f32 %v557_v1, %v556_v0  ;;  %v411_v30 = vpop.f32.mrb[18].mxu1 }
 0x102   :  { %v607_v32 = vpop.f32.mrb[19].mxu1 }
 0x103   :  { %462 = vst.msk [vmem:[%s835_s3 + $0x4] sm:$0xf] %vm460_vm2, %v523_v2  ;;  %v385_v5 = vadd.f32 %v384_v39, %v313_v3  ;;  %v316_v6 = vadd.f32 %v558_v4, %v785_v44 }
 0x105   :  { %v416_v9 = vmax.f32 %v385_v5, 0.0  ;;  %v388_v10 = vadd.f32 %v387_v42, %v316_v6  ;;  %v559_v11 = vpop.f32.mrb[8].mxu0 }
 0x106   :  { %v560_v13 = vpop.f32.mrb[9].mxu0 }
 0x107   :  { %v524_v15 = vpack.c.bf16 %v416_v9, %v416_v9  ;;  %v417_v16 = vmax.f32 %v388_v10, 0.0  ;;  %v561_v17 = vadd.f32 %v560_v13, %v559_v11  ;;  %v562_v18 = vpop.f32.mrb[10].mxu0 }
 0x108   :  { %v563_v19 = vpop.f32.mrb[11].mxu0 }
 0x109   :  { %463 = vst.msk [vmem:[%s835_s3 + $0x8] sm:$0xf] %vm460_vm2, %v524_v15  ;;  %v525_v20 = vpack.c.bf16 %v417_v16, %v417_v16  ;;  %v321_v21 = vadd.f32 %v561_v17, %v785_v44  ;;  %v564_v22 = vadd.f32 %v563_v19, %v562_v18 }
 0x10b   :  { %464 = vst.msk [vmem:[%s835_s3 + $0xc] sm:$0xf] %vm460_vm2, %v525_v20  ;;  %v393_v23 = vadd.f32 %v392_v53, %v321_v21  ;;  %v324_v24 = vadd.f32 %v564_v22, %v785_v44 }
 0x10d   :  { %v418_v27 = vmax.f32 %v393_v23, 0.0  ;;  %v396_v28 = vadd.f32 %v395_v58, %v324_v24  ;;  %v565_v29 = vpop.f32.mrb[12].mxu0 }
 0x10e   :  { %v566_v31 = vpop.f32.mrb[13].mxu0 }
 0x10f   :  { %v526_v33 = vpack.c.bf16 %v418_v27, %v418_v27  ;;  %v419_v34 = vmax.f32 %v396_v28, 0.0  ;;  %v567_v35 = vadd.f32 %v566_v31, %v565_v29  ;;  %v568_v36 = vpop.f32.mrb[14].mxu0 }
 0x110   :  { %v569_v37 = vpop.f32.mrb[15].mxu0 }
 0x111   :  { %465 = vst.msk [vmem:[%s835_s3 + $0x10] sm:$0xf] %vm460_vm2, %v526_v33  ;;  %v527_v38 = vpack.c.bf16 %v419_v34, %v419_v34  ;;  %v329_v39 = vadd.f32 %v567_v35, %v785_v44  ;;  %v570_v40 = vadd.f32 %v569_v37, %v568_v36 }
 0x113   :  { %466 = vst.msk [vmem:[%s835_s3 + $0x14] sm:$0xf] %vm460_vm2, %v527_v38  ;;  %v401_v41 = vadd.f32 %v400_v7, %v329_v39  ;;  %v332_v42 = vadd.f32 %v570_v40, %v785_v44 }
 0x115   :  { %v420_v43 = vmax.f32 %v401_v41, 0.0  ;;  %v404_v45 = vadd.f32 %v403_v12, %v332_v42  ;;  %v571_v46 = vpop.f32.mrb[16].mxu0 }
 0x116   :  { %v572_v47 = vpop.f32.mrb[17].mxu0 }
 0x117   :  { %v528_v48 = vpack.c.bf16 %v420_v43, %v420_v43  ;;  %v421_v49 = vmax.f32 %v404_v45, 0.0  ;;  %v573_v50 = vadd.f32 %v572_v47, %v571_v46  ;;  %v574_v51 = vpop.f32.mrb[18].mxu0 }
 0x118   :  { %v575_v52 = vpop.f32.mrb[19].mxu0 }
 0x119   :  { %467 = vst.msk [vmem:[%s835_s3 + $0x18] sm:$0xf] %vm460_vm2, %v528_v48  ;;  %v529_v53 = vpack.c.bf16 %v421_v49, %v421_v49  ;;  %v337_v54 = vadd.f32 %v573_v50, %v785_v44 }
 0x11b   :  { %468 = vst.msk [vmem:[%s835_s3 + $0x1c] sm:$0xf] %vm460_vm2, %v529_v53  ;;  %v409_v55 = vadd.f32 %v408_v25, %v337_v54 }
 0x11d   :  { %v422_v56 = vmax.f32 %v409_v55, 0.0 }
 0x11f   :  { %v530_v57 = vpack.c.bf16 %v422_v56, %v422_v56 }
 0x121   :  { %469 = vst.msk [vmem:[%s835_s3 + $0x20] sm:$0xf] %vm460_vm2, %v530_v57 }

// kernel: touchnet_forward.16
= control target key start
LH: loop header
LB: loop body
LE: loop exit
PB: predicated region body
PF: predicated region fallthrough
CT: control target
= control target key end

     0   :  { %v859_v0 = vmov 0.0   ;;  %vm860_vm0 = vmmov 0   ;;  %vm263_vm1 = vcmask 261120   ;;  %vm463_vm2 = vcmask 130048   ;;  %s1130_s1 = inlined_call_operand.vmem [shape: bf16[288,32], index: 1, kind: input, shape index: {}]   ;;  %s1131_s0 = inlined_call_operand.vmem [shape: bf16[72,288], index: 0, kind: input, shape index: {}]   ;;  %s1132_s4 = inlined_call_operand.vmem [shape: bf16[16,32], index: 4, kind: input, shape index: {}]   ;;  %s1133_s3 = inlined_call_operand.vmem [shape: bf16[72,16], index: 3, kind: input, shape index: {}]   ;;  %s1134_s2 = inlined_call_operand.vmem [shape: f32[1,32], index: 2, kind: input, shape index: {}]   ;;  %s1135_s5 = inlined_call_operand.vmem [shape: f32[1,32], index: 5, kind: input, shape index: {}]   ;;  %s1136_s6 = inlined_call_operand.vmem [shape: bf16[72,32], index: 6, kind: output, shape index: {}]  }
   0x1   :  { %810 = vmatprep.subr.bf16.mxu1 %v859_v0  ;;  %v816_v1 = vld [vmem:[%s1130_s1 + $0x40] sm:$0xff]   ;;  %772 = vmatprep.mubr.msk.bf16.mxu1 %vm860_vm0, %v859_v0  ;;  %v819_v4 = vld [vmem:[%s1130_s1 + $0x48] sm:$0xff]   ;;  %v823_v8 = vld [vmem:[%s1130_s1 + $0x50] sm:$0xff]   ;;  %vm622_vm3 = vcmask 257024  }
   0x2   :  { %v817_v2 = vld [vmem:[%s1130_s1 + $0x80] sm:$0xff]   ;;  %705 = vmatprep.subr.bf16.mxu0 %v816_v1  ;;  %v820_v5 = vld [vmem:[%s1130_s1 + $0x88] sm:$0xff]   ;;  %v824_v9 = vld [vmem:[%s1130_s1 + $0x10] sm:$0xff]  }
   0x3   :  { %v818_v3 = vld [vmem:[%s1130_s1] sm:$0xff]   ;;  %812 = vmatpush3.bf16.msra.mxu1 %v817_v2  ;;  %v821_v6 = vld [vmem:[%s1130_s1 + $0x8] sm:$0xff]   ;;  %v825_v10 = vld [vmem:[%s1130_s1 + $0x58] sm:$0xff]  }
   0x4   :  { %706 = vmatpush3.bf16.msra.mxu0 %v818_v3  ;;  %811 = vmatprep.subr.bf16.mxu1 %v859_v0  ;;  %v822_v7 = vld [vmem:[%s1131_s0 + $0x20] ss:$12 sps:$4 sm:$0xff]   ;;  %v826_v12 = vld [vmem:[%s1130_s1 + $0x18] sm:$0xff]   ;;  %v834_v18 = vld [vmem:[%s1130_s1 + $0x70] sm:$0xff]  }
   0x5   :  { %707 = vmatprep.subr.bf16.mxu0 %v819_v4  ;;  %v827_v11 = vld [vmem:[%s1132_s4] sm:$0xff]   ;;  %v831_v16 = vld [vmem:[%s1130_s1 + $0x68] sm:$0xff]   ;;  %v833_v19 = vld [vmem:[%s1131_s0 + $0x50] ss:$12 sps:$4 sm:$0xff]  }
   0x6   :  { %v829_v13 = vld [vmem:[%s1130_s1 + $0x60] sm:$0xff]   ;;  %v832_v17 = vld [vmem:[%s1130_s1 + $0x28] sm:$0xff]   ;;  %v835_v21 = vld [vmem:[%s1130_s1 + $0x30] sm:$0xff]  }
   0x7   :  { %813 = vmatpush3.bf16.msra.mxu1 %v820_v5  ;;  %v828_v14 = vld [vmem:[%s1131_s0 + $0x38] ss:$12 sps:$4 sm:$0xff]   ;;  %v841_v24 = vld [vmem:[%s1131_s0 + $0x68] ss:$0 sps:$4 sm:$0xff]   ;;  %v838_v25 = vld [vmem:[%s1131_s0] ss:$12 sps:$4 sm:$0xff]  }
   0x8   :  { %708 = vmatpush3.bf16.msra.mxu0 %v821_v6  ;;  %788 = vmatprep.subr.bf16.mxu1 %v859_v0  ;;  %v830_v15 = vld [vmem:[%s1130_s1 + $0x20] sm:$0xff]   ;;  %v836_v22 = vld [vmem:[%s1130_s1 + $0x78] sm:$0xff]   ;;  %v848_v30 = vld [vmem:[%s1133_s3 + $0x8] sm:$0xff]  }
   0x9   :  { %709 = vmatprep.subr.bf16.mxu0 %v823_v8  ;;  %v840_v20 = vld [vmem:[%s1131_s0 + $0x4] ss:$12 sps:$4 sm:$0xff]   ;;  %v837_v23 = vld [vmem:[%s1130_s1 + $0x38] sm:$0xff]   ;;  %v846_v29 = vld [vmem:[%s1131_s0 + $0x34] ss:$12 sps:$4 sm:$0xff]  }
   0xa   :  { %773 = vmatmul.mubr.msk.bf16.vlgmr.msra.gmra.mrb[0].mxu1 %vm263_vm1, %v822_v7  ;;  %311 = vmatprep.mubr.bf16.mxu0 %v840_v20  ;;  %v842_v26 = vld [vmem:[%s1131_s0 + $0x1c] ss:$12 sps:$4 sm:$0xff]   ;;  %v844_v27 = vld [vmem:[%s1133_s3] sm:$0xff]   ;;  %v850_v32 = vld [vmem:[%s1131_s0 + $0x4c] ss:$12 sps:$4 sm:$0xff]  }
   0xb   :  { %776 = vmatprep.mubr.msk.bf16.mxu1 %vm860_vm0, %v859_v0  ;;  %789 = vmatpush3.bf16.msra.mxu1 %v827_v11  ;;  %v845_v28 = vld [vmem:[%s1131_s0 + $0x18] ss:$12 sps:$4 sm:$0xff]   ;;  %v849_v31 = vld [vmem:[%s1131_s0 + $0x30] ss:$12 sps:$4 sm:$0xff]   ;;  %v853_v35 = vld [vmem:[%s1131_s0 + $0x48] ss:$12 sps:$4 sm:$0xff]  }
   0xc   :  { %710 = vmatpush3.bf16.msra.mxu0 %v824_v9  ;;  %v40_v33 = vld [vmem:[%s1131_s0 + $0x60] sm:$0xff]  ;;  %v852_v34 = vld [vmem:[%s1133_s3 + $0x10] sm:$0xff]   ;;  %v855_v37 = vld [vmem:[%s1133_s3 + $0x18] sm:$0xff]  }
   0xd   :  { %711 = vmatprep.subr.bf16.mxu0 %v825_v10  ;;  %v650_v36 = vcombine.high %v40_v33, %v40_v33  ;;  %v649_v38 = vcombine.low %v40_v33, %v40_v33  ;;  %v857_v39 = vld [vmem:[%s1133_s3 + $0x20] ss:$0 sps:$4 sm:$0xff]   ;;  %v858_v40 = vld [vmem:[%s1131_s0 + $0x8] ss:$12 sps:$4 sm:$0xff]  }
   0xe   :  { %v1062_v7 = vld [vmem:[%s1134_s2] ss:$0 sm:$0xff] }
  0x10   :  { %712 = vmatpush3.bf16.msra.mxu0 %v826_v12 }
  0x11   :  { %713 = vmatprep.subr.bf16.mxu0 %v829_v13 }
  0x12   :  { %777 = vmatmul.mubr.msk.bf16.gmra.mrb[4].mxu1 %vm263_vm1, %v828_v14  ;;  %v1069_v14 = vld [vmem:[%s1135_s5] ss:$0 sm:$0xff] }
  0x13   :  { %780 = vmatprep.mubr.msk.bf16.mxu1 %vm860_vm0, %v859_v0 }
  0x14   :  { %714 = vmatpush3.bf16.msra.mxu0 %v830_v15 }
  0x15   :  { %715 = vmatprep.subr.bf16.mxu0 %v831_v16 }
  0x18   :  { %716 = vmatpush3.bf16.msra.mxu0 %v832_v17 }
  0x19   :  { %717 = vmatprep.subr.bf16.mxu0 %v834_v18 }
  0x1a   :  { %781 = vmatmul.mubr.msk.bf16.gmra.mrb[8].mxu1 %vm263_vm1, %v833_v19 }
  0x1b   :  { %784 = vmatprep.mubr.msk.bf16.mxu1 %vm860_vm0, %v859_v0 }
  0x1c   :  { %718 = vmatpush3.bf16.msra.mxu0 %v835_v21 }
  0x1d   :  { %719 = vmatprep.subr.bf16.mxu0 %v836_v22 }
  0x20   :  { %720 = vmatpush3.bf16.msra.mxu0 %v837_v23 }
  0x21   :  { %764 = vmatprep.subr.bf16.mxu0 %v859_v0 }
  0x22   :  { %785 = vmatmul.mubr.msk.bf16.gmra.mrb[12].mxu1 %vm263_vm1, %v841_v24 }
  0x23   :  { %312 = vmatmul.mubr.bf16.vlgmr.msra.gmra.mrb[0].mxu0 %v838_v25  ;;  %790 = vmatprep.mubr.msk.bf16.mxu1 %vm860_vm0, %v859_v0 }
  0x24   :  { %765 = vmatpush3.bf16.msra.mxu0 %v817_v2  ;;  %319 = vmatprep.mubr.bf16.mxu0 %v842_v26 }
  0x25   :  { %766 = vmatprep.subr.bf16.mxu0 %v859_v0 }
  0x28   :  { %767 = vmatpush3.bf16.msra.mxu0 %v820_v5 }
  0x2a   :  { %791 = vmatmul.mubr.msk.bf16.vlgmr.msra.gmra.mrb[16].mxu1 %vm463_vm2, %v844_v27 }
  0x2b   :  { %320 = vmatmul.mubr.bf16.gmra.mrb[4].mxu0 %v845_v28  ;;  %794 = vmatprep.mubr.msk.bf16.mxu1 %vm860_vm0, %v859_v0 }
  0x2c   :  { %327 = vmatprep.mubr.bf16.mxu0 %v846_v29 }
  0x32   :  { %795 = vmatmul.mubr.msk.bf16.gmra.mrb[20].mxu1 %vm463_vm2, %v848_v30 }
  0x33   :  { %328 = vmatmul.mubr.bf16.gmra.mrb[8].mxu0 %v849_v31  ;;  %798 = vmatprep.mubr.msk.bf16.mxu1 %vm860_vm0, %v859_v0 }
  0x34   :  { %335 = vmatprep.mubr.bf16.mxu0 %v850_v32 }
  0x3a   :  { %799 = vmatmul.mubr.msk.bf16.gmra.mrb[24].mxu1 %vm463_vm2, %v852_v34 }
  0x3b   :  { %336 = vmatmul.mubr.bf16.gmra.mrb[12].mxu0 %v853_v35  ;;  %802 = vmatprep.mubr.msk.bf16.mxu1 %vm860_vm0, %v859_v0 }
  0x3c   :  { %343 = vmatprep.mubr.bf16.mxu0 %v650_v36 }
  0x42   :  { %803 = vmatmul.mubr.msk.bf16.gmra.mrb[28].mxu1 %vm463_vm2, %v855_v37 }
  0x43   :  { %344 = vmatmul.mubr.bf16.gmra.mrb[16].mxu0 %v649_v38  ;;  %806 = vmatprep.mubr.msk.bf16.mxu1 %vm860_vm0, %v859_v0 }
  0x44   :  { %768 = vmatprep.mubr.msk.bf16.mxu0 %vm860_vm0, %v859_v0 }
  0x4a   :  { %807 = vmatmul.mubr.msk.bf16.gmra.mrb[32].mxu1 %vm463_vm2, %v857_v39 }
  0x4b   :  { %769 = vmatmul.mubr.msk.bf16.vlgmr.msra.gmra.mrb[20].mxu0 %vm263_vm1, %v858_v40 }
  0xdd   :  { %v393_v41 = vpop.f32.mrb[0].mxu1 }
  0xde   :  { %v774_v42 = vpop.f32.mrb[1].mxu1 }
  0xdf   :  { %v396_v43 = vpop.f32.mrb[2].mxu1 }
  0xe0   :  { %v775_v44 = vpop.f32.mrb[3].mxu1 }
  0xe5   :  { %v401_v45 = vpop.f32.mrb[4].mxu1 }
  0xe6   :  { %v778_v46 = vpop.f32.mrb[5].mxu1 }
  0xe7   :  { %v404_v47 = vpop.f32.mrb[6].mxu1 }
  0xe8   :  { %v779_v48 = vpop.f32.mrb[7].mxu1 }
  0xed   :  { %v1045_v49 = vpop.f32.mrb[8].mxu1 }
  0xee   :  { %v782_v50 = vpop.f32.mrb[9].mxu1 }
  0xef   :  { %v1047_v51 = vpop.f32.mrb[10].mxu1 }
  0xf0   :  { %v783_v52 = vpop.f32.mrb[11].mxu1 }
  0xf5   :  { %v1049_v53 = vpop.f32.mrb[12].mxu1 }
  0xf6   :  { %v721_v54 = vpop.f32.mrb[0].mxu0  ;;  %v786_v55 = vpop.f32.mrb[13].mxu1 }
  0xf7   :  { %v722_v56 = vpop.f32.mrb[1].mxu0  ;;  %v420_v57 = vpop.f32.mrb[14].mxu1 }
  0xf8   :  { %v1051_v58 = vadd.f32 %v722_v56, %v721_v54  ;;  %v724_v59 = vpop.f32.mrb[2].mxu0  ;;  %v787_v60 = vpop.f32.mrb[15].mxu1 }
  0xf9   :  { %v725_v61 = vpop.f32.mrb[3].mxu0 }
  0xfa   :  { %v1053_v62 = vadd.f32 %v725_v61, %v724_v59 }
  0xfd   :  { %v1055_v63 = vpop.f32.mrb[16].mxu1 }
  0xfe   :  { %v727_v0 = vpop.f32.mrb[4].mxu0  ;;  %v792_v1 = vpop.f32.mrb[17].mxu1 }
  0xff   :  { %v728_v2 = vpop.f32.mrb[5].mxu0  ;;  %v1057_v3 = vpop.f32.mrb[18].mxu1 }
 0x100   :  { %v729_v4 = vadd.f32 %v728_v2, %v727_v0  ;;  %v730_v5 = vpop.f32.mrb[6].mxu0  ;;  %v793_v6 = vpop.f32.mrb[19].mxu1 }
 0x101   :  { %v731_v8 = vpop.f32.mrb[7].mxu0 }
 0x102   :  { %v322_v9 = vadd.f32 %v729_v4, %v1062_v7  ;;  %v732_v10 = vadd.f32 %v731_v8, %v730_v5 }
 0x104   :  { %v325_v11 = vadd.f32 %v732_v10, %v1062_v7  ;;  %v394_v12 = vadd.f32 %v393_v41, %v322_v9 }
 0x105   :  { %v521_v13 = vpop.f32.mrb[20].mxu1 }
 0x106   :  { %v553_v15 = vadd.f32 %v521_v13, %v394_v12  ;;  %v733_v16 = vpop.f32.mrb[8].mxu0  ;;  %v796_v17 = vpop.f32.mrb[21].mxu1  ;;  %v397_v18 = vadd.f32 %v396_v43, %v325_v11 }
 0x107   :  { %v734_v19 = vpop.f32.mrb[9].mxu0  ;;  %v524_v20 = vpop.f32.mrb[22].mxu1 }
 0x108   :  { %v569_v21 = vadd.f32 %v1069_v14, %v553_v15  ;;  %v735_v22 = vadd.f32 %v734_v19, %v733_v16  ;;  %v554_v23 = vadd.f32 %v524_v20, %v397_v18  ;;  %v736_v24 = vpop.f32.mrb[10].mxu0  ;;  %v797_v25 = vpop.f32.mrb[23].mxu1 }
 0x109   :  { %v737_v26 = vpop.f32.mrb[11].mxu0 }
 0x10a   :  { %v578_v27 = vmax.f32 %v569_v21, 0.0  ;;  %v330_v28 = vadd.f32 %v735_v22, %v1062_v7  ;;  %v570_v29 = vadd.f32 %v1069_v14, %v554_v23  ;;  %v738_v30 = vadd.f32 %v737_v26, %v736_v24 }
 0x10b   :  { %v314_v21 = vadd.f32 %v1051_v58, %v1062_v7 }
 0x10c   :  { %v698_v31 = vpack.c.bf16 %v578_v27, %v578_v27  ;;  %v579_v32 = vmax.f32 %v570_v29, 0.0  ;;  %v333_v33 = vadd.f32 %v738_v30, %v1062_v7  ;;  %v402_v34 = vadd.f32 %v401_v45, %v330_v28 }
 0x10d   :  { %v529_v35 = vpop.f32.mrb[24].mxu1  ;;  %v317_v28 = vadd.f32 %v1053_v62, %v1062_v7 }
 0x10e   :  { %625 = vst.msk [vmem:[%s1136_s6 + $0x8] sm:$0xf] %vm622_vm3, %v698_v31  ;;  %v699_v36 = vpack.c.bf16 %v579_v32, %v579_v32  ;;  %v555_v37 = vadd.f32 %v529_v35, %v402_v34  ;;  %v739_v38 = vpop.f32.mrb[12].mxu0  ;;  %v800_v39 = vpop.f32.mrb[25].mxu1  ;;  %v405_v40 = vadd.f32 %v404_v47, %v333_v33 }
 0x10f   :  { %v740_v41 = vpop.f32.mrb[13].mxu0  ;;  %v532_v42 = vpop.f32.mrb[26].mxu1 }
 0x110   :  { %626 = vst.msk [vmem:[%s1136_s6 + $0xc] sm:$0xf] %vm622_vm3, %v699_v36  ;;  %v571_v43 = vadd.f32 %v1069_v14, %v555_v37  ;;  %v741_v44 = vadd.f32 %v740_v41, %v739_v38  ;;  %v556_v45 = vadd.f32 %v532_v42, %v405_v40  ;;  %v742_v46 = vpop.f32.mrb[14].mxu0  ;;  %v801_v48 = vpop.f32.mrb[27].mxu1 }
 0x111   :  { %v743_v50 = vpop.f32.mrb[15].mxu0 }
 0x112   :  { %v580_v52 = vmax.f32 %v571_v43, 0.0  ;;  %v338_v54 = vadd.f32 %v741_v44, %v1062_v7  ;;  %v572_v55 = vadd.f32 %v1069_v14, %v556_v45  ;;  %v744_v47 = vadd.f32 %v743_v50, %v742_v46 }
 0x114   :  { %v700_v56 = vpack.c.bf16 %v580_v52, %v580_v52  ;;  %v581_v57 = vmax.f32 %v572_v55, 0.0  ;;  %v341_v59 = vadd.f32 %v744_v47, %v1062_v7  ;;  %v410_v60 = vadd.f32 %v1045_v49, %v338_v54 }
 0x115   :  { %v537_v61 = vpop.f32.mrb[28].mxu1 }
 0x116   :  { %627 = vst.msk [vmem:[%s1136_s6 + $0x10] sm:$0xf] %vm622_vm3, %v700_v56  ;;  %v701_v0 = vpack.c.bf16 %v581_v57, %v581_v57  ;;  %v557_v1 = vadd.f32 %v537_v61, %v410_v60  ;;  %v745_v2 = vpop.f32.mrb[16].mxu0  ;;  %v804_v4 = vpop.f32.mrb[29].mxu1  ;;  %v413_v5 = vadd.f32 %v1047_v51, %v341_v59 }
 0x117   :  { %v746_v6 = vpop.f32.mrb[17].mxu0  ;;  %v540_v8 = vpop.f32.mrb[30].mxu1 }
 0x118   :  { %628 = vst.msk [vmem:[%s1136_s6 + $0x14] sm:$0xf] %vm622_vm3, %v701_v0  ;;  %v573_v49 = vadd.f32 %v1069_v14, %v557_v1  ;;  %v747_v9 = vadd.f32 %v746_v6, %v745_v2  ;;  %v558_v10 = vadd.f32 %v540_v8, %v413_v5  ;;  %v748_v11 = vpop.f32.mrb[18].mxu0  ;;  %v805_v12 = vpop.f32.mrb[31].mxu1 }
 0x119   :  { %v749_v13 = vpop.f32.mrb[19].mxu0 }
 0x11a   :  { %v582_v15 = vmax.f32 %v573_v49, 0.0  ;;  %v346_v16 = vadd.f32 %v747_v9, %v1062_v7  ;;  %v574_v17 = vadd.f32 %v1069_v14, %v558_v10 }
 0x11c   :  { %v702_v51 = vpack.c.bf16 %v582_v15, %v582_v15  ;;  %v583_v18 = vmax.f32 %v574_v17, 0.0  ;;  %v418_v19 = vadd.f32 %v1049_v53, %v346_v16 }
 0x11d   :  { %v545_v20 = vpop.f32.mrb[32].mxu1 }
 0x11e   :  { %629 = vst.msk [vmem:[%s1136_s6 + $0x18] sm:$0xf] %vm622_vm3, %v702_v51  ;;  %v703_v22 = vpack.c.bf16 %v583_v18, %v583_v18  ;;  %v559_v23 = vadd.f32 %v545_v20, %v418_v19  ;;  %v385_v24 = vpop.f32.mrb[20].mxu0  ;;  %v808_v25 = vpop.f32.mrb[33].mxu1 }
 0x11f   :  { %v386_v26 = vadd.f32 %v385_v24, %v314_v21  ;;  %v770_v27 = vpop.f32.mrb[21].mxu0  ;;  %v548_v29 = vpop.f32.mrb[34].mxu1 }
 0x120   :  { %630 = vst.msk [vmem:[%s1136_s6 + $0x1c] sm:$0xf] %vm622_vm3, %v703_v22  ;;  %v575_v53 = vadd.f32 %v1069_v14, %v559_v23  ;;  %v388_v58 = vpop.f32.mrb[22].mxu0  ;;  %v809_v30 = vpop.f32.mrb[35].mxu1 }
 0x121   :  { %v551_v31 = vadd.f32 %v1055_v63, %v386_v26  ;;  %v389_v32 = vadd.f32 %v388_v58, %v317_v28  ;;  %v771_v33 = vpop.f32.mrb[23].mxu0 }
 0x122   :  { %v584_v34 = vmax.f32 %v575_v53, 0.0 }
 0x123   :  { %v567_v35 = vadd.f32 %v1069_v14, %v551_v31  ;;  %v552_v36 = vadd.f32 %v1057_v3, %v389_v32 }
 0x124   :  { %v704_v62 = vpack.c.bf16 %v584_v34, %v584_v34 }
 0x125   :  { %v576_v7 = vmax.f32 %v567_v35, 0.0  ;;  %v568_v37 = vadd.f32 %v1069_v14, %v552_v36 }
 0x126   :  { %631 = vst.msk [vmem:[%s1136_s6 + $0x20] sm:$0xf] %vm622_vm3, %v704_v62 }
 0x127   :  { %v696_v38 = vpack.c.bf16 %v576_v7, %v576_v7  ;;  %v577_v39 = vmax.f32 %v568_v37, 0.0 }
 0x129   :  { %623 = vst.msk [vmem:[%s1136_s6] sm:$0xf] %vm622_vm3, %v696_v38  ;;  %v697_v63 = vpack.c.bf16 %v577_v39, %v577_v39 }
 0x12b   :  { %624 = vst.msk [vmem:[%s1136_s6 + $0x4] sm:$0xf] %vm622_vm3, %v697_v63 }

// kernel: touchnet_forward.18
= control target key start
LH: loop header
LB: loop body
LE: loop exit
PB: predicated region body
PF: predicated region fallthrough
CT: control target
= control target key end

     0   :  { %v696_v1 = vmov 0.0   ;;  %vm697_vm0 = vmmov 0   ;;  %vm257_vm1 = vcmask 261120   ;;  %vm490_vm2 = vcmask 257024   ;;  %s901_s1 = inlined_call_operand.vmem [shape: bf16[288,32], index: 1, kind: input, shape index: {}]   ;;  %s902_s0 = inlined_call_operand.vmem [shape: bf16[72,288], index: 0, kind: input, shape index: {}]   ;;  %s903_s2 = inlined_call_operand.vmem [shape: f32[1,32], index: 2, kind: input, shape index: {}]   ;;  %s904_s3 = inlined_call_operand.vmem [shape: bf16[72,32], index: 3, kind: input, shape index: {}]   ;;  %s905_s4 = inlined_call_operand.vmem [shape: bf16[72,32], index: 4, kind: output, shape index: {}]  }
   0x1   :  { %v659_v0 = vld [vmem:[%s901_s1 + $0x40] sm:$0xff]   ;;  %633 = vmatprep.subr.bf16.mxu1 %v696_v1  ;;  %637 = vmatprep.mubr.msk.bf16.mxu1 %vm697_vm0, %v696_v1  ;;  %v661_v3 = vld [vmem:[%s901_s1 + $0x48] sm:$0xff]   ;;  %v663_v5 = vld [vmem:[%s901_s1 + $0x50] sm:$0xff]  }
   0x2   :  { %v660_v2 = vld [vmem:[%s901_s1] sm:$0xff]   ;;  %580 = vmatprep.subr.bf16.mxu0 %v659_v0  ;;  %v662_v4 = vld [vmem:[%s901_s1 + $0x8] sm:$0xff]   ;;  %v664_v6 = vld [vmem:[%s901_s1 + $0x10] sm:$0xff]  }
   0x3   :  { %581 = vmatpush3.bf16.msra.mxu0 %v660_v2  ;;  %v665_v7 = vld [vmem:[%s901_s1 + $0x58] sm:$0xff]   ;;  %v667_v9 = vld [vmem:[%s901_s1 + $0x60] sm:$0xff]   ;;  %v669_v12 = vld [vmem:[%s901_s1 + $0x68] sm:$0xff]  }
   0x4   :  { %582 = vmatprep.subr.bf16.mxu0 %v661_v3  ;;  %v666_v8 = vld [vmem:[%s901_s1 + $0x18] sm:$0xff]   ;;  %v673_v10 = vld [vmem:[%s901_s1 + $0x80] sm:$0xff]   ;;  %v670_v13 = vld [vmem:[%s901_s1 + $0x28] sm:$0xff]  }
   0x5   :  { %v668_v11 = vld [vmem:[%s901_s1 + $0x20] sm:$0xff]   ;;  %634 = vmatpush3.bf16.msra.mxu1 %v673_v10  ;;  %v671_v14 = vld [vmem:[%s901_s1 + $0x70] sm:$0xff]   ;;  %v679_v16 = vld [vmem:[%s901_s1 + $0x88] sm:$0xff]  }
   0x6   :  { %635 = vmatprep.subr.bf16.mxu1 %v696_v1  ;;  %v678_v15 = vld [vmem:[%s902_s0 + $0x4] ss:$12 sps:$4 sm:$0xff]   ;;  %v680_v17 = vld [vmem:[%s902_s0 + $0x8] ss:$12 sps:$4 sm:$0xff]   ;;  %v674_v19 = vld [vmem:[%s901_s1 + $0x78] sm:$0xff]  }
   0x7   :  { %583 = vmatpush3.bf16.msra.mxu0 %v662_v4  ;;  %305 = vmatprep.mubr.bf16.mxu0 %v678_v15  ;;  %v672_v18 = vld [vmem:[%s901_s1 + $0x30] sm:$0xff]   ;;  %v675_v20 = vld [vmem:[%s901_s1 + $0x38] sm:$0xff]   ;;  %v684_v21 = vld [vmem:[%s902_s0 + $0x20] ss:$12 sps:$4 sm:$0xff]  }
   0x8   :  { %584 = vmatprep.subr.bf16.mxu0 %v663_v5  ;;  %v676_v22 = vld [vmem:[%s902_s0] ss:$12 sps:$4 sm:$0xff]   ;;  %v681_v23 = vld [vmem:[%s902_s0 + $0x1c] ss:$12 sps:$4 sm:$0xff]   ;;  %v688_v24 = vld [vmem:[%s902_s0 + $0x38] ss:$12 sps:$4 sm:$0xff]  }
   0x9   :  { %636 = vmatpush3.bf16.msra.mxu1 %v679_v16  ;;  %v683_v25 = vld [vmem:[%s902_s0 + $0x18] ss:$12 sps:$4 sm:$0xff]   ;;  %v685_v26 = vld [vmem:[%s902_s0 + $0x34] ss:$12 sps:$4 sm:$0xff]   ;;  %v692_v27 = vld [vmem:[%s902_s0 + $0x50] ss:$12 sps:$4 sm:$0xff]  }
   0xa   :  { %v687_v28 = vld [vmem:[%s902_s0 + $0x30] ss:$12 sps:$4 sm:$0xff]   ;;  %v689_v29 = vld [vmem:[%s902_s0 + $0x4c] ss:$12 sps:$4 sm:$0xff]   ;;  %v34_v30 = vld [vmem:[%s902_s0 + $0x60] sm:$0xff] }
   0xb   :  { %585 = vmatpush3.bf16.msra.mxu0 %v664_v6  ;;  %v695_v31 = vld [vmem:[%s902_s0 + $0x68] ss:$0 sps:$4 sm:$0xff]   ;;  %v518_v33 = vcombine.high %v34_v30, %v34_v30  ;;  %v517_v34 = vcombine.low %v34_v30, %v34_v30  ;;  %v839_v44 = vld [vmem:[%s903_s2] ss:$0 sm:$0xff] }
   0xc   :  { %586 = vmatprep.subr.bf16.mxu0 %v665_v7  ;;  %638 = vmatmul.mubr.msk.bf16.vlgmr.msra.gmra.mrb[0].mxu1 %vm257_vm1, %v680_v17  ;;  %v691_v32 = vld [vmem:[%s902_s0 + $0x48] ss:$12 sps:$4 sm:$0xff]   ;;  %v562_v45 = vld [vmem:[%s904_s3] sm:$0xff]  }
   0xd   :  { %641 = vmatprep.mubr.msk.bf16.mxu1 %vm697_vm0, %v696_v1  ;;  %v563_v51 = vunpack.c.l.bf16 %v562_v45  ;;  %v564_v55 = vunpack.c.h.bf16 %v562_v45  ;;  %v577_v61 = vld [vmem:[%s904_s3 + $0x8] sm:$0xff]  }
   0xe   :  { %v567_v5 = vunpack.c.l.bf16 %v577_v61 }
   0xf   :  { %587 = vmatpush3.bf16.msra.mxu0 %v666_v8 }
  0x10   :  { %588 = vmatprep.subr.bf16.mxu0 %v667_v9 }
  0x13   :  { %589 = vmatpush3.bf16.msra.mxu0 %v668_v11 }
  0x14   :  { %590 = vmatprep.subr.bf16.mxu0 %v669_v12  ;;  %642 = vmatmul.mubr.msk.bf16.gmra.mrb[4].mxu1 %vm257_vm1, %v684_v21 }
  0x15   :  { %645 = vmatprep.mubr.msk.bf16.mxu1 %vm697_vm0, %v696_v1 }
  0x17   :  { %591 = vmatpush3.bf16.msra.mxu0 %v670_v13 }
  0x18   :  { %592 = vmatprep.subr.bf16.mxu0 %v671_v14  ;;  %v568_v14 = vunpack.c.h.bf16 %v577_v61 }
  0x1b   :  { %593 = vmatpush3.bf16.msra.mxu0 %v672_v18 }
  0x1c   :  { %594 = vmatprep.subr.bf16.mxu0 %v674_v19  ;;  %646 = vmatmul.mubr.msk.bf16.gmra.mrb[8].mxu1 %vm257_vm1, %v688_v24 }
  0x1d   :  { %649 = vmatprep.mubr.msk.bf16.mxu1 %vm697_vm0, %v696_v1 }
  0x1f   :  { %595 = vmatpush3.bf16.msra.mxu0 %v675_v20  ;;  %v578_v20 = vld [vmem:[%s904_s3 + $0x10] sm:$0xff]  }
  0x22   :  { %306 = vmatmul.mubr.bf16.vlgmr.msra.gmra.mrb[0].mxu0 %v676_v22 }
  0x23   :  { %313 = vmatprep.mubr.bf16.mxu0 %v681_v23 }
  0x24   :  { %650 = vmatmul.mubr.msk.bf16.gmra.mrb[12].mxu1 %vm257_vm1, %v692_v27 }
  0x25   :  { %653 = vmatprep.mubr.msk.bf16.mxu1 %vm697_vm0, %v696_v1 }
  0x2a   :  { %314 = vmatmul.mubr.bf16.gmra.mrb[4].mxu0 %v683_v25 }
  0x2b   :  { %321 = vmatprep.mubr.bf16.mxu0 %v685_v26 }
  0x2c   :  { %654 = vmatmul.mubr.msk.bf16.gmra.mrb[16].mxu1 %vm257_vm1, %v695_v31 }
  0x32   :  { %322 = vmatmul.mubr.bf16.gmra.mrb[8].mxu0 %v687_v28  ;;  %v571_v28 = vunpack.c.l.bf16 %v578_v20 }
  0x33   :  { %329 = vmatprep.mubr.bf16.mxu0 %v689_v29 }
  0x3a   :  { %330 = vmatmul.mubr.bf16.gmra.mrb[12].mxu0 %v691_v32 }
  0x3b   :  { %337 = vmatprep.mubr.bf16.mxu0 %v518_v33 }
  0x42   :  { %338 = vmatmul.mubr.bf16.gmra.mrb[16].mxu0 %v517_v34 }
  0xdf   :  { %v379_v35 = vpop.f32.mrb[0].mxu1 }
  0xe0   :  { %v639_v36 = vpop.f32.mrb[1].mxu1 }
  0xe1   :  { %v382_v37 = vpop.f32.mrb[2].mxu1 }
  0xe2   :  { %v640_v38 = vpop.f32.mrb[3].mxu1 }
  0xe7   :  { %v387_v39 = vpop.f32.mrb[4].mxu1 }
  0xe8   :  { %v643_v40 = vpop.f32.mrb[5].mxu1 }
  0xe9   :  { %v390_v42 = vpop.f32.mrb[6].mxu1 }
  0xea   :  { %v644_v46 = vpop.f32.mrb[7].mxu1 }
  0xef   :  { %v395_v56 = vpop.f32.mrb[8].mxu1 }
  0xf0   :  { %v647_v57 = vpop.f32.mrb[9].mxu1 }
  0xf1   :  { %v398_v62 = vpop.f32.mrb[10].mxu1 }
  0xf2   :  { %v648_v0 = vpop.f32.mrb[11].mxu1 }
  0xf5   :  { %v596_v41 = vpop.f32.mrb[0].mxu0 }
  0xf6   :  { %v597_v43 = vpop.f32.mrb[1].mxu0 }
  0xf7   :  { %v598_v47 = vadd.f32 %v597_v43, %v596_v41  ;;  %v599_v48 = vpop.f32.mrb[2].mxu0  ;;  %v403_v15 = vpop.f32.mrb[12].mxu1  ;;  %v579_v43 = vld [vmem:[%s904_s3 + $0x18] sm:$0xff]  }
  0xf8   :  { %v600_v49 = vpop.f32.mrb[3].mxu0  ;;  %v651_v16 = vpop.f32.mrb[13].mxu1  ;;  %v576_v61 = vunpack.c.h.bf16 %v579_v43 }
  0xf9   :  { %v308_v50 = vadd.f32 %v598_v47, %v839_v44  ;;  %v601_v52 = vadd.f32 %v600_v49, %v599_v48  ;;  %v406_v21 = vpop.f32.mrb[14].mxu1 }
  0xfa   :  { %v652_v23 = vpop.f32.mrb[15].mxu1 }
  0xfb   :  { %v380_v53 = vadd.f32 %v379_v35, %v308_v50  ;;  %v311_v54 = vadd.f32 %v601_v52, %v839_v44  ;;  %v575_v52 = vunpack.c.l.bf16 %v579_v43 }
  0xfd   :  { %v435_v58 = vadd.f32 %v563_v51, %v380_v53  ;;  %v383_v59 = vadd.f32 %v382_v37, %v311_v54  ;;  %v602_v60 = vpop.f32.mrb[4].mxu0  ;;  %v572_v37 = vunpack.c.h.bf16 %v578_v20 }
  0xfe   :  { %v603_v63 = vpop.f32.mrb[5].mxu0 }
  0xff   :  { %v444_v1 = vmax.f32 %v435_v58, 0.0  ;;  %v436_v2 = vadd.f32 %v564_v55, %v383_v59  ;;  %v604_v3 = vadd.f32 %v603_v63, %v602_v60  ;;  %v605_v4 = vpop.f32.mrb[6].mxu0  ;;  %v411_v38 = vpop.f32.mrb[16].mxu1 }
 0x100   :  { %v606_v6 = vpop.f32.mrb[7].mxu0 }
 0x101   :  { %v552_v7 = vpack.c.bf16 %v444_v1, %v444_v1  ;;  %v445_v8 = vmax.f32 %v436_v2, 0.0  ;;  %v316_v9 = vadd.f32 %v604_v3, %v839_v44  ;;  %v607_v10 = vadd.f32 %v606_v6, %v605_v4  ;;  %v425_v2 = vld [vmem:[%s904_s3 + $0x20] sm:$0xf] }
 0x103   :  { %491 = vst.msk [vmem:[%s905_s4] sm:$0xf] %vm490_vm2, %v552_v7  ;;  %v553_v11 = vpack.c.bf16 %v445_v8, %v445_v8  ;;  %v388_v12 = vadd.f32 %v387_v39, %v316_v9  ;;  %v319_v13 = vadd.f32 %v607_v10, %v839_v44  ;;  %v655_v39 = vpop.f32.mrb[17].mxu1 }
 0x104   :  { %v414_v45 = vpop.f32.mrb[18].mxu1 }
 0x105   :  { %492 = vst.msk [vmem:[%s905_s4 + $0x4] sm:$0xf] %vm490_vm2, %v553_v11  ;;  %v437_v17 = vadd.f32 %v567_v5, %v388_v12  ;;  %v391_v18 = vadd.f32 %v390_v42, %v319_v13  ;;  %v608_v19 = vpop.f32.mrb[8].mxu0  ;;  %v656_v47 = vpop.f32.mrb[19].mxu1  ;;  %v434_v11 = vunpack.c.l.bf16 %v425_v2 }
 0x106   :  { %v609_v22 = vpop.f32.mrb[9].mxu0 }
 0x107   :  { %v446_v24 = vmax.f32 %v437_v17, 0.0  ;;  %v438_v25 = vadd.f32 %v568_v14, %v391_v18  ;;  %v610_v26 = vadd.f32 %v609_v22, %v608_v19  ;;  %v611_v27 = vpop.f32.mrb[10].mxu0 }
 0x108   :  { %v612_v29 = vpop.f32.mrb[11].mxu0 }
 0x109   :  { %v554_v30 = vpack.c.bf16 %v446_v24, %v446_v24  ;;  %v447_v31 = vmax.f32 %v438_v25, 0.0  ;;  %v324_v32 = vadd.f32 %v610_v26, %v839_v44  ;;  %v613_v33 = vadd.f32 %v612_v29, %v611_v27 }
 0x10b   :  { %493 = vst.msk [vmem:[%s905_s4 + $0x8] sm:$0xf] %vm490_vm2, %v554_v30  ;;  %v555_v34 = vpack.c.bf16 %v447_v31, %v447_v31  ;;  %v396_v35 = vadd.f32 %v395_v56, %v324_v32  ;;  %v327_v36 = vadd.f32 %v613_v33, %v839_v44 }
 0x10d   :  { %494 = vst.msk [vmem:[%s905_s4 + $0xc] sm:$0xf] %vm490_vm2, %v555_v34  ;;  %v439_v40 = vadd.f32 %v571_v28, %v396_v35  ;;  %v399_v41 = vadd.f32 %v398_v62, %v327_v36  ;;  %v614_v42 = vpop.f32.mrb[12].mxu0 }
 0x10e   :  { %v615_v46 = vpop.f32.mrb[13].mxu0 }
 0x10f   :  { %v448_v48 = vmax.f32 %v439_v40, 0.0  ;;  %v440_v49 = vadd.f32 %v572_v37, %v399_v41  ;;  %v616_v50 = vadd.f32 %v615_v46, %v614_v42  ;;  %v617_v51 = vpop.f32.mrb[14].mxu0 }
 0x110   :  { %v618_v53 = vpop.f32.mrb[15].mxu0 }
 0x111   :  { %v556_v54 = vpack.c.bf16 %v448_v48, %v448_v48  ;;  %v449_v55 = vmax.f32 %v440_v49, 0.0  ;;  %v332_v56 = vadd.f32 %v616_v50, %v839_v44  ;;  %v619_v57 = vadd.f32 %v618_v53, %v617_v51 }
 0x113   :  { %495 = vst.msk [vmem:[%s905_s4 + $0x10] sm:$0xf] %vm490_vm2, %v556_v54  ;;  %v557_v58 = vpack.c.bf16 %v449_v55, %v449_v55  ;;  %v404_v59 = vadd.f32 %v403_v15, %v332_v56  ;;  %v335_v60 = vadd.f32 %v619_v57, %v839_v44 }
 0x115   :  { %496 = vst.msk [vmem:[%s905_s4 + $0x14] sm:$0xf] %vm490_vm2, %v557_v58  ;;  %v441_v62 = vadd.f32 %v575_v52, %v404_v59  ;;  %v407_v63 = vadd.f32 %v406_v21, %v335_v60  ;;  %v620_v0 = vpop.f32.mrb[16].mxu0 }
 0x116   :  { %v621_v1 = vpop.f32.mrb[17].mxu0 }
 0x117   :  { %v450_v3 = vmax.f32 %v441_v62, 0.0  ;;  %v442_v4 = vadd.f32 %v576_v61, %v407_v63  ;;  %v622_v5 = vadd.f32 %v621_v1, %v620_v0  ;;  %v623_v6 = vpop.f32.mrb[18].mxu0 }
 0x118   :  { %v624_v7 = vpop.f32.mrb[19].mxu0 }
 0x119   :  { %v558_v8 = vpack.c.bf16 %v450_v3, %v450_v3  ;;  %v451_v9 = vmax.f32 %v442_v4, 0.0  ;;  %v340_v10 = vadd.f32 %v622_v5, %v839_v44 }
 0x11b   :  { %497 = vst.msk [vmem:[%s905_s4 + $0x18] sm:$0xf] %vm490_vm2, %v558_v8  ;;  %v559_v12 = vpack.c.bf16 %v451_v9, %v451_v9  ;;  %v412_v13 = vadd.f32 %v411_v38, %v340_v10 }
 0x11d   :  { %498 = vst.msk [vmem:[%s905_s4 + $0x1c] sm:$0xf] %vm490_vm2, %v559_v12  ;;  %v443_v14 = vadd.f32 %v434_v11, %v412_v13 }
 0x11f   :  { %v452_v15 = vmax.f32 %v443_v14, 0.0 }
 0x121   :  { %v560_v16 = vpack.c.bf16 %v452_v15, %v452_v15 }
 0x123   :  { %499 = vst.msk [vmem:[%s905_s4 + $0x20] sm:$0xf] %vm490_vm2, %v560_v16 }

// kernel: touchnet_forward.19
= control target key start
LH: loop header
LB: loop body
LE: loop exit
PB: predicated region body
PF: predicated region fallthrough
CT: control target
= control target key end

     0   :  { %vm186_vm0 = vcmask 1042432   ;;  %vm182_vm1 = vcmask 48128   ;;  %v537_v1 = vmov 0.0   ;;  %vm538_vm2 = vmmov 0   ;;  %s695_s0 = inlined_call_operand.vmem [shape: bf16[2,36,32], index: 0, kind: input, shape index: {}]   ;;  %s696_s1 = inlined_call_operand.vmem [shape: bf16[2,6], index: 1, kind: input, shape index: {}]   ;;  %s697_s2 = inlined_call_operand.vmem [shape: bf16[32,32], index: 2, kind: input, shape index: {}]   ;;  %s698_s3 = inlined_call_operand.vmem [shape: f32[1,32], index: 3, kind: input, shape index: {}]   ;;  %s699_s4 = inlined_call_operand.vmem [shape: bf16[6,12], index: 4, kind: input, shape index: {}]   ;;  %s700_s5 = inlined_call_operand.vmem [shape: f32[1,12], index: 5, kind: input, shape index: {}]   ;;  %s701_s6 = inlined_call_operand.vmem [shape: bf16[12,3], index: 6, kind: input, shape index: {}]   ;;  %s702_s7 = inlined_call_operand.vmem [shape: f32[1,3], index: 7, kind: input, shape index: {}]   ;;  %s703_s8 = inlined_call_operand.vmem [shape: bf16[32,27], index: 8, kind: input, shape index: {}]   ;;  %s704_s9 = inlined_call_operand.vmem [shape: bf16[3,27], index: 9, kind: input, shape index: {}]   ;;  %s705_s10 = inlined_call_operand.vmem [shape: f32[1,27], index: 10, kind: input, shape index: {}]   ;;  %s706_s11 = inlined_call_operand.hbm [shape: f32[2,27], index: 11, kind: output, shape index: {}]  }
   0x1   :  { %v174_v0 = vld [vmem:[%s699_s4] sm:$0x7]  ;;  %478 = vmatprep.subr.bf16.mxu1 %v537_v1  ;;  %480 = vmatprep.mubr.msk.bf16.mxu1 %vm538_vm2, %v537_v1  ;;  %vm249_vm3 = vcmask 1045504   ;;  %v510_v6 = vld [vmem:[%s697_s2 + $0x8] sm:$0xff]  }
   0x2   :  { %v188_v2 = vsel %vm186_vm0, %v174_v0, 0  ;;  %v173_v3 = vld [vmem:[%s696_s1] sm:$0x1]  ;;  %470 = vmatprep.subr.bf16.mxu0 %v537_v1  ;;  %474 = vmatprep.mubr.msk.bf16.mxu0 %vm538_vm2, %v537_v1 }
   0x3   :  { %v508_v4 = vld [vmem:[%s697_s2] sm:$0xff]   ;;  %479 = vmatpush3.bf16.msra.mxu1 %v188_v2 }
   0x4   :  { %471 = vmatpush3.bf16.msra.mxu0 %v508_v4  ;;  %484 = vmatprep.subr.bf16.mxu1 %v537_v1  ;;  %v509_v5 = vld [vmem:[%s701_s6] sm:$0x3f]  }
   0x5   :  { %472 = vmatprep.subr.bf16.mxu0 %v537_v1  ;;  %v251_v7 = vsel %vm249_vm3, %v509_v5, 0 }
   0x6   :  { %481 = vmatmul.mubr.msk.bf16.vlgmr.msra.gmra.mrb[0].mxu1 %vm182_vm1, %v173_v3 }
   0x7   :  { %485 = vmatpush3.bf16.msra.mxu1 %v251_v7  ;;  %486 = vmatprep.mubr.msk.bf16.mxu1 %vm538_vm2, %v537_v1 }
   0x8   :  { %16 = vsyncpa [#allocation3], 0  ;;  %473 = vmatpush3.bf16.msra.mxu0 %v510_v6  ;;  %496 = vmatprep.subr.bf16.mxu1 %v537_v1  ;;  %v445_v8 = vld [vmem:[%s695_s0] sm:$0xff]   ;;  %v457_v10 = vld [vmem:[%s695_s0 + $0x18] sm:$0xff]   ;;  %vm60_vm4 = vcmask 261120   ;;  %vm68_vm5 = vcmask 257024  }
   0x9   :  { %490 = vmatprep.subr.bf16.mxu0 %v537_v1  ;;  %v45_v9 = vld [vmem:[%s695_s0 + $0x14] ss:$12 sps:$4 sm:$0xff]   ;;  %v446_v11 = vunpack.c.l.bf16 %v445_v8  ;;  %v447_v12 = vunpack.c.h.bf16 %v445_v8  ;;  %v454_v13 = vunpack.c.l.bf16 %v457_v10  ;;  %v456_v15 = vld [vmem:[%s695_s0 + $0x8] sm:$0xff]   ;;  %v455_v17 = vunpack.c.h.bf16 %v457_v10  ;;  %v44_v27 = vld [vmem:[%s695_s0 + $0x10] sm:$0x3]  ;;  %s540_s24 = smov [#allocation2]  }
   0xa   :  { %v55_v14 = vunpack.c.l.bf16 %v45_v9  ;;  %v450_v16 = vunpack.c.l.bf16 %v456_v15  ;;  %v451_v23 = vunpack.c.h.bf16 %v456_v15  ;;  %v58_v24 = vunpack.c.h.bf16 %v45_v9  ;;  %v49_v28 = vld [vmem:[%s695_s0 + $0x24] sm:$0x3]  ;;  %v299_v0 = vld [vmem:[%s704_s9] sm:$0x3]  ;;  %s422_s25 = sshll.u32 %s540_s24, 4  ;;  %s423_s25 = int_to_ptr.vmem [resolvable:$true] %s422_s25 }
   0xb   :  { %v61_v18 = vsel %vm60_vm4, %v446_v11, 0.0  ;;  %v62_v19 = vsel %vm60_vm4, %v447_v12, 0.0  ;;  %v78_v22 = vsel %vm60_vm4, %v454_v13, 0.0  ;;  %v80_v30 = vsel %vm60_vm4, %v455_v17, 0.0  ;;  %v434_v6 = vld [vmem:[%s700_s5] ss:$0 sm:$0xff]  ;;  %p518_p1 = scmp.lt.s32.totalorder %s423_s25, %s423_s25 }
   0xc   :  { %v63_v20 = vadd.f32 %v62_v19, %v61_v18  ;;  %v77_v21 = vsel %vm60_vm4, %v55_v14, 0.0  ;;  %v64_v25 = vsel %vm60_vm4, %v450_v16, 0.0  ;;  %v54_v31 = vunpack.c.l.bf16 %v44_v27  ;;  %v511_v11 = vld [vmem:[%s703_s8] sm:$0xff]   ;;  %v512_v14 = vld [vmem:[%s703_s8 + $0x8] sm:$0xff]  }
   0xd   :  { %v79_v26 = vadd.f32 %v78_v22, %v77_v21  ;;  %v59_v32 = vunpack.c.l.bf16 %v49_v28  ;;  %v66_v33 = vsel %vm60_vm4, %v451_v23, 0.0  ;;  %v82_v36 = vsel %vm60_vm4, %v58_v24, 0.0  ;;  %v430_v15 = vld [vmem:[%s698_s3] ss:$0 sm:$0xff] }
   0xe   :  { %v65_v29 = vadd.f32 %v64_v25, %v63_v20  ;;  %v69_v37 = vsel %vm68_vm5, %v54_v31, 0.0  ;;  %vm115_vm8 = vcmask 1041409   ;;  %vm304_vm9 = vcmask 1040384   ;;  %v436_v22 = vld [vmem:[%s702_s7] ss:$0 sm:$0xff]  ;;  %s513_s7 = scalar_lea.vmem %s423_s25, 32 }
   0xf   :  { %v81_v34 = vadd.f32 %v80_v30, %v79_v26  ;;  %v84_v39 = vsel %vm68_vm5, %v59_v32, 0.0  ;;  %vm305_vm10 = vcmask 1041408   ;;  %v539_v2 = vmov 65535   ;;  %p514_p0 = scmp.ne.s32.totalorder %s423_s25, %s513_s7  ;;  %p519_p2 = scmp.lt.s32.totalorder %s513_s7, %s513_s7 }
  0x10   :  { %v67_v35 = vadd.f32 %v66_v33, %v65_v29  ;;  %v306_v3 = vsel %vm304_vm9, 4294967295, %v539_v2  ;;  %vm245_vm11 = vcmask 97280   ;;  %vm300_vm12 = vcmask 23552   ;;  %v443_v33 = vld [vmem:[%s705_s10] ss:$0 sm:$0xff] }
  0x11   :  { %v83_v38 = vadd.f32 %v82_v36, %v81_v34  ;;  %v307_v4 = vsel %vm305_vm10, %v306_v3, 0  ;;  %vm414_vm13 = vcmask 214016   ;;  %p520_p3 = por %p519_p2, %p518_p1 }
  0x12   :  { %v70_v40 = vadd.f32 %v69_v37, %v67_v35  ;;  %v309_v5 = vand.u32 %v307_v4, %v299_v0 }
  0x13   :  { %v85_v41 = vadd.f32 %v84_v39, %v83_v38  ;;  %p521_p4 = pnand %p520_p3, %p514_p0 }
  0x14   :  { %v71_v42 = vrot.slane %v70_v40, 4 }
  0x15   :  { %v86_v43 = vrot.slane %v85_v41, 4 }
  0x16   :  { %v72_v44 = vadd.f32 %v71_v42, %v70_v40 }
  0x17   :  { %v87_v45 = vadd.f32 %v86_v43, %v85_v41 }
  0x18   :  { %v73_v46 = vrot.slane %v72_v44, 2 }
  0x19   :  { %v88_v47 = vrot.slane %v87_v45, 2 }
  0x1a   :  { %v74_v48 = vadd.f32 %v73_v46, %v72_v44 }
  0x1b   :  { %v89_v49 = vadd.f32 %v88_v47, %v87_v45 }
  0x1c   :  { %v75_v50 = vrot.slane %v74_v48, 1 }
  0x1d   :  { %v90_v51 = vrot.slane %v89_v49, 1 }
  0x1e   :  { %v76_v52 = vadd.f32 %v75_v50, %v74_v48 }
  0x1f   :  { %v91_v53 = vadd.f32 %v90_v51, %v89_v49 }
  0x20   :  { %v92_v54 = vmul.f32 0.027777778, %v76_v52 }
  0x21   :  { %v93_v55 = vmul.f32 0.027777778, %v91_v53 }
  0x22   :  { %vm94_vm6 = vcmp.gt.f32.partialorder %v92_v54, -1e+20 }
  0x23   :  { %vm95_vm7 = vcmp.gt.f32.partialorder %v93_v55, -1e+20  ;;  %v96_v56 = vsel %vm94_vm6, %v92_v54, -1e+20 }
  0x24   :  { %v97_v57 = vsel %vm95_vm7, %v93_v55, -1e+20  ;;  %v98_v58 = vpack.c.bf16 %v96_v56, %v96_v56 }
  0x25   :  { %v99_v59 = vpack.c.bf16 %v97_v57, %v97_v57 }
  0x26   :  { %v113_v60 = vunpack.c.l.b16 %v98_v58 }
  0x27   :  { %v114_v61 = vunpack.c.l.b16 %v99_v59 }
  0x29   :  { %v116_v62 = vsel %vm115_vm8, %v114_v61, %v113_v60 }
  0x2a   :  { %v117_v63 = vpack.c.b16 %v116_v62, %v116_v62 }
  0x2c   :  { %475 = vmatmul.mubr.msk.bf16.vlgmr.msra.gmra.mrb[0].mxu0 %vm60_vm4, %v117_v63 }
  0x2d   :  { %492 = vmatprep.mubr.msk.bf16.mxu0 %vm538_vm2, %v537_v1  ;;  %491 = vmatpush3.bf16.msra.mxu0 %v309_v5 }
  0xd9   :  { %v224_v7 = vpop.f32.mrb[0].mxu1 }
  0xda   :  { %v225_v8 = vadd.f32 %v434_v6, %v224_v7  ;;  %v482_v9 = vpop.f32.mrb[1].mxu1 }
  0xdb   :  { %v227_v10 = vpop.f32.mrb[2].mxu1 }
  0xdc   :  { %v230_v12 = vpack.c.bf16 %v225_v8, %v225_v8  ;;  %v483_v13 = vpop.f32.mrb[3].mxu1 }
  0xde   :  { %487 = vmatmul.mubr.msk.bf16.vlgmr.msra.gmra.mrb[4].mxu1 %vm245_vm11, %v230_v12 }
  0xdf   :  { %497 = vmatpush3.bf16.msra.mxu1 %v511_v11  ;;  %500 = vmatprep.mubr.msk.bf16.mxu1 %vm538_vm2, %v537_v1 }
  0xe0   :  { %498 = vmatprep.subr.bf16.mxu1 %v537_v1 }
  0xe3   :  { %499 = vmatpush3.bf16.msra.mxu1 %v512_v14 }
  0xff   :  { %v167_v16 = vpop.f32.mrb[0].mxu0 }
 0x100   :  { %v168_v17 = vadd.f32 %v430_v15, %v167_v16  ;;  %v476_v18 = vpop.f32.mrb[1].mxu0 }
 0x101   :  { %v170_v19 = vpop.f32.mrb[2].mxu0 }
 0x102   :  { %v293_v20 = vpack.c.bf16 %v168_v17, %v168_v17  ;;  %v477_v21 = vpop.f32.mrb[3].mxu0 }
 0x104   :  { %501 = vmatmul.mubr.msk.bf16.vlgmr.msra.gmra.mrb[8].mxu1 %vm60_vm4, %v293_v20 }
 0x1b1   :  { %v287_v23 = vpop.f32.mrb[4].mxu1 }
 0x1b2   :  { %v288_v24 = vadd.f32 %v436_v22, %v287_v23  ;;  %v488_v1 = vpop.f32.mrb[5].mxu1 }
 0x1b3   :  { %v290_v25 = vpop.f32.mrb[6].mxu1 }
 0x1b4   :  { %v298_v26 = vpack.c.bf16 %v288_v24, %v288_v24  ;;  %v489_v27 = vpop.f32.mrb[7].mxu1 }
 0x1b6   :  { %493 = vmatmul.mubr.msk.bf16.vlgmr.msra.gmra.mrb[4].mxu0 %vm300_vm12, %v298_v26 }
 0x1d7   :  { %v400_v28 = vpop.f32.mrb[8].mxu1 }
 0x1d8   :  { %v502_v29 = vpop.f32.mrb[9].mxu1 }
 0x1d9   :  { %v403_v30 = vpop.f32.mrb[10].mxu1 }
 0x1da   :  { %v503_v31 = vpop.f32.mrb[11].mxu1 }
 0x289   :  { %v345_v32 = vpop.f32.mrb[4].mxu0 }
 0x28a   :  { %v401_v34 = vadd.f32 %v400_v28, %v345_v32  ;;  %v494_v35 = vpop.f32.mrb[5].mxu0 }
 0x28b   :  { %v348_v36 = vpop.f32.mrb[6].mxu0 }
 0x28c   :  { %v413_v37 = vadd.f32 %v443_v33, %v401_v34  ;;  %v495_v38 = vpop.f32.mrb[7].mxu0 }
 0x28e   :  { %415 = vst.msk [vmem:[#allocation2] sm:$0x3] %vm414_vm13, %v413_v37 }
 0x28f   :  { %524 = shalt.err (!%p521_p4)
}
 0x290   :  { %s525_s10 = scalar_lea.hbm %s706_s11, 32 }
 0x291   :  { %p526_p5 = scmp.ne.s32.totalorder %s706_s11, %s525_s10  ;;  %p529_p6 = scmp.lt.u32.totalorder %s525_s10, %s706_s11 }
 0x293   :  { %p531_p7 = pnand %p529_p6, %p526_p5 }
 0x295   :  { %534 = shalt.err (!%p531_p7)
}
 0x296   :  { %425 = dma.vmem_to_hbm [thread:$0]  %s423_s25, 32, %s706_s11, [#allocation3]  }
 0x297   :  { %535 = dma.done.wait [#allocation3], 32  }
 0x298   :  { %536 = vsyncadd [#allocation3], 4294967264 }
 0x299   :  { %429 = vsyncpa [#allocation3], 1 }

</bundles_post_ra>
